<compile_context>
chip_gen: v7x
topology: tpu7x:2x2x1
jax: 0.10.0
libtpu: 0.0.40
codegen_flags: <defaults>
</compile_context>

<pallas_src>
import jax
import jax.numpy as jnp
from jax import lax
from jax.experimental import pallas as pl
from jax.experimental.pallas import tpu as pltpu  # noqa: F401  (kept for TPU-specific tuning hooks)

# ---- hyper-parameters (small shapes consistent with the PyTorch module) ----
B               = 2                               # number of graphs / LM sequences
N_NODES         = 16                              # nodes per graph
NODE_FEAT_DIM   = 64                              # stand-in for 768
KG_DIM          = 32
HIDDEN_DIM      = (NODE_FEAT_DIM + KG_DIM) // 2   # analogue of (768 + KG_DIM) // 2
GRAPH_SEQ_DIM   = 8
LM_MAX_LEN      = 16
MODEL_DIM       = 48                              # `model_dim` ctor argument
LM_DIM          = 64
OTK_EPS         = 0.1                             # OTKernel defaults
OTK_MAX_ITER    = 100
SINKHORN_UNROLL = 10                              # 10 unrolled iters x 10 outer trips
LN_EPS          = 1e-5


def _hvv_kg_kernel(adj_ref, feat_ref, lm_ref,
                   w1_ref, b1_ref, w2_ref, b2_ref,
                   wlen_rs_ref, blen_ref,
                   wlm_ref, blm_ref,
                   wo_lm_ref, wo_g_ref, bo_ref,
                   otk_w_ref,
                   lng_ref, lnb_ref,
                   out_ref):
    f32 = jnp.float32

    # shared parameters, loaded once
    w1, b1 = w1_ref[...], b1_ref[...]
    w2, b2 = w2_ref[...], b2_ref[...]
    wlen_rs, blen = wlen_rs_ref[...], blen_ref[...]
    wlm, blm = wlm_ref[...], blm_ref[...]
    wo_lm, wo_g, bo = wo_lm_ref[...], wo_g_ref[...], bo_ref[...]
    otk_w = otk_w_ref[...]
    lng, lnb = lng_ref[...], lnb_ref[...]

    def sdp_self_attn(x, dim):
        # ScaledDotProductAttention: softmax(QK^T / sqrt(dim)) V with Q=K=V=x
        scores = lax.dot_general(x, x, (((1,), (1,)), ((), ())),
                                 preferred_element_type=f32) * (1.0 / float(dim) ** 0.5)
        m = jnp.max(scores, axis=-1, keepdims=True)
        e = jnp.exp(scores - m)
        attn = e * pl.reciprocal(jnp.sum(e, axis=-1, keepdims=True), approx=True)
        return jnp.dot(attn, x, preferred_element_type=f32)

    # ------------ per-batch graph / LM pipelines (tiny, fully unrolled over B) ------------
    Ks, zs = [], []
    for b in range(B):
        AT = adj_ref[b]          # (N, N)  [dst, src] edge weights
        X = feat_ref[b]          # (N, NODE_FEAT_DIM)
        lm = lm_ref[b]           # (LM_MAX_LEN, MODEL_DIM)

        # ---- dgl GraphConv (norm='both') with raw edge weights: count-based degrees ----
        ind = jnp.where(AT != 0.0, 1.0, 0.0)
        in_norm = lax.rsqrt(jnp.maximum(jnp.sum(ind, axis=1, keepdims=True), 1.0))   # (N,1) dst
        out_norm = lax.rsqrt(jnp.maximum(jnp.sum(ind, axis=0, keepdims=True), 1.0))  # (1,N) src
        # fold the source-degree norm into the adjacency columns (shared by both convs)
        a_norm = AT * out_norm

        def gconv(feat, W, bias):
            agg = jnp.dot(a_norm, feat, preferred_element_type=f32)   # D_in^-1/2-pending agg
            h = jnp.dot(agg, W, preferred_element_type=f32)
            return h * in_norm + bias

        h2 = gconv(gconv(X, w1, b1), w2, b2)                          # (N, KG_DIM)

        # ---- dgl MaxPooling over nodes ----
        pooled = jnp.max(h2, axis=0, keepdims=True)                   # (1, KG_DIM)

        # ---- unsqueeze/repeat -> permute -> Linear -> relu -> permute  collapses to
        #      rowsum(W_len) * pooled + bias  because the seq axis is constant ----
        g = jnp.maximum(wlen_rs * pooled + blen, 0.0)                 # (LM_MAX_LEN, KG_DIM)
        ctx_g = sdp_self_attn(g, KG_DIM)

        # ---- LM branch ----
        # TODO(synk): nn.Dropout implemented as identity (inference mode / deterministic).
        lm2 = jnp.maximum(jnp.dot(lm, wlm, preferred_element_type=f32) + blm, 0.0)
        ctx_lm = sdp_self_attn(lm2, LM_DIM)                           # (LM_MAX_LEN, LM_DIM)

        # ---- otk_layer Linear(LM_DIM + KG_DIM, LM_DIM) on concat([lm, graph]) + ReLU ----
        # (weight split into the two concat halves == concatenation, no in-kernel concat)
        z = (jnp.dot(ctx_lm, wo_lm, preferred_element_type=f32)
             + jnp.dot(ctx_g, wo_g, preferred_element_type=f32) + bo)
        z = jnp.maximum(z, 0.0)                                       # (LM_MAX_LEN, LM_DIM)

        # ---- OTKernel Gibbs kernel on l2-normalized features ----
        # TODO(synk): OTKernel internals reconstructed from the OTK reference implementation
        # (exp(<x, ref>/eps) kernel on l2-normalized features + Sinkhorn transport plan).
        zn = z * lax.rsqrt(jnp.maximum(jnp.sum(z * z, axis=-1, keepdims=True), 1e-12))
        sim = lax.dot_general(otk_w, zn, (((1,), (1,)), ((), ())),
                              preferred_element_type=f32)             # (out_size, in_size)
        # per-sample max subtraction: the Sinkhorn plan is invariant to scaling K by a
        # constant, so this is exact while removing the exp(sim/0.1) overflow hazard.
        smax = jnp.max(jnp.max(sim, axis=1, keepdims=True), axis=0, keepdims=True)
        Ks.append(jnp.exp((sim - smax) * (1.0 / OTK_EPS)))
        zs.append(z)

    # ------------ Sinkhorn: B independent chains interleaved, partially unrolled ------------
    a_marg = float(LM_MAX_LEN) / float(LM_MAX_LEN)                    # in_size / out_size
    us = tuple(jnp.ones((LM_MAX_LEN, 1), f32) for _ in range(B))
    vs = tuple(jnp.ones((1, LM_MAX_LEN), f32) for _ in range(B))

    def sinkhorn_block(_, carry):
        us, vs = carry
        for _ in range(SINKHORN_UNROLL):
            new_us, new_vs = [], []
            for b in range(B):
                K = Ks[b]
                u = a_marg * pl.reciprocal(
                    jnp.sum(K * vs[b], axis=1, keepdims=True), approx=True)
                v = pl.reciprocal(
                    jnp.sum(K * u, axis=0, keepdims=True), approx=True)
                new_us.append(u)
                new_vs.append(v)
            us, vs = tuple(new_us), tuple(new_vs)
        return us, vs

    us, vs = lax.fori_loop(0, OTK_MAX_ITER // SINKHORN_UNROLL, sinkhorn_block, (us, vs))

    # ------------ apply transport plan, nan_to_num, LayerNorm(LM_DIM) ------------
    fmax = jnp.finfo(jnp.float32).max
    for b in range(B):
        plan = us[b] * Ks[b] * vs[b]                                  # (out_size, in_size)
        otk = jnp.dot(plan, zs[b], preferred_element_type=f32)        # (LM_MAX_LEN, LM_DIM)
        y = jnp.where(jnp.isnan(otk), 0.0, otk)
        y = jnp.clip(y, -fmax, fmax)                                  # +/-inf -> +/-finfo.max
        mu = jnp.mean(y, axis=-1, keepdims=True)
        var = jnp.mean((y - mu) ** 2, axis=-1, keepdims=True)
        out_ref[b] = (y - mu) * lax.rsqrt(var + LN_EPS) * lng + lnb


def hvv_kg_forward(adj_in, node_feat, lm_input, params):
    (w1, b1, w2, b2, wlen_t, blen, wlm, blm,
     wo_lm, wo_g, bo, otk_w, lng, lnb) = params

    # graph_len_transform acts on a seq-constant input, so only the weight row-sums matter.
    wlen_rowsum = jnp.sum(wlen_t, axis=1, keepdims=True)              # (LM_MAX_LEN, 1)

    # No grid: every operand is tiny, so the whole forward pass (all B batch elements)
    # runs in a single kernel invocation with full arrays resident in VMEM.
    return pl.pallas_call(
        _hvv_kg_kernel,
        out_shape=jax.ShapeDtypeStruct((B, LM_MAX_LEN, LM_DIM), jnp.float32),
    )(adj_in, node_feat, lm_input,
      w1, b1, w2, b2, wlen_rowsum, blen,
      wlm, blm, wo_lm, wo_g, bo, otk_w, lng, lnb)


def init_params(key):
    ks = jax.random.split(key, 10)

    def unif(k, shape, fan_in):
        bound = 1.0 / float(fan_in) ** 0.5
        return jax.random.uniform(k, shape, jnp.float32, -bound, bound)

    w1 = unif(ks[0], (NODE_FEAT_DIM, HIDDEN_DIM), NODE_FEAT_DIM)      # GraphConv1
    b1 = jnp.zeros((1, HIDDEN_DIM), jnp.float32)
    w2 = unif(ks[1], (HIDDEN_DIM, KG_DIM), HIDDEN_DIM)                # GraphConv2
    b2 = jnp.zeros((1, KG_DIM), jnp.float32)
    # graph_len_transform: Linear(GRAPH_SEQ_DIM, LM_MAX_LEN), stored pre-transposed
    wlen_t = unif(ks[2], (LM_MAX_LEN, GRAPH_SEQ_DIM), GRAPH_SEQ_DIM)
    blen = unif(ks[3], (LM_MAX_LEN, 1), GRAPH_SEQ_DIM)
    # lm_transform: Linear(model_dim, LM_DIM)
    wlm = unif(ks[4], (MODEL_DIM, LM_DIM), MODEL_DIM)
    blm = unif(ks[5], (1, LM_DIM), MODEL_DIM)
    # otk Linear(LM_DIM + KG_DIM, LM_DIM), split into the two concat halves
    wo_lm = unif(ks[6], (LM_DIM, LM_DIM), LM_DIM + KG_DIM)
    wo_g = unif(ks[7], (KG_DIM, LM_DIM), LM_DIM + KG_DIM)
    bo = unif(ks[8], (1, LM_DIM), LM_DIM + KG_DIM)
    # OTKernel references: (out_size, in_dim), heads = 1
    otk_w = unif(ks[9], (LM_MAX_LEN, LM_DIM), LM_MAX_LEN)
    # LayerNorm(LM_DIM) default init
    lng = jnp.ones((1, LM_DIM), jnp.float32)
    lnb = jnp.zeros((1, LM_DIM), jnp.float32)
    return (w1, b1, w2, b2, wlen_t, blen, wlm, blm,
            wo_lm, wo_g, bo, otk_w, lng, lnb)


if __name__ == "__main__":
    key = jax.random.PRNGKey(0)
    k_adj, k_w, k_feat, k_lm, k_par = jax.random.split(key, 5)

    # random weighted directed graph per batch element, stored directly as the
    # in-edge adjacency: adj_in[b, dst, src] = weight of edge src->dst (+ self loops).
    mask = (jax.random.uniform(k_adj, (B, N_NODES, N_NODES)) < 0.3).astype(jnp.float32)
    weights = jax.random.uniform(k_w, (B, N_NODES, N_NODES),
                                 minval=0.5, maxval=1.5, dtype=jnp.float32)
    adj_in = jnp.maximum(mask * weights, jnp.eye(N_NODES, dtype=jnp.float32)[None])

    node_feat = jax.random.normal(k_feat, (B, N_NODES, NODE_FEAT_DIM), jnp.float32)
    lm_input = jax.random.normal(k_lm, (B, LM_MAX_LEN, MODEL_DIM), jnp.float32)
    params = init_params(k_par)

    out = hvv_kg_forward(adj_in, node_feat, lm_input, params)
    out = jax.block_until_ready(out)
    assert out.shape == (B, LM_MAX_LEN, LM_DIM), out.shape
    assert bool(jnp.all(jnp.isfinite(out)))
    print("KERNEL_OK")
</pallas_src>

<mosaic_0001>
module attributes {stable_mosaic.version = 11 : i64} {
  func.func @_hvv_kg_kernel(%arg0: memref<2x16x16xf32, #tpu.memory_space<vmem>>, %arg1: memref<2x16x64xf32, #tpu.memory_space<vmem>>, %arg2: memref<2x16x48xf32, #tpu.memory_space<vmem>>, %arg3: memref<64x48xf32, #tpu.memory_space<vmem>>, %arg4: memref<1x48xf32, #tpu.memory_space<vmem>>, %arg5: memref<48x32xf32, #tpu.memory_space<vmem>>, %arg6: memref<1x32xf32, #tpu.memory_space<vmem>>, %arg7: memref<16x1xf32, #tpu.memory_space<vmem>>, %arg8: memref<16x1xf32, #tpu.memory_space<vmem>>, %arg9: memref<48x64xf32, #tpu.memory_space<vmem>>, %arg10: memref<1x64xf32, #tpu.memory_space<vmem>>, %arg11: memref<64x64xf32, #tpu.memory_space<vmem>>, %arg12: memref<32x64xf32, #tpu.memory_space<vmem>>, %arg13: memref<1x64xf32, #tpu.memory_space<vmem>>, %arg14: memref<16x64xf32, #tpu.memory_space<vmem>>, %arg15: memref<1x64xf32, #tpu.memory_space<vmem>>, %arg16: memref<1x64xf32, #tpu.memory_space<vmem>>, %arg17: memref<2x16x64xf32, #tpu.memory_space<vmem>>) attributes {dimension_semantics = [], scalar_prefetch = 0 : i64, scratch_operands = 0 : i64, tpu.core_type = #tpu.core_type<tc>} {
    %c0 = arith.constant 0 : index
    %c0_0 = arith.constant 0 : index
    %0 = vector.load %arg3[%c0, %c0_0] : memref<64x48xf32, #tpu.memory_space<vmem>>, vector<64x48xf32>
    %c0_1 = arith.constant 0 : index
    %c0_2 = arith.constant 0 : index
    %1 = vector.load %arg4[%c0_1, %c0_2] : memref<1x48xf32, #tpu.memory_space<vmem>>, vector<1x48xf32>
    %c0_3 = arith.constant 0 : index
    %c0_4 = arith.constant 0 : index
    %2 = vector.load %arg5[%c0_3, %c0_4] : memref<48x32xf32, #tpu.memory_space<vmem>>, vector<48x32xf32>
    %c0_5 = arith.constant 0 : index
    %c0_6 = arith.constant 0 : index
    %3 = vector.load %arg6[%c0_5, %c0_6] : memref<1x32xf32, #tpu.memory_space<vmem>>, vector<1x32xf32>
    %c0_7 = arith.constant 0 : index
    %c0_8 = arith.constant 0 : index
    %4 = vector.load %arg7[%c0_7, %c0_8] : memref<16x1xf32, #tpu.memory_space<vmem>>, vector<16x1xf32>
    %c0_9 = arith.constant 0 : index
    %c0_10 = arith.constant 0 : index
    %5 = vector.load %arg8[%c0_9, %c0_10] : memref<16x1xf32, #tpu.memory_space<vmem>>, vector<16x1xf32>
    %c0_11 = arith.constant 0 : index
    %c0_12 = arith.constant 0 : index
    %6 = vector.load %arg9[%c0_11, %c0_12] : memref<48x64xf32, #tpu.memory_space<vmem>>, vector<48x64xf32>
    %c0_13 = arith.constant 0 : index
    %c0_14 = arith.constant 0 : index
    %7 = vector.load %arg10[%c0_13, %c0_14] : memref<1x64xf32, #tpu.memory_space<vmem>>, vector<1x64xf32>
    %c0_15 = arith.constant 0 : index
    %c0_16 = arith.constant 0 : index
    %8 = vector.load %arg11[%c0_15, %c0_16] : memref<64x64xf32, #tpu.memory_space<vmem>>, vector<64x64xf32>
    %c0_17 = arith.constant 0 : index
    %c0_18 = arith.constant 0 : index
    %9 = vector.load %arg12[%c0_17, %c0_18] : memref<32x64xf32, #tpu.memory_space<vmem>>, vector<32x64xf32>
    %c0_19 = arith.constant 0 : index
    %c0_20 = arith.constant 0 : index
    %10 = vector.load %arg13[%c0_19, %c0_20] : memref<1x64xf32, #tpu.memory_space<vmem>>, vector<1x64xf32>
    %c0_21 = arith.constant 0 : index
    %c0_22 = arith.constant 0 : index
    %11 = vector.load %arg14[%c0_21, %c0_22] : memref<16x64xf32, #tpu.memory_space<vmem>>, vector<16x64xf32>
    %c0_23 = arith.constant 0 : index
    %c0_24 = arith.constant 0 : index
    %12 = vector.load %arg15[%c0_23, %c0_24] : memref<1x64xf32, #tpu.memory_space<vmem>>, vector<1x64xf32>
    %c0_25 = arith.constant 0 : index
    %c0_26 = arith.constant 0 : index
    %13 = vector.load %arg16[%c0_25, %c0_26] : memref<1x64xf32, #tpu.memory_space<vmem>>, vector<1x64xf32>
    %c0_27 = arith.constant 0 : index
    %c0_28 = arith.constant 0 : index
    %c0_29 = arith.constant 0 : index
    %14 = vector.load %arg0[%c0_27, %c0_28, %c0_29] : memref<2x16x16xf32, #tpu.memory_space<vmem>>, vector<1x16x16xf32>
    %15 = vector.shape_cast %14 : vector<1x16x16xf32> to vector<16x16xf32>
    %c0_30 = arith.constant 0 : index
    %c0_31 = arith.constant 0 : index
    %c0_32 = arith.constant 0 : index
    %16 = vector.load %arg1[%c0_30, %c0_31, %c0_32] : memref<2x16x64xf32, #tpu.memory_space<vmem>>, vector<1x16x64xf32>
    %17 = vector.shape_cast %16 : vector<1x16x64xf32> to vector<16x64xf32>
    %c0_33 = arith.constant 0 : index
    %c0_34 = arith.constant 0 : index
    %c0_35 = arith.constant 0 : index
    %18 = vector.load %arg2[%c0_33, %c0_34, %c0_35] : memref<2x16x48xf32, #tpu.memory_space<vmem>>, vector<1x16x48xf32>
    %19 = vector.shape_cast %18 : vector<1x16x48xf32> to vector<16x48xf32>
    %cst = arith.constant 0.000000e+00 : f32
    %20 = vector.broadcast %cst : f32 to vector<16x16xf32>
    %21 = arith.cmpf one, %15, %20 : vector<16x16xf32>
    %cst_36 = arith.constant 1.000000e+00 : f32
    %cst_37 = arith.constant 0.000000e+00 : f32
    %22 = vector.broadcast %cst_36 : f32 to vector<16x16xf32>
    %23 = vector.broadcast %cst_37 : f32 to vector<16x16xf32>
    %24 = arith.select %21, %22, %23 : vector<16x16xi1>, vector<16x16xf32>
    %cst_38 = arith.constant dense<0.000000e+00> : vector<16xf32>
    %25 = vector.multi_reduction <add>, %24, %cst_38 [1] : vector<16x16xf32> to vector<16xf32>
    %26 = vector.shape_cast %25 : vector<16xf32> to vector<16x1xf32>
    %cst_39 = arith.constant 1.000000e+00 : f32
    %27 = vector.broadcast %cst_39 : f32 to vector<16x1xf32>
    %28 = arith.maximumf %26, %27 : vector<16x1xf32>
    %29 = math.rsqrt %28 : vector<16x1xf32>
    %cst_40 = arith.constant dense<0.000000e+00> : vector<16xf32>
    %30 = vector.multi_reduction <add>, %24, %cst_40 [0] : vector<16x16xf32> to vector<16xf32>
    %31 = vector.shape_cast %30 : vector<16xf32> to vector<1x16xf32>
    %cst_41 = arith.constant 1.000000e+00 : f32
    %32 = vector.broadcast %cst_41 : f32 to vector<1x16xf32>
    %33 = arith.maximumf %31, %32 : vector<1x16xf32>
    %34 = math.rsqrt %33 : vector<1x16xf32>
    %35 = vector.broadcast %34 : vector<1x16xf32> to vector<16x16xf32>
    %36 = arith.mulf %15, %35 : vector<16x16xf32>
    %cst_42 = arith.constant dense<0.000000e+00> : vector<16x64xf32>
    %37 = tpu.matmul %36, %17, %cst_42 {dimension_numbers = #tpu.dot_dimension_numbers<[1], [0], [0], [1], [0, 0, 1, 1], [], []>} : vector<16x16xf32>, vector<16x64xf32>, vector<16x64xf32> -> vector<16x64xf32>
    %cst_43 = arith.constant dense<0.000000e+00> : vector<16x48xf32>
    %38 = tpu.matmul %37, %0, %cst_43 {dimension_numbers = #tpu.dot_dimension_numbers<[1], [0], [0], [1], [0, 0, 1, 1], [], []>} : vector<16x64xf32>, vector<64x48xf32>, vector<16x48xf32> -> vector<16x48xf32>
    %39 = vector.broadcast %29 : vector<16x1xf32> to vector<16x48xf32>
    %40 = arith.mulf %38, %39 : vector<16x48xf32>
    %41 = vector.broadcast %1 : vector<1x48xf32> to vector<16x48xf32>
    %42 = arith.addf %40, %41 : vector<16x48xf32>
    %cst_44 = arith.constant dense<0.000000e+00> : vector<16x48xf32>
    %43 = tpu.matmul %36, %42, %cst_44 {dimension_numbers = #tpu.dot_dimension_numbers<[1], [0], [0], [1], [0, 0, 1, 1], [], []>} : vector<16x16xf32>, vector<16x48xf32>, vector<16x48xf32> -> vector<16x48xf32>
    %cst_45 = arith.constant dense<0.000000e+00> : vector<16x32xf32>
    %44 = tpu.matmul %43, %2, %cst_45 {dimension_numbers = #tpu.dot_dimension_numbers<[1], [0], [0], [1], [0, 0, 1, 1], [], []>} : vector<16x48xf32>, vector<48x32xf32>, vector<16x32xf32> -> vector<16x32xf32>
    %45 = vector.broadcast %29 : vector<16x1xf32> to vector<16x32xf32>
    %46 = arith.mulf %44, %45 : vector<16x32xf32>
    %47 = vector.broadcast %3 : vector<1x32xf32> to vector<16x32xf32>
    %48 = arith.addf %46, %47 : vector<16x32xf32>
    %cst_46 = arith.constant dense<0xFF800000> : vector<32xf32>
    %49 = vector.multi_reduction <maximumf>, %48, %cst_46 [0] : vector<16x32xf32> to vector<32xf32>
    %50 = vector.shape_cast %49 : vector<32xf32> to vector<1x32xf32>
    %51 = vector.broadcast %4 : vector<16x1xf32> to vector<16x32xf32>
    %52 = vector.broadcast %50 : vector<1x32xf32> to vector<16x32xf32>
    %53 = arith.mulf %51, %52 : vector<16x32xf32>
    %54 = vector.broadcast %5 : vector<16x1xf32> to vector<16x32xf32>
    %55 = arith.addf %53, %54 : vector<16x32xf32>
    %cst_47 = arith.constant 0.000000e+00 : f32
    %56 = vector.broadcast %cst_47 : f32 to vector<16x32xf32>
    %57 = arith.maximumf %55, %56 : vector<16x32xf32>
    %cst_48 = arith.constant dense<0.000000e+00> : vector<16x16xf32>
    %58 = tpu.matmul %57, %57, %cst_48 {dimension_numbers = #tpu.dot_dimension_numbers<[1], [1], [0], [0], [0, 0, 1, 0], [], []>} : vector<16x32xf32>, vector<16x32xf32>, vector<16x16xf32> -> vector<16x16xf32>
    %cst_49 = arith.constant 0.176776692 : f32
    %59 = vector.broadcast %cst_49 : f32 to vector<16x16xf32>
    %60 = arith.mulf %58, %59 : vector<16x16xf32>
    %cst_50 = arith.constant dense<0xFF800000> : vector<16xf32>
    %61 = vector.multi_reduction <maximumf>, %60, %cst_50 [1] : vector<16x16xf32> to vector<16xf32>
    %62 = vector.shape_cast %61 : vector<16xf32> to vector<16x1xf32>
    %63 = vector.broadcast %62 : vector<16x1xf32> to vector<16x16xf32>
    %64 = arith.subf %60, %63 : vector<16x16xf32>
    %65 = math.exp %64 : vector<16x16xf32>
    %cst_51 = arith.constant dense<0.000000e+00> : vector<16xf32>
    %66 = vector.multi_reduction <add>, %65, %cst_51 [1] : vector<16x16xf32> to vector<16xf32>
    %67 = vector.shape_cast %66 : vector<16xf32> to vector<16x1xf32>
    %68 = tpu.reciprocal %67 {approx = true} : vector<16x1xf32> -> vector<16x1xf32>
    %69 = vector.broadcast %68 : vector<16x1xf32> to vector<16x16xf32>
    %70 = arith.mulf %65, %69 : vector<16x16xf32>
    %cst_52 = arith.constant dense<0.000000e+00> : vector<16x32xf32>
    %71 = tpu.matmul %70, %57, %cst_52 {dimension_numbers = #tpu.dot_dimension_numbers<[1], [0], [0], [1], [0, 0, 1, 1], [], []>} : vector<16x16xf32>, vector<16x32xf32>, vector<16x32xf32> -> vector<16x32xf32>
    %cst_53 = arith.constant dense<0.000000e+00> : vector<16x64xf32>
    %72 = tpu.matmul %19, %6, %cst_53 {dimension_numbers = #tpu.dot_dimension_numbers<[1], [0], [0], [1], [0, 0, 1, 1], [], []>} : vector<16x48xf32>, vector<48x64xf32>, vector<16x64xf32> -> vector<16x64xf32>
    %73 = vector.broadcast %7 : vector<1x64xf32> to vector<16x64xf32>
    %74 = arith.addf %72, %73 : vector<16x64xf32>
    %cst_54 = arith.constant 0.000000e+00 : f32
    %75 = vector.broadcast %cst_54 : f32 to vector<16x64xf32>
    %76 = arith.maximumf %74, %75 : vector<16x64xf32>
    %cst_55 = arith.constant dense<0.000000e+00> : vector<16x16xf32>
    %77 = tpu.matmul %76, %76, %cst_55 {dimension_numbers = #tpu.dot_dimension_numbers<[1], [1], [0], [0], [0, 0, 1, 0], [], []>} : vector<16x64xf32>, vector<16x64xf32>, vector<16x16xf32> -> vector<16x16xf32>
    %cst_56 = arith.constant 1.250000e-01 : f32
    %78 = vector.broadcast %cst_56 : f32 to vector<16x16xf32>
    %79 = arith.mulf %77, %78 : vector<16x16xf32>
    %cst_57 = arith.constant dense<0xFF800000> : vector<16xf32>
    %80 = vector.multi_reduction <maximumf>, %79, %cst_57 [1] : vector<16x16xf32> to vector<16xf32>
    %81 = vector.shape_cast %80 : vector<16xf32> to vector<16x1xf32>
    %82 = vector.broadcast %81 : vector<16x1xf32> to vector<16x16xf32>
    %83 = arith.subf %79, %82 : vector<16x16xf32>
    %84 = math.exp %83 : vector<16x16xf32>
    %cst_58 = arith.constant dense<0.000000e+00> : vector<16xf32>
    %85 = vector.multi_reduction <add>, %84, %cst_58 [1] : vector<16x16xf32> to vector<16xf32>
    %86 = vector.shape_cast %85 : vector<16xf32> to vector<16x1xf32>
    %87 = tpu.reciprocal %86 {approx = true} : vector<16x1xf32> -> vector<16x1xf32>
    %88 = vector.broadcast %87 : vector<16x1xf32> to vector<16x16xf32>
    %89 = arith.mulf %84, %88 : vector<16x16xf32>
    %cst_59 = arith.constant dense<0.000000e+00> : vector<16x64xf32>
    %90 = tpu.matmul %89, %76, %cst_59 {dimension_numbers = #tpu.dot_dimension_numbers<[1], [0], [0], [1], [0, 0, 1, 1], [], []>} : vector<16x16xf32>, vector<16x64xf32>, vector<16x64xf32> -> vector<16x64xf32>
    %cst_60 = arith.constant dense<0.000000e+00> : vector<16x64xf32>
    %91 = tpu.matmul %90, %8, %cst_60 {dimension_numbers = #tpu.dot_dimension_numbers<[1], [0], [0], [1], [0, 0, 1, 1], [], []>} : vector<16x64xf32>, vector<64x64xf32>, vector<16x64xf32> -> vector<16x64xf32>
    %cst_61 = arith.constant dense<0.000000e+00> : vector<16x64xf32>
    %92 = tpu.matmul %71, %9, %cst_61 {dimension_numbers = #tpu.dot_dimension_numbers<[1], [0], [0], [1], [0, 0, 1, 1], [], []>} : vector<16x32xf32>, vector<32x64xf32>, vector<16x64xf32> -> vector<16x64xf32>
    %93 = arith.addf %91, %92 : vector<16x64xf32>
    %94 = vector.broadcast %10 : vector<1x64xf32> to vector<16x64xf32>
    %95 = arith.addf %93, %94 : vector<16x64xf32>
    %cst_62 = arith.constant 0.000000e+00 : f32
    %96 = vector.broadcast %cst_62 : f32 to vector<16x64xf32>
    %97 = arith.maximumf %95, %96 : vector<16x64xf32>
    %98 = arith.mulf %97, %97 : vector<16x64xf32>
    %cst_63 = arith.constant dense<0.000000e+00> : vector<16xf32>
    %99 = vector.multi_reduction <add>, %98, %cst_63 [1] : vector<16x64xf32> to vector<16xf32>
    %100 = vector.shape_cast %99 : vector<16xf32> to vector<16x1xf32>
    %cst_64 = arith.constant 9.99999996E-13 : f32
    %101 = vector.broadcast %cst_64 : f32 to vector<16x1xf32>
    %102 = arith.maximumf %100, %101 : vector<16x1xf32>
    %103 = math.rsqrt %102 : vector<16x1xf32>
    %104 = vector.broadcast %103 : vector<16x1xf32> to vector<16x64xf32>
    %105 = arith.mulf %97, %104 : vector<16x64xf32>
    %cst_65 = arith.constant dense<0.000000e+00> : vector<16x16xf32>
    %106 = tpu.matmul %11, %105, %cst_65 {dimension_numbers = #tpu.dot_dimension_numbers<[1], [1], [0], [0], [0, 0, 1, 0], [], []>} : vector<16x64xf32>, vector<16x64xf32>, vector<16x16xf32> -> vector<16x16xf32>
    %cst_66 = arith.constant dense<0xFF800000> : vector<16xf32>
    %107 = vector.multi_reduction <maximumf>, %106, %cst_66 [1] : vector<16x16xf32> to vector<16xf32>
    %108 = vector.shape_cast %107 : vector<16xf32> to vector<16x1xf32>
    %cst_67 = arith.constant dense<0xFF800000> : vector<1xf32>
    %109 = vector.multi_reduction <maximumf>, %108, %cst_67 [0] : vector<16x1xf32> to vector<1xf32>
    %110 = vector.shape_cast %109 : vector<1xf32> to vector<1x1xf32>
    %111 = vector.broadcast %110 : vector<1x1xf32> to vector<16x16xf32>
    %112 = arith.subf %106, %111 : vector<16x16xf32>
    %cst_68 = arith.constant 1.000000e+01 : f32
    %113 = vector.broadcast %cst_68 : f32 to vector<16x16xf32>
    %114 = arith.mulf %112, %113 : vector<16x16xf32>
    %115 = math.exp %114 : vector<16x16xf32>
    %c1 = arith.constant 1 : index
    %c0_69 = arith.constant 0 : index
    %c0_70 = arith.constant 0 : index
    %116 = vector.load %arg0[%c1, %c0_69, %c0_70] : memref<2x16x16xf32, #tpu.memory_space<vmem>>, vector<1x16x16xf32>
    %117 = vector.shape_cast %116 : vector<1x16x16xf32> to vector<16x16xf32>
    %c1_71 = arith.constant 1 : index
    %c0_72 = arith.constant 0 : index
    %c0_73 = arith.constant 0 : index
    %118 = vector.load %arg1[%c1_71, %c0_72, %c0_73] : memref<2x16x64xf32, #tpu.memory_space<vmem>>, vector<1x16x64xf32>
    %119 = vector.shape_cast %118 : vector<1x16x64xf32> to vector<16x64xf32>
    %c1_74 = arith.constant 1 : index
    %c0_75 = arith.constant 0 : index
    %c0_76 = arith.constant 0 : index
    %120 = vector.load %arg2[%c1_74, %c0_75, %c0_76] : memref<2x16x48xf32, #tpu.memory_space<vmem>>, vector<1x16x48xf32>
    %121 = vector.shape_cast %120 : vector<1x16x48xf32> to vector<16x48xf32>
    %cst_77 = arith.constant 0.000000e+00 : f32
    %122 = vector.broadcast %cst_77 : f32 to vector<16x16xf32>
    %123 = arith.cmpf one, %117, %122 : vector<16x16xf32>
    %cst_78 = arith.constant 1.000000e+00 : f32
    %cst_79 = arith.constant 0.000000e+00 : f32
    %124 = vector.broadcast %cst_78 : f32 to vector<16x16xf32>
    %125 = vector.broadcast %cst_79 : f32 to vector<16x16xf32>
    %126 = arith.select %123, %124, %125 : vector<16x16xi1>, vector<16x16xf32>
    %cst_80 = arith.constant dense<0.000000e+00> : vector<16xf32>
    %127 = vector.multi_reduction <add>, %126, %cst_80 [1] : vector<16x16xf32> to vector<16xf32>
    %128 = vector.shape_cast %127 : vector<16xf32> to vector<16x1xf32>
    %cst_81 = arith.constant 1.000000e+00 : f32
    %129 = vector.broadcast %cst_81 : f32 to vector<16x1xf32>
    %130 = arith.maximumf %128, %129 : vector<16x1xf32>
    %131 = math.rsqrt %130 : vector<16x1xf32>
    %cst_82 = arith.constant dense<0.000000e+00> : vector<16xf32>
    %132 = vector.multi_reduction <add>, %126, %cst_82 [0] : vector<16x16xf32> to vector<16xf32>
    %133 = vector.shape_cast %132 : vector<16xf32> to vector<1x16xf32>
    %cst_83 = arith.constant 1.000000e+00 : f32
    %134 = vector.broadcast %cst_83 : f32 to vector<1x16xf32>
    %135 = arith.maximumf %133, %134 : vector<1x16xf32>
    %136 = math.rsqrt %135 : vector<1x16xf32>
    %137 = vector.broadcast %136 : vector<1x16xf32> to vector<16x16xf32>
    %138 = arith.mulf %117, %137 : vector<16x16xf32>
    %cst_84 = arith.constant dense<0.000000e+00> : vector<16x64xf32>
    %139 = tpu.matmul %138, %119, %cst_84 {dimension_numbers = #tpu.dot_dimension_numbers<[1], [0], [0], [1], [0, 0, 1, 1], [], []>} : vector<16x16xf32>, vector<16x64xf32>, vector<16x64xf32> -> vector<16x64xf32>
    %cst_85 = arith.constant dense<0.000000e+00> : vector<16x48xf32>
    %140 = tpu.matmul %139, %0, %cst_85 {dimension_numbers = #tpu.dot_dimension_numbers<[1], [0], [0], [1], [0, 0, 1, 1], [], []>} : vector<16x64xf32>, vector<64x48xf32>, vector<16x48xf32> -> vector<16x48xf32>
    %141 = vector.broadcast %131 : vector<16x1xf32> to vector<16x48xf32>
    %142 = arith.mulf %140, %141 : vector<16x48xf32>
    %143 = vector.broadcast %1 : vector<1x48xf32> to vector<16x48xf32>
    %144 = arith.addf %142, %143 : vector<16x48xf32>
    %cst_86 = arith.constant dense<0.000000e+00> : vector<16x48xf32>
    %145 = tpu.matmul %138, %144, %cst_86 {dimension_numbers = #tpu.dot_dimension_numbers<[1], [0], [0], [1], [0, 0, 1, 1], [], []>} : vector<16x16xf32>, vector<16x48xf32>, vector<16x48xf32> -> vector<16x48xf32>
    %cst_87 = arith.constant dense<0.000000e+00> : vector<16x32xf32>
    %146 = tpu.matmul %145, %2, %cst_87 {dimension_numbers = #tpu.dot_dimension_numbers<[1], [0], [0], [1], [0, 0, 1, 1], [], []>} : vector<16x48xf32>, vector<48x32xf32>, vector<16x32xf32> -> vector<16x32xf32>
    %147 = vector.broadcast %131 : vector<16x1xf32> to vector<16x32xf32>
    %148 = arith.mulf %146, %147 : vector<16x32xf32>
    %149 = vector.broadcast %3 : vector<1x32xf32> to vector<16x32xf32>
    %150 = arith.addf %148, %149 : vector<16x32xf32>
    %cst_88 = arith.constant dense<0xFF800000> : vector<32xf32>
    %151 = vector.multi_reduction <maximumf>, %150, %cst_88 [0] : vector<16x32xf32> to vector<32xf32>
    %152 = vector.shape_cast %151 : vector<32xf32> to vector<1x32xf32>
    %153 = vector.broadcast %4 : vector<16x1xf32> to vector<16x32xf32>
    %154 = vector.broadcast %152 : vector<1x32xf32> to vector<16x32xf32>
    %155 = arith.mulf %153, %154 : vector<16x32xf32>
    %156 = vector.broadcast %5 : vector<16x1xf32> to vector<16x32xf32>
    %157 = arith.addf %155, %156 : vector<16x32xf32>
    %cst_89 = arith.constant 0.000000e+00 : f32
    %158 = vector.broadcast %cst_89 : f32 to vector<16x32xf32>
    %159 = arith.maximumf %157, %158 : vector<16x32xf32>
    %cst_90 = arith.constant dense<0.000000e+00> : vector<16x16xf32>
    %160 = tpu.matmul %159, %159, %cst_90 {dimension_numbers = #tpu.dot_dimension_numbers<[1], [1], [0], [0], [0, 0, 1, 0], [], []>} : vector<16x32xf32>, vector<16x32xf32>, vector<16x16xf32> -> vector<16x16xf32>
    %cst_91 = arith.constant 0.176776692 : f32
    %161 = vector.broadcast %cst_91 : f32 to vector<16x16xf32>
    %162 = arith.mulf %160, %161 : vector<16x16xf32>
    %cst_92 = arith.constant dense<0xFF800000> : vector<16xf32>
    %163 = vector.multi_reduction <maximumf>, %162, %cst_92 [1] : vector<16x16xf32> to vector<16xf32>
    %164 = vector.shape_cast %163 : vector<16xf32> to vector<16x1xf32>
    %165 = vector.broadcast %164 : vector<16x1xf32> to vector<16x16xf32>
    %166 = arith.subf %162, %165 : vector<16x16xf32>
    %167 = math.exp %166 : vector<16x16xf32>
    %cst_93 = arith.constant dense<0.000000e+00> : vector<16xf32>
    %168 = vector.multi_reduction <add>, %167, %cst_93 [1] : vector<16x16xf32> to vector<16xf32>
    %169 = vector.shape_cast %168 : vector<16xf32> to vector<16x1xf32>
    %170 = tpu.reciprocal %169 {approx = true} : vector<16x1xf32> -> vector<16x1xf32>
    %171 = vector.broadcast %170 : vector<16x1xf32> to vector<16x16xf32>
    %172 = arith.mulf %167, %171 : vector<16x16xf32>
    %cst_94 = arith.constant dense<0.000000e+00> : vector<16x32xf32>
    %173 = tpu.matmul %172, %159, %cst_94 {dimension_numbers = #tpu.dot_dimension_numbers<[1], [0], [0], [1], [0, 0, 1, 1], [], []>} : vector<16x16xf32>, vector<16x32xf32>, vector<16x32xf32> -> vector<16x32xf32>
    %cst_95 = arith.constant dense<0.000000e+00> : vector<16x64xf32>
    %174 = tpu.matmul %121, %6, %cst_95 {dimension_numbers = #tpu.dot_dimension_numbers<[1], [0], [0], [1], [0, 0, 1, 1], [], []>} : vector<16x48xf32>, vector<48x64xf32>, vector<16x64xf32> -> vector<16x64xf32>
    %175 = vector.broadcast %7 : vector<1x64xf32> to vector<16x64xf32>
    %176 = arith.addf %174, %175 : vector<16x64xf32>
    %cst_96 = arith.constant 0.000000e+00 : f32
    %177 = vector.broadcast %cst_96 : f32 to vector<16x64xf32>
    %178 = arith.maximumf %176, %177 : vector<16x64xf32>
    %cst_97 = arith.constant dense<0.000000e+00> : vector<16x16xf32>
    %179 = tpu.matmul %178, %178, %cst_97 {dimension_numbers = #tpu.dot_dimension_numbers<[1], [1], [0], [0], [0, 0, 1, 0], [], []>} : vector<16x64xf32>, vector<16x64xf32>, vector<16x16xf32> -> vector<16x16xf32>
    %cst_98 = arith.constant 1.250000e-01 : f32
    %180 = vector.broadcast %cst_98 : f32 to vector<16x16xf32>
    %181 = arith.mulf %179, %180 : vector<16x16xf32>
    %cst_99 = arith.constant dense<0xFF800000> : vector<16xf32>
    %182 = vector.multi_reduction <maximumf>, %181, %cst_99 [1] : vector<16x16xf32> to vector<16xf32>
    %183 = vector.shape_cast %182 : vector<16xf32> to vector<16x1xf32>
    %184 = vector.broadcast %183 : vector<16x1xf32> to vector<16x16xf32>
    %185 = arith.subf %181, %184 : vector<16x16xf32>
    %186 = math.exp %185 : vector<16x16xf32>
    %cst_100 = arith.constant dense<0.000000e+00> : vector<16xf32>
    %187 = vector.multi_reduction <add>, %186, %cst_100 [1] : vector<16x16xf32> to vector<16xf32>
    %188 = vector.shape_cast %187 : vector<16xf32> to vector<16x1xf32>
    %189 = tpu.reciprocal %188 {approx = true} : vector<16x1xf32> -> vector<16x1xf32>
    %190 = vector.broadcast %189 : vector<16x1xf32> to vector<16x16xf32>
    %191 = arith.mulf %186, %190 : vector<16x16xf32>
    %cst_101 = arith.constant dense<0.000000e+00> : vector<16x64xf32>
    %192 = tpu.matmul %191, %178, %cst_101 {dimension_numbers = #tpu.dot_dimension_numbers<[1], [0], [0], [1], [0, 0, 1, 1], [], []>} : vector<16x16xf32>, vector<16x64xf32>, vector<16x64xf32> -> vector<16x64xf32>
    %cst_102 = arith.constant dense<0.000000e+00> : vector<16x64xf32>
    %193 = tpu.matmul %192, %8, %cst_102 {dimension_numbers = #tpu.dot_dimension_numbers<[1], [0], [0], [1], [0, 0, 1, 1], [], []>} : vector<16x64xf32>, vector<64x64xf32>, vector<16x64xf32> -> vector<16x64xf32>
    %cst_103 = arith.constant dense<0.000000e+00> : vector<16x64xf32>
    %194 = tpu.matmul %173, %9, %cst_103 {dimension_numbers = #tpu.dot_dimension_numbers<[1], [0], [0], [1], [0, 0, 1, 1], [], []>} : vector<16x32xf32>, vector<32x64xf32>, vector<16x64xf32> -> vector<16x64xf32>
    %195 = arith.addf %193, %194 : vector<16x64xf32>
    %196 = vector.broadcast %10 : vector<1x64xf32> to vector<16x64xf32>
    %197 = arith.addf %195, %196 : vector<16x64xf32>
    %cst_104 = arith.constant 0.000000e+00 : f32
    %198 = vector.broadcast %cst_104 : f32 to vector<16x64xf32>
    %199 = arith.maximumf %197, %198 : vector<16x64xf32>
    %200 = arith.mulf %199, %199 : vector<16x64xf32>
    %cst_105 = arith.constant dense<0.000000e+00> : vector<16xf32>
    %201 = vector.multi_reduction <add>, %200, %cst_105 [1] : vector<16x64xf32> to vector<16xf32>
    %202 = vector.shape_cast %201 : vector<16xf32> to vector<16x1xf32>
    %cst_106 = arith.constant 9.99999996E-13 : f32
    %203 = vector.broadcast %cst_106 : f32 to vector<16x1xf32>
    %204 = arith.maximumf %202, %203 : vector<16x1xf32>
    %205 = math.rsqrt %204 : vector<16x1xf32>
    %206 = vector.broadcast %205 : vector<16x1xf32> to vector<16x64xf32>
    %207 = arith.mulf %199, %206 : vector<16x64xf32>
    %cst_107 = arith.constant dense<0.000000e+00> : vector<16x16xf32>
    %208 = tpu.matmul %11, %207, %cst_107 {dimension_numbers = #tpu.dot_dimension_numbers<[1], [1], [0], [0], [0, 0, 1, 0], [], []>} : vector<16x64xf32>, vector<16x64xf32>, vector<16x16xf32> -> vector<16x16xf32>
    %cst_108 = arith.constant dense<0xFF800000> : vector<16xf32>
    %209 = vector.multi_reduction <maximumf>, %208, %cst_108 [1] : vector<16x16xf32> to vector<16xf32>
    %210 = vector.shape_cast %209 : vector<16xf32> to vector<16x1xf32>
    %cst_109 = arith.constant dense<0xFF800000> : vector<1xf32>
    %211 = vector.multi_reduction <maximumf>, %210, %cst_109 [0] : vector<16x1xf32> to vector<1xf32>
    %212 = vector.shape_cast %211 : vector<1xf32> to vector<1x1xf32>
    %213 = vector.broadcast %212 : vector<1x1xf32> to vector<16x16xf32>
    %214 = arith.subf %208, %213 : vector<16x16xf32>
    %cst_110 = arith.constant 1.000000e+01 : f32
    %215 = vector.broadcast %cst_110 : f32 to vector<16x16xf32>
    %216 = arith.mulf %214, %215 : vector<16x16xf32>
    %217 = math.exp %216 : vector<16x16xf32>
    %cst_111 = arith.constant 1.000000e+00 : f32
    %218 = vector.broadcast %cst_111 : f32 to vector<16x1xf32>
    %cst_112 = arith.constant 1.000000e+00 : f32
    %219 = vector.broadcast %cst_112 : f32 to vector<16x1xf32>
    %cst_113 = arith.constant 1.000000e+00 : f32
    %220 = vector.broadcast %cst_113 : f32 to vector<1x16xf32>
    %cst_114 = arith.constant 1.000000e+00 : f32
    %221 = vector.broadcast %cst_114 : f32 to vector<1x16xf32>
    %c0_i32 = arith.constant 0 : i32
    %c10_i32 = arith.constant 10 : i32
    %222 = arith.addi %c0_i32, %c10_i32 : i32
    %c1_i32 = arith.constant 1 : i32
    %223:4 = scf.for %arg18 = %c0_i32 to %222 step %c1_i32 iter_args(%arg19 = %218, %arg20 = %219, %arg21 = %220, %arg22 = %221) -> (vector<16x1xf32>, vector<16x1xf32>, vector<1x16xf32>, vector<1x16xf32>)  : i32 {
      %298 = vector.broadcast %arg21 : vector<1x16xf32> to vector<16x16xf32>
      %299 = arith.mulf %115, %298 : vector<16x16xf32>
      %cst_139 = arith.constant dense<0.000000e+00> : vector<16xf32>
      %300 = vector.multi_reduction <add>, %299, %cst_139 [1] : vector<16x16xf32> to vector<16xf32>
      %301 = vector.shape_cast %300 : vector<16xf32> to vector<16x1xf32>
      %302 = tpu.reciprocal %301 {approx = true} : vector<16x1xf32> -> vector<16x1xf32>
      %cst_140 = arith.constant 1.000000e+00 : f32
      %303 = vector.broadcast %cst_140 : f32 to vector<16x1xf32>
      %304 = arith.mulf %303, %302 : vector<16x1xf32>
      %305 = vector.broadcast %304 : vector<16x1xf32> to vector<16x16xf32>
      %306 = arith.mulf %115, %305 : vector<16x16xf32>
      %cst_141 = arith.constant dense<0.000000e+00> : vector<16xf32>
      %307 = vector.multi_reduction <add>, %306, %cst_141 [0] : vector<16x16xf32> to vector<16xf32>
      %308 = vector.shape_cast %307 : vector<16xf32> to vector<1x16xf32>
      %309 = tpu.reciprocal %308 {approx = true} : vector<1x16xf32> -> vector<1x16xf32>
      %310 = vector.broadcast %arg22 : vector<1x16xf32> to vector<16x16xf32>
      %311 = arith.mulf %217, %310 : vector<16x16xf32>
      %cst_142 = arith.constant dense<0.000000e+00> : vector<16xf32>
      %312 = vector.multi_reduction <add>, %311, %cst_142 [1] : vector<16x16xf32> to vector<16xf32>
      %313 = vector.shape_cast %312 : vector<16xf32> to vector<16x1xf32>
      %314 = tpu.reciprocal %313 {approx = true} : vector<16x1xf32> -> vector<16x1xf32>
      %cst_143 = arith.constant 1.000000e+00 : f32
      %315 = vector.broadcast %cst_143 : f32 to vector<16x1xf32>
      %316 = arith.mulf %315, %314 : vector<16x1xf32>
      %317 = vector.broadcast %316 : vector<16x1xf32> to vector<16x16xf32>
      %318 = arith.mulf %217, %317 : vector<16x16xf32>
      %cst_144 = arith.constant dense<0.000000e+00> : vector<16xf32>
      %319 = vector.multi_reduction <add>, %318, %cst_144 [0] : vector<16x16xf32> to vector<16xf32>
      %320 = vector.shape_cast %319 : vector<16xf32> to vector<1x16xf32>
      %321 = tpu.reciprocal %320 {approx = true} : vector<1x16xf32> -> vector<1x16xf32>
      %322 = vector.broadcast %309 : vector<1x16xf32> to vector<16x16xf32>
      %323 = arith.mulf %115, %322 : vector<16x16xf32>
      %cst_145 = arith.constant dense<0.000000e+00> : vector<16xf32>
      %324 = vector.multi_reduction <add>, %323, %cst_145 [1] : vector<16x16xf32> to vector<16xf32>
      %325 = vector.shape_cast %324 : vector<16xf32> to vector<16x1xf32>
      %326 = tpu.reciprocal %325 {approx = true} : vector<16x1xf32> -> vector<16x1xf32>
      %cst_146 = arith.constant 1.000000e+00 : f32
      %327 = vector.broadcast %cst_146 : f32 to vector<16x1xf32>
      %328 = arith.mulf %327, %326 : vector<16x1xf32>
      %329 = vector.broadcast %328 : vector<16x1xf32> to vector<16x16xf32>
      %330 = arith.mulf %115, %329 : vector<16x16xf32>
      %cst_147 = arith.constant dense<0.000000e+00> : vector<16xf32>
      %331 = vector.multi_reduction <add>, %330, %cst_147 [0] : vector<16x16xf32> to vector<16xf32>
      %332 = vector.shape_cast %331 : vector<16xf32> to vector<1x16xf32>
      %333 = tpu.reciprocal %332 {approx = true} : vector<1x16xf32> -> vector<1x16xf32>
      %334 = vector.broadcast %321 : vector<1x16xf32> to vector<16x16xf32>
      %335 = arith.mulf %217, %334 : vector<16x16xf32>
      %cst_148 = arith.constant dense<0.000000e+00> : vector<16xf32>
      %336 = vector.multi_reduction <add>, %335, %cst_148 [1] : vector<16x16xf32> to vector<16xf32>
      %337 = vector.shape_cast %336 : vector<16xf32> to vector<16x1xf32>
      %338 = tpu.reciprocal %337 {approx = true} : vector<16x1xf32> -> vector<16x1xf32>
      %cst_149 = arith.constant 1.000000e+00 : f32
      %339 = vector.broadcast %cst_149 : f32 to vector<16x1xf32>
      %340 = arith.mulf %339, %338 : vector<16x1xf32>
      %341 = vector.broadcast %340 : vector<16x1xf32> to vector<16x16xf32>
      %342 = arith.mulf %217, %341 : vector<16x16xf32>
      %cst_150 = arith.constant dense<0.000000e+00> : vector<16xf32>
      %343 = vector.multi_reduction <add>, %342, %cst_150 [0] : vector<16x16xf32> to vector<16xf32>
      %344 = vector.shape_cast %343 : vector<16xf32> to vector<1x16xf32>
      %345 = tpu.reciprocal %344 {approx = true} : vector<1x16xf32> -> vector<1x16xf32>
      %346 = vector.broadcast %333 : vector<1x16xf32> to vector<16x16xf32>
      %347 = arith.mulf %115, %346 : vector<16x16xf32>
      %cst_151 = arith.constant dense<0.000000e+00> : vector<16xf32>
      %348 = vector.multi_reduction <add>, %347, %cst_151 [1] : vector<16x16xf32> to vector<16xf32>
      %349 = vector.shape_cast %348 : vector<16xf32> to vector<16x1xf32>
      %350 = tpu.reciprocal %349 {approx = true} : vector<16x1xf32> -> vector<16x1xf32>
      %cst_152 = arith.constant 1.000000e+00 : f32
      %351 = vector.broadcast %cst_152 : f32 to vector<16x1xf32>
      %352 = arith.mulf %351, %350 : vector<16x1xf32>
      %353 = vector.broadcast %352 : vector<16x1xf32> to vector<16x16xf32>
      %354 = arith.mulf %115, %353 : vector<16x16xf32>
      %cst_153 = arith.constant dense<0.000000e+00> : vector<16xf32>
      %355 = vector.multi_reduction <add>, %354, %cst_153 [0] : vector<16x16xf32> to vector<16xf32>
      %356 = vector.shape_cast %355 : vector<16xf32> to vector<1x16xf32>
      %357 = tpu.reciprocal %356 {approx = true} : vector<1x16xf32> -> vector<1x16xf32>
      %358 = vector.broadcast %345 : vector<1x16xf32> to vector<16x16xf32>
      %359 = arith.mulf %217, %358 : vector<16x16xf32>
      %cst_154 = arith.constant dense<0.000000e+00> : vector<16xf32>
      %360 = vector.multi_reduction <add>, %359, %cst_154 [1] : vector<16x16xf32> to vector<16xf32>
      %361 = vector.shape_cast %360 : vector<16xf32> to vector<16x1xf32>
      %362 = tpu.reciprocal %361 {approx = true} : vector<16x1xf32> -> vector<16x1xf32>
      %cst_155 = arith.constant 1.000000e+00 : f32
      %363 = vector.broadcast %cst_155 : f32 to vector<16x1xf32>
      %364 = arith.mulf %363, %362 : vector<16x1xf32>
      %365 = vector.broadcast %364 : vector<16x1xf32> to vector<16x16xf32>
      %366 = arith.mulf %217, %365 : vector<16x16xf32>
      %cst_156 = arith.constant dense<0.000000e+00> : vector<16xf32>
      %367 = vector.multi_reduction <add>, %366, %cst_156 [0] : vector<16x16xf32> to vector<16xf32>
      %368 = vector.shape_cast %367 : vector<16xf32> to vector<1x16xf32>
      %369 = tpu.reciprocal %368 {approx = true} : vector<1x16xf32> -> vector<1x16xf32>
      %370 = vector.broadcast %357 : vector<1x16xf32> to vector<16x16xf32>
      %371 = arith.mulf %115, %370 : vector<16x16xf32>
      %cst_157 = arith.constant dense<0.000000e+00> : vector<16xf32>
      %372 = vector.multi_reduction <add>, %371, %cst_157 [1] : vector<16x16xf32> to vector<16xf32>
      %373 = vector.shape_cast %372 : vector<16xf32> to vector<16x1xf32>
      %374 = tpu.reciprocal %373 {approx = true} : vector<16x1xf32> -> vector<16x1xf32>
      %cst_158 = arith.constant 1.000000e+00 : f32
      %375 = vector.broadcast %cst_158 : f32 to vector<16x1xf32>
      %376 = arith.mulf %375, %374 : vector<16x1xf32>
      %377 = vector.broadcast %376 : vector<16x1xf32> to vector<16x16xf32>
      %378 = arith.mulf %115, %377 : vector<16x16xf32>
      %cst_159 = arith.constant dense<0.000000e+00> : vector<16xf32>
      %379 = vector.multi_reduction <add>, %378, %cst_159 [0] : vector<16x16xf32> to vector<16xf32>
      %380 = vector.shape_cast %379 : vector<16xf32> to vector<1x16xf32>
      %381 = tpu.reciprocal %380 {approx = true} : vector<1x16xf32> -> vector<1x16xf32>
      %382 = vector.broadcast %369 : vector<1x16xf32> to vector<16x16xf32>
      %383 = arith.mulf %217, %382 : vector<16x16xf32>
      %cst_160 = arith.constant dense<0.000000e+00> : vector<16xf32>
      %384 = vector.multi_reduction <add>, %383, %cst_160 [1] : vector<16x16xf32> to vector<16xf32>
      %385 = vector.shape_cast %384 : vector<16xf32> to vector<16x1xf32>
      %386 = tpu.reciprocal %385 {approx = true} : vector<16x1xf32> -> vector<16x1xf32>
      %cst_161 = arith.constant 1.000000e+00 : f32
      %387 = vector.broadcast %cst_161 : f32 to vector<16x1xf32>
      %388 = arith.mulf %387, %386 : vector<16x1xf32>
      %389 = vector.broadcast %388 : vector<16x1xf32> to vector<16x16xf32>
      %390 = arith.mulf %217, %389 : vector<16x16xf32>
      %cst_162 = arith.constant dense<0.000000e+00> : vector<16xf32>
      %391 = vector.multi_reduction <add>, %390, %cst_162 [0] : vector<16x16xf32> to vector<16xf32>
      %392 = vector.shape_cast %391 : vector<16xf32> to vector<1x16xf32>
      %393 = tpu.reciprocal %392 {approx = true} : vector<1x16xf32> -> vector<1x16xf32>
      %394 = vector.broadcast %381 : vector<1x16xf32> to vector<16x16xf32>
      %395 = arith.mulf %115, %394 : vector<16x16xf32>
      %cst_163 = arith.constant dense<0.000000e+00> : vector<16xf32>
      %396 = vector.multi_reduction <add>, %395, %cst_163 [1] : vector<16x16xf32> to vector<16xf32>
      %397 = vector.shape_cast %396 : vector<16xf32> to vector<16x1xf32>
      %398 = tpu.reciprocal %397 {approx = true} : vector<16x1xf32> -> vector<16x1xf32>
      %cst_164 = arith.constant 1.000000e+00 : f32
      %399 = vector.broadcast %cst_164 : f32 to vector<16x1xf32>
      %400 = arith.mulf %399, %398 : vector<16x1xf32>
      %401 = vector.broadcast %400 : vector<16x1xf32> to vector<16x16xf32>
      %402 = arith.mulf %115, %401 : vector<16x16xf32>
      %cst_165 = arith.constant dense<0.000000e+00> : vector<16xf32>
      %403 = vector.multi_reduction <add>, %402, %cst_165 [0] : vector<16x16xf32> to vector<16xf32>
      %404 = vector.shape_cast %403 : vector<16xf32> to vector<1x16xf32>
      %405 = tpu.reciprocal %404 {approx = true} : vector<1x16xf32> -> vector<1x16xf32>
      %406 = vector.broadcast %393 : vector<1x16xf32> to vector<16x16xf32>
      %407 = arith.mulf %217, %406 : vector<16x16xf32>
      %cst_166 = arith.constant dense<0.000000e+00> : vector<16xf32>
      %408 = vector.multi_reduction <add>, %407, %cst_166 [1] : vector<16x16xf32> to vector<16xf32>
      %409 = vector.shape_cast %408 : vector<16xf32> to vector<16x1xf32>
      %410 = tpu.reciprocal %409 {approx = true} : vector<16x1xf32> -> vector<16x1xf32>
      %cst_167 = arith.constant 1.000000e+00 : f32
      %411 = vector.broadcast %cst_167 : f32 to vector<16x1xf32>
      %412 = arith.mulf %411, %410 : vector<16x1xf32>
      %413 = vector.broadcast %412 : vector<16x1xf32> to vector<16x16xf32>
      %414 = arith.mulf %217, %413 : vector<16x16xf32>
      %cst_168 = arith.constant dense<0.000000e+00> : vector<16xf32>
      %415 = vector.multi_reduction <add>, %414, %cst_168 [0] : vector<16x16xf32> to vector<16xf32>
      %416 = vector.shape_cast %415 : vector<16xf32> to vector<1x16xf32>
      %417 = tpu.reciprocal %416 {approx = true} : vector<1x16xf32> -> vector<1x16xf32>
      %418 = vector.broadcast %405 : vector<1x16xf32> to vector<16x16xf32>
      %419 = arith.mulf %115, %418 : vector<16x16xf32>
      %cst_169 = arith.constant dense<0.000000e+00> : vector<16xf32>
      %420 = vector.multi_reduction <add>, %419, %cst_169 [1] : vector<16x16xf32> to vector<16xf32>
      %421 = vector.shape_cast %420 : vector<16xf32> to vector<16x1xf32>
      %422 = tpu.reciprocal %421 {approx = true} : vector<16x1xf32> -> vector<16x1xf32>
      %cst_170 = arith.constant 1.000000e+00 : f32
      %423 = vector.broadcast %cst_170 : f32 to vector<16x1xf32>
      %424 = arith.mulf %423, %422 : vector<16x1xf32>
      %425 = vector.broadcast %424 : vector<16x1xf32> to vector<16x16xf32>
      %426 = arith.mulf %115, %425 : vector<16x16xf32>
      %cst_171 = arith.constant dense<0.000000e+00> : vector<16xf32>
      %427 = vector.multi_reduction <add>, %426, %cst_171 [0] : vector<16x16xf32> to vector<16xf32>
      %428 = vector.shape_cast %427 : vector<16xf32> to vector<1x16xf32>
      %429 = tpu.reciprocal %428 {approx = true} : vector<1x16xf32> -> vector<1x16xf32>
      %430 = vector.broadcast %417 : vector<1x16xf32> to vector<16x16xf32>
      %431 = arith.mulf %217, %430 : vector<16x16xf32>
      %cst_172 = arith.constant dense<0.000000e+00> : vector<16xf32>
      %432 = vector.multi_reduction <add>, %431, %cst_172 [1] : vector<16x16xf32> to vector<16xf32>
      %433 = vector.shape_cast %432 : vector<16xf32> to vector<16x1xf32>
      %434 = tpu.reciprocal %433 {approx = true} : vector<16x1xf32> -> vector<16x1xf32>
      %cst_173 = arith.constant 1.000000e+00 : f32
      %435 = vector.broadcast %cst_173 : f32 to vector<16x1xf32>
      %436 = arith.mulf %435, %434 : vector<16x1xf32>
      %437 = vector.broadcast %436 : vector<16x1xf32> to vector<16x16xf32>
      %438 = arith.mulf %217, %437 : vector<16x16xf32>
      %cst_174 = arith.constant dense<0.000000e+00> : vector<16xf32>
      %439 = vector.multi_reduction <add>, %438, %cst_174 [0] : vector<16x16xf32> to vector<16xf32>
      %440 = vector.shape_cast %439 : vector<16xf32> to vector<1x16xf32>
      %441 = tpu.reciprocal %440 {approx = true} : vector<1x16xf32> -> vector<1x16xf32>
      %442 = vector.broadcast %429 : vector<1x16xf32> to vector<16x16xf32>
      %443 = arith.mulf %115, %442 : vector<16x16xf32>
      %cst_175 = arith.constant dense<0.000000e+00> : vector<16xf32>
      %444 = vector.multi_reduction <add>, %443, %cst_175 [1] : vector<16x16xf32> to vector<16xf32>
      %445 = vector.shape_cast %444 : vector<16xf32> to vector<16x1xf32>
      %446 = tpu.reciprocal %445 {approx = true} : vector<16x1xf32> -> vector<16x1xf32>
      %cst_176 = arith.constant 1.000000e+00 : f32
      %447 = vector.broadcast %cst_176 : f32 to vector<16x1xf32>
      %448 = arith.mulf %447, %446 : vector<16x1xf32>
      %449 = vector.broadcast %448 : vector<16x1xf32> to vector<16x16xf32>
      %450 = arith.mulf %115, %449 : vector<16x16xf32>
      %cst_177 = arith.constant dense<0.000000e+00> : vector<16xf32>
      %451 = vector.multi_reduction <add>, %450, %cst_177 [0] : vector<16x16xf32> to vector<16xf32>
      %452 = vector.shape_cast %451 : vector<16xf32> to vector<1x16xf32>
      %453 = tpu.reciprocal %452 {approx = true} : vector<1x16xf32> -> vector<1x16xf32>
      %454 = vector.broadcast %441 : vector<1x16xf32> to vector<16x16xf32>
      %455 = arith.mulf %217, %454 : vector<16x16xf32>
      %cst_178 = arith.constant dense<0.000000e+00> : vector<16xf32>
      %456 = vector.multi_reduction <add>, %455, %cst_178 [1] : vector<16x16xf32> to vector<16xf32>
      %457 = vector.shape_cast %456 : vector<16xf32> to vector<16x1xf32>
      %458 = tpu.reciprocal %457 {approx = true} : vector<16x1xf32> -> vector<16x1xf32>
      %cst_179 = arith.constant 1.000000e+00 : f32
      %459 = vector.broadcast %cst_179 : f32 to vector<16x1xf32>
      %460 = arith.mulf %459, %458 : vector<16x1xf32>
      %461 = vector.broadcast %460 : vector<16x1xf32> to vector<16x16xf32>
      %462 = arith.mulf %217, %461 : vector<16x16xf32>
      %cst_180 = arith.constant dense<0.000000e+00> : vector<16xf32>
      %463 = vector.multi_reduction <add>, %462, %cst_180 [0] : vector<16x16xf32> to vector<16xf32>
      %464 = vector.shape_cast %463 : vector<16xf32> to vector<1x16xf32>
      %465 = tpu.reciprocal %464 {approx = true} : vector<1x16xf32> -> vector<1x16xf32>
      %466 = vector.broadcast %453 : vector<1x16xf32> to vector<16x16xf32>
      %467 = arith.mulf %115, %466 : vector<16x16xf32>
      %cst_181 = arith.constant dense<0.000000e+00> : vector<16xf32>
      %468 = vector.multi_reduction <add>, %467, %cst_181 [1] : vector<16x16xf32> to vector<16xf32>
      %469 = vector.shape_cast %468 : vector<16xf32> to vector<16x1xf32>
      %470 = tpu.reciprocal %469 {approx = true} : vector<16x1xf32> -> vector<16x1xf32>
      %cst_182 = arith.constant 1.000000e+00 : f32
      %471 = vector.broadcast %cst_182 : f32 to vector<16x1xf32>
      %472 = arith.mulf %471, %470 : vector<16x1xf32>
      %473 = vector.broadcast %472 : vector<16x1xf32> to vector<16x16xf32>
      %474 = arith.mulf %115, %473 : vector<16x16xf32>
      %cst_183 = arith.constant dense<0.000000e+00> : vector<16xf32>
      %475 = vector.multi_reduction <add>, %474, %cst_183 [0] : vector<16x16xf32> to vector<16xf32>
      %476 = vector.shape_cast %475 : vector<16xf32> to vector<1x16xf32>
      %477 = tpu.reciprocal %476 {approx = true} : vector<1x16xf32> -> vector<1x16xf32>
      %478 = vector.broadcast %465 : vector<1x16xf32> to vector<16x16xf32>
      %479 = arith.mulf %217, %478 : vector<16x16xf32>
      %cst_184 = arith.constant dense<0.000000e+00> : vector<16xf32>
      %480 = vector.multi_reduction <add>, %479, %cst_184 [1] : vector<16x16xf32> to vector<16xf32>
      %481 = vector.shape_cast %480 : vector<16xf32> to vector<16x1xf32>
      %482 = tpu.reciprocal %481 {approx = true} : vector<16x1xf32> -> vector<16x1xf32>
      %cst_185 = arith.constant 1.000000e+00 : f32
      %483 = vector.broadcast %cst_185 : f32 to vector<16x1xf32>
      %484 = arith.mulf %483, %482 : vector<16x1xf32>
      %485 = vector.broadcast %484 : vector<16x1xf32> to vector<16x16xf32>
      %486 = arith.mulf %217, %485 : vector<16x16xf32>
      %cst_186 = arith.constant dense<0.000000e+00> : vector<16xf32>
      %487 = vector.multi_reduction <add>, %486, %cst_186 [0] : vector<16x16xf32> to vector<16xf32>
      %488 = vector.shape_cast %487 : vector<16xf32> to vector<1x16xf32>
      %489 = tpu.reciprocal %488 {approx = true} : vector<1x16xf32> -> vector<1x16xf32>
      %490 = vector.broadcast %477 : vector<1x16xf32> to vector<16x16xf32>
      %491 = arith.mulf %115, %490 : vector<16x16xf32>
      %cst_187 = arith.constant dense<0.000000e+00> : vector<16xf32>
      %492 = vector.multi_reduction <add>, %491, %cst_187 [1] : vector<16x16xf32> to vector<16xf32>
      %493 = vector.shape_cast %492 : vector<16xf32> to vector<16x1xf32>
      %494 = tpu.reciprocal %493 {approx = true} : vector<16x1xf32> -> vector<16x1xf32>
      %cst_188 = arith.constant 1.000000e+00 : f32
      %495 = vector.broadcast %cst_188 : f32 to vector<16x1xf32>
      %496 = arith.mulf %495, %494 : vector<16x1xf32>
      %497 = vector.broadcast %496 : vector<16x1xf32> to vector<16x16xf32>
      %498 = arith.mulf %115, %497 : vector<16x16xf32>
      %cst_189 = arith.constant dense<0.000000e+00> : vector<16xf32>
      %499 = vector.multi_reduction <add>, %498, %cst_189 [0] : vector<16x16xf32> to vector<16xf32>
      %500 = vector.shape_cast %499 : vector<16xf32> to vector<1x16xf32>
      %501 = tpu.reciprocal %500 {approx = true} : vector<1x16xf32> -> vector<1x16xf32>
      %502 = vector.broadcast %489 : vector<1x16xf32> to vector<16x16xf32>
      %503 = arith.mulf %217, %502 : vector<16x16xf32>
      %cst_190 = arith.constant dense<0.000000e+00> : vector<16xf32>
      %504 = vector.multi_reduction <add>, %503, %cst_190 [1] : vector<16x16xf32> to vector<16xf32>
      %505 = vector.shape_cast %504 : vector<16xf32> to vector<16x1xf32>
      %506 = tpu.reciprocal %505 {approx = true} : vector<16x1xf32> -> vector<16x1xf32>
      %cst_191 = arith.constant 1.000000e+00 : f32
      %507 = vector.broadcast %cst_191 : f32 to vector<16x1xf32>
      %508 = arith.mulf %507, %506 : vector<16x1xf32>
      %509 = vector.broadcast %508 : vector<16x1xf32> to vector<16x16xf32>
      %510 = arith.mulf %217, %509 : vector<16x16xf32>
      %cst_192 = arith.constant dense<0.000000e+00> : vector<16xf32>
      %511 = vector.multi_reduction <add>, %510, %cst_192 [0] : vector<16x16xf32> to vector<16xf32>
      %512 = vector.shape_cast %511 : vector<16xf32> to vector<1x16xf32>
      %513 = tpu.reciprocal %512 {approx = true} : vector<1x16xf32> -> vector<1x16xf32>
      %514 = vector.broadcast %501 : vector<1x16xf32> to vector<16x16xf32>
      %515 = arith.mulf %115, %514 : vector<16x16xf32>
      %cst_193 = arith.constant dense<0.000000e+00> : vector<16xf32>
      %516 = vector.multi_reduction <add>, %515, %cst_193 [1] : vector<16x16xf32> to vector<16xf32>
      %517 = vector.shape_cast %516 : vector<16xf32> to vector<16x1xf32>
      %518 = tpu.reciprocal %517 {approx = true} : vector<16x1xf32> -> vector<16x1xf32>
      %cst_194 = arith.constant 1.000000e+00 : f32
      %519 = vector.broadcast %cst_194 : f32 to vector<16x1xf32>
      %520 = arith.mulf %519, %518 : vector<16x1xf32>
      %521 = vector.broadcast %520 : vector<16x1xf32> to vector<16x16xf32>
      %522 = arith.mulf %115, %521 : vector<16x16xf32>
      %cst_195 = arith.constant dense<0.000000e+00> : vector<16xf32>
      %523 = vector.multi_reduction <add>, %522, %cst_195 [0] : vector<16x16xf32> to vector<16xf32>
      %524 = vector.shape_cast %523 : vector<16xf32> to vector<1x16xf32>
      %525 = tpu.reciprocal %524 {approx = true} : vector<1x16xf32> -> vector<1x16xf32>
      %526 = vector.broadcast %513 : vector<1x16xf32> to vector<16x16xf32>
      %527 = arith.mulf %217, %526 : vector<16x16xf32>
      %cst_196 = arith.constant dense<0.000000e+00> : vector<16xf32>
      %528 = vector.multi_reduction <add>, %527, %cst_196 [1] : vector<16x16xf32> to vector<16xf32>
      %529 = vector.shape_cast %528 : vector<16xf32> to vector<16x1xf32>
      %530 = tpu.reciprocal %529 {approx = true} : vector<16x1xf32> -> vector<16x1xf32>
      %cst_197 = arith.constant 1.000000e+00 : f32
      %531 = vector.broadcast %cst_197 : f32 to vector<16x1xf32>
      %532 = arith.mulf %531, %530 : vector<16x1xf32>
      %533 = vector.broadcast %532 : vector<16x1xf32> to vector<16x16xf32>
      %534 = arith.mulf %217, %533 : vector<16x16xf32>
      %cst_198 = arith.constant dense<0.000000e+00> : vector<16xf32>
      %535 = vector.multi_reduction <add>, %534, %cst_198 [0] : vector<16x16xf32> to vector<16xf32>
      %536 = vector.shape_cast %535 : vector<16xf32> to vector<1x16xf32>
      %537 = tpu.reciprocal %536 {approx = true} : vector<1x16xf32> -> vector<1x16xf32>
      scf.yield %520, %532, %525, %537 : vector<16x1xf32>, vector<16x1xf32>, vector<1x16xf32>, vector<1x16xf32>
    }
    %224 = vector.broadcast %223#0 : vector<16x1xf32> to vector<16x16xf32>
    %225 = arith.mulf %224, %115 : vector<16x16xf32>
    %226 = vector.broadcast %223#2 : vector<1x16xf32> to vector<16x16xf32>
    %227 = arith.mulf %225, %226 : vector<16x16xf32>
    %cst_115 = arith.constant dense<0.000000e+00> : vector<16x64xf32>
    %228 = tpu.matmul %227, %97, %cst_115 {dimension_numbers = #tpu.dot_dimension_numbers<[1], [0], [0], [1], [0, 0, 1, 1], [], []>} : vector<16x16xf32>, vector<16x64xf32>, vector<16x64xf32> -> vector<16x64xf32>
    %229 = arith.cmpf one, %228, %228 : vector<16x64xf32>
    %cst_116 = arith.constant 0.000000e+00 : f32
    %230 = vector.broadcast %cst_116 : f32 to vector<16x64xf32>
    %231 = arith.select %229, %230, %228 : vector<16x64xi1>, vector<16x64xf32>
    %cst_117 = arith.constant -3.40282347E+38 : f32
    %cst_118 = arith.constant 3.40282347E+38 : f32
    %232 = vector.broadcast %cst_117 : f32 to vector<16x64xf32>
    %233 = arith.maximumf %232, %231 : vector<16x64xf32>
    %234 = vector.broadcast %cst_118 : f32 to vector<16x64xf32>
    %235 = arith.minimumf %234, %233 : vector<16x64xf32>
    %cst_119 = arith.constant dense<0.000000e+00> : vector<16xf32>
    %236 = vector.multi_reduction <add>, %235, %cst_119 [1] : vector<16x64xf32> to vector<16xf32>
    %237 = vector.shape_cast %236 : vector<16xf32> to vector<16x1xf32>
    %cst_120 = arith.constant 6.400000e+01 : f32
    %238 = vector.broadcast %cst_120 : f32 to vector<16x1xf32>
    %239 = arith.divf %237, %238 : vector<16x1xf32>
    %240 = vector.broadcast %239 : vector<16x1xf32> to vector<16x64xf32>
    %241 = arith.subf %235, %240 : vector<16x64xf32>
    %242 = arith.mulf %241, %241 : vector<16x64xf32>
    %cst_121 = arith.constant dense<0.000000e+00> : vector<16xf32>
    %243 = vector.multi_reduction <add>, %242, %cst_121 [1] : vector<16x64xf32> to vector<16xf32>
    %244 = vector.shape_cast %243 : vector<16xf32> to vector<16x1xf32>
    %cst_122 = arith.constant 6.400000e+01 : f32
    %245 = vector.broadcast %cst_122 : f32 to vector<16x1xf32>
    %246 = arith.divf %244, %245 : vector<16x1xf32>
    %247 = vector.broadcast %239 : vector<16x1xf32> to vector<16x64xf32>
    %248 = arith.subf %235, %247 : vector<16x64xf32>
    %cst_123 = arith.constant 9.99999974E-6 : f32
    %249 = vector.broadcast %cst_123 : f32 to vector<16x1xf32>
    %250 = arith.addf %246, %249 : vector<16x1xf32>
    %251 = math.rsqrt %250 : vector<16x1xf32>
    %252 = vector.broadcast %251 : vector<16x1xf32> to vector<16x64xf32>
    %253 = arith.mulf %248, %252 : vector<16x64xf32>
    %254 = vector.broadcast %12 : vector<1x64xf32> to vector<16x64xf32>
    %255 = arith.mulf %253, %254 : vector<16x64xf32>
    %256 = vector.broadcast %13 : vector<1x64xf32> to vector<16x64xf32>
    %257 = arith.addf %255, %256 : vector<16x64xf32>
    %c0_124 = arith.constant 0 : index
    %c0_125 = arith.constant 0 : index
    %c0_126 = arith.constant 0 : index
    %258 = vector.load %arg17[%c0_124, %c0_125, %c0_126] : memref<2x16x64xf32, #tpu.memory_space<vmem>>, vector<1x16x64xf32>
    %259 = vector.shape_cast %258 : vector<1x16x64xf32> to vector<16x64xf32>
    %260 = vector.shape_cast %257 : vector<16x64xf32> to vector<1x16x64xf32>
    tpu.vector_store %arg17[%c0_124, %c0_125, %c0_126], %260 {strides = array<i32>} : memref<2x16x64xf32, #tpu.memory_space<vmem>>, vector<1x16x64xf32>,
    %261 = vector.broadcast %223#1 : vector<16x1xf32> to vector<16x16xf32>
    %262 = arith.mulf %261, %217 : vector<16x16xf32>
    %263 = vector.broadcast %223#3 : vector<1x16xf32> to vector<16x16xf32>
    %264 = arith.mulf %262, %263 : vector<16x16xf32>
    %cst_127 = arith.constant dense<0.000000e+00> : vector<16x64xf32>
    %265 = tpu.matmul %264, %199, %cst_127 {dimension_numbers = #tpu.dot_dimension_numbers<[1], [0], [0], [1], [0, 0, 1, 1], [], []>} : vector<16x16xf32>, vector<16x64xf32>, vector<16x64xf32> -> vector<16x64xf32>
    %266 = arith.cmpf one, %265, %265 : vector<16x64xf32>
    %cst_128 = arith.constant 0.000000e+00 : f32
    %267 = vector.broadcast %cst_128 : f32 to vector<16x64xf32>
    %268 = arith.select %266, %267, %265 : vector<16x64xi1>, vector<16x64xf32>
    %cst_129 = arith.constant -3.40282347E+38 : f32
    %cst_130 = arith.constant 3.40282347E+38 : f32
    %269 = vector.broadcast %cst_129 : f32 to vector<16x64xf32>
    %270 = arith.maximumf %269, %268 : vector<16x64xf32>
    %271 = vector.broadcast %cst_130 : f32 to vector<16x64xf32>
    %272 = arith.minimumf %271, %270 : vector<16x64xf32>
    %cst_131 = arith.constant dense<0.000000e+00> : vector<16xf32>
    %273 = vector.multi_reduction <add>, %272, %cst_131 [1] : vector<16x64xf32> to vector<16xf32>
    %274 = vector.shape_cast %273 : vector<16xf32> to vector<16x1xf32>
    %cst_132 = arith.constant 6.400000e+01 : f32
    %275 = vector.broadcast %cst_132 : f32 to vector<16x1xf32>
    %276 = arith.divf %274, %275 : vector<16x1xf32>
    %277 = vector.broadcast %276 : vector<16x1xf32> to vector<16x64xf32>
    %278 = arith.subf %272, %277 : vector<16x64xf32>
    %279 = arith.mulf %278, %278 : vector<16x64xf32>
    %cst_133 = arith.constant dense<0.000000e+00> : vector<16xf32>
    %280 = vector.multi_reduction <add>, %279, %cst_133 [1] : vector<16x64xf32> to vector<16xf32>
    %281 = vector.shape_cast %280 : vector<16xf32> to vector<16x1xf32>
    %cst_134 = arith.constant 6.400000e+01 : f32
    %282 = vector.broadcast %cst_134 : f32 to vector<16x1xf32>
    %283 = arith.divf %281, %282 : vector<16x1xf32>
    %284 = vector.broadcast %276 : vector<16x1xf32> to vector<16x64xf32>
    %285 = arith.subf %272, %284 : vector<16x64xf32>
    %cst_135 = arith.constant 9.99999974E-6 : f32
    %286 = vector.broadcast %cst_135 : f32 to vector<16x1xf32>
    %287 = arith.addf %283, %286 : vector<16x1xf32>
    %288 = math.rsqrt %287 : vector<16x1xf32>
    %289 = vector.broadcast %288 : vector<16x1xf32> to vector<16x64xf32>
    %290 = arith.mulf %285, %289 : vector<16x64xf32>
    %291 = vector.broadcast %12 : vector<1x64xf32> to vector<16x64xf32>
    %292 = arith.mulf %290, %291 : vector<16x64xf32>
    %293 = vector.broadcast %13 : vector<1x64xf32> to vector<16x64xf32>
    %294 = arith.addf %292, %293 : vector<16x64xf32>
    %c1_136 = arith.constant 1 : index
    %c0_137 = arith.constant 0 : index
    %c0_138 = arith.constant 0 : index
    %295 = vector.load %arg17[%c1_136, %c0_137, %c0_138] : memref<2x16x64xf32, #tpu.memory_space<vmem>>, vector<1x16x64xf32>
    %296 = vector.shape_cast %295 : vector<1x16x64xf32> to vector<16x64xf32>
    %297 = vector.shape_cast %294 : vector<16x64xf32> to vector<1x16x64xf32>
    tpu.vector_store %arg17[%c1_136, %c0_137, %c0_138], %297 {strides = array<i32>} : memref<2x16x64xf32, #tpu.memory_space<vmem>>, vector<1x16x64xf32>,
    return
  }
}

</mosaic_0001>

<bundles_post_ra>
// kernel: tpu_custom_call.1
= control target key start
LH: loop header
LB: loop body
LE: loop exit
PB: predicated region body
PF: predicated region fallthrough
CT: control target
= control target key end

     0   :  { %s5033_s0 = inlined_call_operand.vmem [shape: f32[2,16,16], index: 0, kind: input, shape index: {}]   ;;  %s5034_s1 = inlined_call_operand.vmem [shape: f32[2,16,64], index: 1, kind: input, shape index: {}]   ;;  %s5035_s2 = inlined_call_operand.hbm [shape: f32[2,16,48], index: 2, kind: input, shape index: {}]   ;;  %s5036_s3 = inlined_call_operand.vmem [shape: f32[64,48], index: 3, kind: input, shape index: {}]   ;;  %s5037_s4 = inlined_call_operand.hbm [shape: f32[1,48], index: 4, kind: input, shape index: {}]   ;;  %s5038_s5 = inlined_call_operand.vmem [shape: f32[48,32], index: 5, kind: input, shape index: {}]   ;;  %s5039_s6 = inlined_call_operand.hbm [shape: f32[1,32], index: 6, kind: input, shape index: {}]   ;;  %s5040_s7 = inlined_call_operand.vmem [shape: f32[16,1], index: 7, kind: input, shape index: {}]   ;;  %s5041_s8 = inlined_call_operand.vmem [shape: f32[16,1], index: 8, kind: input, shape index: {}]   ;;  %s5042_s9 = inlined_call_operand.vmem [shape: f32[48,64], index: 9, kind: input, shape index: {}]   ;;  %s5043_s10 = inlined_call_operand.vmem [shape: f32[1,64], index: 10, kind: input, shape index: {}]   ;;  %s5044_s11 = inlined_call_operand.vmem [shape: f32[64,64], index: 11, kind: input, shape index: {}]   ;;  %s5045_s12 = inlined_call_operand.vmem [shape: f32[32,64], index: 12, kind: input, shape index: {}]   ;;  %s5046_s13 = inlined_call_operand.vmem [shape: f32[1,64], index: 13, kind: input, shape index: {}]   ;;  %s5047_s14 = inlined_call_operand.vmem [shape: f32[16,64], index: 14, kind: input, shape index: {}]   ;;  %s5048_s15 = inlined_call_operand.vmem [shape: f32[1,64], index: 15, kind: input, shape index: {}]   ;;  %s5049_s16 = inlined_call_operand.vmem [shape: f32[1,64], index: 16, kind: input, shape index: {}]   ;;  %s5050_s17 = inlined_call_operand.hbm [shape: f32[2,16,64], index: 17, kind: output, shape index: {}]  }
   0x1   :  { %5053 = sst [smem:[#allocation12_spill]] %s5033_s0 }
   0x2   :  { %5054 = sst [smem:[#allocation13_spill]] %s5034_s1 }
   0x3   :  { %22 = vsyncpa [#allocation3], 0 }
   0x4   :  { %23 = vsyncpa [#allocation6], 0 }
   0x5   :  { %24 = vsyncpa [#allocation4], 0  ;;  %s4214_s24 = smov [#allocation5]   ;;  %s4215_s26 = smov [#allocation2]  }
   0x6   :  { %s49_s25 = sshll.u32 %s4214_s24, 4  ;;  %s34_s27 = sshll.u32 %s4215_s26, 4  ;;  %s50_s25 = int_to_ptr.vmem [resolvable:$true] %s49_s25  ;;  %s4312_s27 = int_to_ptr.vmem [resolvable:$true] %s34_s27 }
   0x7   :  { %s4096_s0 = scalar_lea.hbm %s5037_s4, 16 }
   0x8   :  { %p4097_p0 = scmp.ne.s32.totalorder %s5037_s4, %s4096_s0  ;;  %p4100_p1 = scmp.lt.u32.totalorder %s4096_s0, %s5037_s4 }
   0xa   :  { %p4102_p2 = pnand %p4100_p1, %p4097_p0 }
   0xc   :  { %4105 = shalt.err (!%p4102_p2)
}
   0xd   :  { %s4106_s20 = scalar_lea.vmem %s50_s25, 16  ;;  %s4110_s21 = scalar_lea.vmem %s50_s25, 32 }
   0xe   :  { %p4107_p3 = scmp.ne.s32.totalorder %s50_s25, %s4106_s20  ;;  %p4111_p4 = scmp.lt.s32.totalorder %s50_s25, %s50_s25 }
   0xf   :  { %p4112_p5 = scmp.lt.s32.totalorder %s4110_s21, %s4106_s20 }
  0x11   :  { %p4113_p6 = por %p4112_p5, %p4111_p4 }
  0x13   :  { %p4114_p7 = pnand %p4113_p6, %p4107_p3 }
  0x15   :  { %4117 = shalt.err (!%p4114_p7)
}
  0x16   :  { %52 = dma.hbm_to_vmem [thread:$0]  %s5037_s4, 16, %s50_s25, [#allocation6]  }
  0x17   :  { %s4118_s28 = scalar_lea.hbm %s5035_s2, 512 }
  0x18   :  { %p4119_p8 = scmp.ne.s32.totalorder %s5035_s2, %s4118_s28  ;;  %p4122_p9 = scmp.lt.u32.totalorder %s4118_s28, %s5035_s2 }
  0x1a   :  { %p4124_p10 = pnand %p4122_p9, %p4119_p8 }
  0x1c   :  { %4127 = shalt.err (!%p4124_p10)
}
  0x1d   :  { %s4128_s19 = scalar_lea.vmem %s4312_s27, 512  ;;  %p4133_p12 = scmp.lt.s32.totalorder %s4312_s27, %s4312_s27 }
  0x1e   :  { %p4129_p11 = scmp.ne.s32.totalorder %s4312_s27, %s4128_s19  ;;  %p4134_p13 = scmp.lt.s32.totalorder %s4128_s19, %s4128_s19 }
  0x20   :  { %p4135_p0 = por %p4134_p13, %p4133_p12 }
  0x22   :  { %p4136_p1 = pnand %p4135_p0, %p4129_p11 }
  0x24   :  { %4139 = shalt.err (!%p4136_p1)
}
  0x25   :  { %s4216_s4 = smov 128   ;;  %s4217_s25 = smov 8  }
  0x26   :  { %40 = dma.hbm_to_vmem [thread:$0]  %s5035_s2, 512, %s4312_s27, [#allocation3], %s4216_s4, %s4216_s4, %s4217_s25  }
  0x27   :  { %s4218_s21 = smov [#allocation7]   ;;  %s4140_s26 = scalar_lea.hbm %s5039_s6, 16 }
  0x28   :  { %s61_s22 = sshll.u32 %s4218_s21, 4  ;;  %p4141_p2 = scmp.ne.s32.totalorder %s5039_s6, %s4140_s26  ;;  %s62_s22 = int_to_ptr.vmem [resolvable:$true] %s61_s22 }
  0x29   :  { %p4144_p3 = scmp.lt.u32.totalorder %s4140_s26, %s5039_s6 }
  0x2b   :  { %p4146_p4 = pnand %p4144_p3, %p4141_p2 }
  0x2d   :  { %4149 = shalt.err (!%p4146_p4)
}
  0x2e   :  { %s4150_s18 = scalar_lea.vmem %s62_s22, 16  ;;  %s4154_s2 = scalar_lea.vmem %s62_s22, 32 }
  0x2f   :  { %p4151_p5 = scmp.ne.s32.totalorder %s62_s22, %s4150_s18  ;;  %p4155_p6 = scmp.lt.s32.totalorder %s62_s22, %s62_s22 }
  0x30   :  { %p4156_p7 = scmp.lt.s32.totalorder %s4154_s2, %s4150_s18 }
  0x32   :  { %p4157_p8 = por %p4156_p7, %p4155_p6 }
  0x34   :  { %p4158_p9 = pnand %p4157_p8, %p4151_p5 }
  0x36   :  { %4161 = shalt.err (!%p4158_p9)
}
  0x37   :  { %64 = dma.hbm_to_vmem [thread:$0]  %s5039_s6, 16, %s62_s22, [#allocation6]  }
  0x38   :  { %4196 = dma.done.wait [#allocation3], 512  }
  0x39   :  { %4197 = vsyncadd [#allocation3], 4294966784 }
  0x3a   :  { %4198 = dma.done.wait [#allocation6], 32  }
  0x3b   :  { %4199 = vsyncadd [#allocation6], 4294967264  ;;  %v4361_v0 = vld [vmem:[%s5048_s15] ss:$0 sm:$0xff]  ;;  %s5055_s28 = sld [smem:[#allocation13_spill]]  ;;  %s5056_s30 = sld [smem:[#allocation12_spill]] }
  0x3c   :  { %v4366_v1 = vld [vmem:[%s5049_s16] ss:$0 sm:$0xff]  ;;  %vm148_vm0 = vcmask 130048   ;;  %v95_v8 = vld [vmem:[%s5036_s3 + $0x8] sm:$0xff]  ;;  %v4219_v9 = vmov 0.0   ;;  %v96_v23 = vld [vmem:[%s5036_s3 + $0x10] sm:$0xff] }
  0x3d   :  { %v94_v7 = vld [vmem:[%s5036_s3] sm:$0xff]  ;;  %v97_v24 = vld [vmem:[%s5036_s3 + $0x18] sm:$0xff]  ;;  %v99_v30 = vld [vmem:[%s5036_s3 + $0x28] sm:$0xff]  ;;  %vm251_vm3 = vcmask 523264   ;;  %v4220_v61 = vmov 0   ;;  %vm418_vm4 = vcmask 392192  }
  0x3e   :  { %v4388_v12 = vpack.c.bf16 %v95_v8, %v94_v7  ;;  %v4399_v28 = vpack.c.bf16 %v97_v24, %v96_v23  ;;  %v98_v29 = vld [vmem:[%s5036_s3 + $0x20] sm:$0xff]  ;;  %v100_v32 = vld [vmem:[%s5036_s3 + $0x30] sm:$0xff]  ;;  %v101_v33 = vld [vmem:[%s5036_s3 + $0x38] sm:$0xff]  ;;  %3906 = vset.pattern.permute.xlu1 %v4220_v61  ;;  %3907 = vset.pattern.permute.xlu0 %v4220_v61  ;;  %vm510_vm5 = vcmask 261120  }
  0x3f   :  { %v4412_v31 = vpack.c.bf16 %v99_v30, %v98_v29  ;;  %v4422_v34 = vpack.c.bf16 %v101_v33, %v100_v32  ;;  %v4429_v42 = vld [vmem:[#allocation5] ss:$0 sm:$0xff]  ;;  %v104_v50 = vld [vmem:[%s5038_s5 + $0x8] sm:$0xff]  ;;  %v105_v54 = vld [vmem:[%s5038_s5 + $0x10] sm:$0xff] }
  0x40   :  { %v103_v49 = vld [vmem:[%s5038_s5] sm:$0xff]  ;;  %v106_v55 = vld [vmem:[%s5038_s5 + $0x18] sm:$0xff]  ;;  %v108_v58 = vld [vmem:[%s5038_s5 + $0x28] sm:$0xff] }
  0x41   :  { %v140_v2 = vld [vmem:[%s5055_s28] sm:$0xff]  ;;  %v141_v3 = vld [vmem:[%s5055_s28 + $0x8] sm:$0xff]  ;;  %v4439_v53 = vpack.c.bf16 %v104_v50, %v103_v49  ;;  %v4448_v56 = vpack.c.bf16 %v106_v55, %v105_v54  ;;  %vm4498_vm6 = vmpackc.low %vm510_vm5, %vm510_vm5 }
  0x42   :  { %v138_v4 = vld [vmem:[%s5056_s30] sm:$0xff]  ;;  %v139_v5 = vld [vmem:[%s5056_s30 + $0x8] sm:$0xff]  ;;  %v3666_v6 = vpack.c.bf16 %v141_v3, %v140_v2  ;;  %vm4577_vm7 = vmpackc.low %vm251_vm3, %vm251_vm3 }
  0x43   :  { %vm144_vm1 = vcmp.ne.f32.partialorder %v138_v4, 0.0  ;;  %vm145_vm2 = vcmp.ne.f32.partialorder %v139_v5, 0.0  ;;  %v107_v57 = vld [vmem:[%s5038_s5 + $0x20] sm:$0xff]  ;;  %v111_v63 = vld [vmem:[%s5040_s7 + $0x8] sm:$0xff] }
  0x44   :  { %v146_v10 = vsel %vm144_vm1, 1.0, %v4219_v9  ;;  %v147_v11 = vsel %vm145_vm2, 1.0, %v4219_v9  ;;  %3667 = vmatprep.subr.bf16.mxu1 %v3666_v6  ;;  %v4459_v59 = vpack.c.bf16 %v108_v58, %v107_v57  ;;  %v110_v60 = vld [vmem:[%s5040_s7] sm:$0xff]  ;;  %v113_v2 = vld [vmem:[%s5041_s8 + $0x8] sm:$0xff] }
  0x45   :  { %v149_v13 = vsel %vm148_vm0, %v146_v10, 0.0  ;;  %v152_v14 = vsel %vm148_vm0, %v147_v11, 0.0  ;;  %3669 = vmatpush3.bf16.msra.mxu1 %v3666_v6  ;;  %v112_v62 = vld [vmem:[%s5041_s8] sm:$0xff]  ;;  %522 = vperm.xlu1 %3906, %v110_v60   ;;  %v115_v58 = vld [vmem:[%s5042_s9 + $0x8] sm:$0xff] }
  0x46   :  { %v159_v15 = vadd.f32 %v152_v14, %v149_v13  ;;  %150 = vadd.xlane.f32.xlu0 %v149_v13  ;;  %3671 = vmatprep.subr.bf16.mxu1 %v4388_v12  ;;  %v114_v57 = vld [vmem:[%s5042_s9] sm:$0xff] }
  0x47   :  { %v4518_v60 = vpack.c.bf16 %v115_v58, %v114_v57 }
  0x48   :  { %v160_v16 = vrot.slane %v159_v15, 4 }
  0x49   :  { %527 = vperm.xlu1 %3906, %v111_v63  }
  0x4a   :  { %v161_v17 = vadd.f32 %v160_v16, %v159_v15  ;;  %153 = vadd.xlane.f32.xlu0 %v152_v14 }
  0x4c   :  { %v162_v18 = vrot.slane %v161_v17, 2 }
  0x4d   :  { %539 = vperm.xlu1 %3906, %v113_v2  }
  0x4e   :  { %v163_v19 = vadd.f32 %v162_v18, %v161_v17 }
  0x50   :  { %v164_v20 = vrot.slane %v163_v19, 1 }
  0x52   :  { %v165_v21 = vadd.f32 %v164_v20, %v163_v19 }
  0x54   :  { %v166_v22 = vmax.f32 %v165_v21, 1.0 }
  0x56   :  { %3908 = vrsqrt.f32 %v166_v22 }
  0x60   :  { %v3909_v25 = vpop.eup %3908  ;;  %534 = vperm.xlu0 %3907, %v112_v62  }
  0x61   :  { %v168_v26 = vmul.f32 %v3909_v25, %v138_v4  ;;  %v169_v27 = vmul.f32 %v3909_v25, %v139_v5  ;;  %v4478_v5 = vld [vmem:[#allocation7] ss:$0 sm:$0xff] }
  0x63   :  { %3400 = vmatprep.mubr.msk.f32.mxu1 %vm148_vm0, %v168_v26  ;;  %3426 = vmatprep.mubr.msk.f32.mxu0 %vm148_vm0, %v168_v26 }
  0x64   :  { %3401 = vmatmul.mubr.msk.f32.vlgmr.msra.gmra.mrb[0].mxu1 %vm148_vm0, %v169_v27 }
  0x65   :  { %3673 = vmatpush3.bf16.msra.mxu1 %v4388_v12 }
  0x66   :  { %3675 = vmatprep.subr.bf16.mxu1 %v4399_v28 }
  0x69   :  { %3677 = vmatpush3.bf16.msra.mxu1 %v4399_v28 }
  0x6a   :  { %3679 = vmatprep.subr.bf16.mxu1 %v4412_v31 }
  0x6d   :  { %3681 = vmatpush3.bf16.msra.mxu1 %v4412_v31 }
  0x6e   :  { %3683 = vmatprep.subr.bf16.mxu1 %v4422_v34 }
  0x71   :  { %3685 = vmatpush3.bf16.msra.mxu1 %v4422_v34 }
  0xc4   :  { %v4484_v18 = vpop.permute.xlu1 %522 }
  0xc8   :  { %v4486_v22 = vpop.permute.xlu1 %527 }
  0xcc   :  { %v4492_v29 = vpop.permute.xlu1 %539 }
  0xd3   :  { %v151_v37 = vpop.xlane.xlu0 %150 }
  0xd4   :  { %v155_v40 = vmax.f32 %v151_v37, 1.0 }
  0xd7   :  { %v154_v38 = vpop.xlane.xlu0 %153 }
  0xd8   :  { %v156_v39 = vmax.f32 %v154_v38, 1.0 }
  0xda   :  { %3910 = vrsqrt.f32 %v156_v39 }
  0xdb   :  { %3912 = vrsqrt.f32 %v155_v40 }
  0xdf   :  { %v4488_v25 = vpop.permute.xlu0 %534 }
  0xe4   :  { %v3911_v41 = vpop.eup %3910 }
  0xe5   :  { %v3913_v44 = vpop.eup %3912 }
 0x137   :  { %v3402_v35 = vpop.f32.mrb[0].mxu1 }
 0x138   :  { %v242_v36 = vpop.f32.mrb[1].mxu1 }
 0x139   :  { %3419 = vmatprep.mubr.msk.f32.mxu1 %vm251_vm3, %v242_v36 }
 0x13a   :  { %3420 = vmatmul.mubr.msk.f32.vlgmr.msra.gmra.mrb[2].mxu1 %vm251_vm3, %v3402_v35 }
 0x20d   :  { %v3421_v43 = vpop.f32.mrb[2].mxu1 }
 0x20e   :  { %v334_v45 = vmul.f32 %v3911_v41, %v3421_v43  ;;  %v324_v46 = vpop.f32.mrb[3].mxu1 }
 0x20f   :  { %v333_v47 = vmul.f32 %v3913_v44, %v324_v46 }
 0x210   :  { %v342_v48 = vadd.f32 %v4429_v42, %v334_v45 }
 0x211   :  { %v341_v51 = vadd.f32 %v4429_v42, %v333_v47 }
 0x213   :  { %v3686_v52 = vpack.c.bf16 %v342_v48, %v341_v51 }
 0x215   :  { %3687 = vmatprep.subr.bf16.mxu0 %v3686_v52 }
 0x216   :  { %3689 = vmatpush3.bf16.msra.mxu0 %v3686_v52 }
 0x217   :  { %3691 = vmatprep.subr.bf16.mxu0 %v4439_v53 }
 0x219   :  { %3427 = vmatmul.mubr.msk.f32.vlgmr.msra.gmra.mrb[0].mxu0 %vm148_vm0, %v169_v27 }
 0x21a   :  { %3693 = vmatpush3.bf16.msra.mxu0 %v4439_v53 }
 0x21b   :  { %3695 = vmatprep.subr.bf16.mxu0 %v4448_v56 }
 0x21e   :  { %3697 = vmatpush3.bf16.msra.mxu0 %v4448_v56 }
 0x21f   :  { %3699 = vmatprep.subr.bf16.mxu0 %v4459_v59 }
 0x222   :  { %3701 = vmatpush3.bf16.msra.mxu0 %v4459_v59 }
 0x2ec   :  { %v3428_v3 = vpop.f32.mrb[0].mxu0 }
 0x2ed   :  { %v409_v4 = vpop.f32.mrb[1].mxu0 }
 0x2ee   :  { %3441 = vmatprep.mubr.msk.f32.mxu0 %vm418_vm4, %v409_v4  ;;  %v117_v4 = vld [vmem:[%s5042_s9 + $0x18] sm:$0xff] }
 0x2ef   :  { %3442 = vmatmul.mubr.msk.f32.vlgmr.msra.gmra.mrb[2].mxu0 %vm418_vm4, %v3428_v3  ;;  %v116_v3 = vld [vmem:[%s5042_s9 + $0x10] sm:$0xff] }
 0x3c2   :  { %v3443_v6 = vpop.f32.mrb[2].mxu0 }
 0x3c3   :  { %v501_v7 = vmul.f32 %v3911_v41, %v3443_v6  ;;  %v491_v8 = vpop.f32.mrb[3].mxu0 }
 0x3c4   :  { %v500_v10 = vmul.f32 %v3913_v44, %v491_v8  ;;  %v4528_v8 = vpack.c.bf16 %v117_v4, %v116_v3  ;;  %v124_v4 = vld [vmem:[%s5044_s11 + $0x18] sm:$0xff] }
 0x3c5   :  { %v509_v11 = vadd.f32 %v4478_v5, %v501_v7 }
 0x3c6   :  { %v508_v13 = vadd.f32 %v4478_v5, %v500_v10  ;;  %v142_v10 = vld [vmem:[#allocation2] sm:$0xff] }
 0x3c7   :  { %v512_v14 = vsel %vm510_vm5, %v509_v11, -inf  ;;  %v118_v11 = vld [vmem:[%s5042_s9 + $0x20] sm:$0xff] }
 0x3c8   :  { %v511_v15 = vsel %vm510_vm5, %v508_v13, -inf  ;;  %v119_v13 = vld [vmem:[%s5042_s9 + $0x28] sm:$0xff] }
 0x3c9   :  { %v513_v16 = vmax.f32 %v511_v15, %v512_v14  ;;  %v4540_v14 = vpack.c.bf16 %v119_v13, %v118_v11  ;;  %v129_v15 = vld [vmem:[%s5045_s12] sm:$0xff]  ;;  %v127_v13 = vld [vmem:[%s5044_s11 + $0x30] sm:$0xff] }
 0x3cb   :  { %v514_v17 = vrot.slane %v513_v16, 4 }
 0x3cd   :  { %v515_v19 = vmax.f32 %v513_v16, %v514_v17  ;;  %v130_v16 = vld [vmem:[%s5045_s12 + $0x8] sm:$0xff] }
 0x3ce   :  { %v4550_v17 = vpack.c.bf16 %v130_v16, %v129_v15  ;;  %v128_v15 = vld [vmem:[%s5044_s11 + $0x38] sm:$0xff] }
 0x3cf   :  { %v516_v20 = vrot.slane %v515_v19, 2  ;;  %v4626_v16 = vpack.c.bf16 %v128_v15, %v127_v13 }
 0x3d1   :  { %v517_v21 = vmax.f32 %v515_v19, %v516_v20  ;;  %v131_v19 = vld [vmem:[%s5045_s12 + $0x10] sm:$0xff]  ;;  %v132_v20 = vld [vmem:[%s5045_s12 + $0x18] sm:$0xff] }
 0x3d3   :  { %v518_v23 = vrot.slane %v517_v21, 1 }
 0x3d5   :  { %v519_v24 = vmax.f32 %v517_v21, %v518_v23  ;;  %v143_v21 = vld [vmem:[#allocation2 + $0x8] sm:$0xff]  ;;  %v4560_v23 = vpack.c.bf16 %v132_v20, %v131_v19 }
 0x3d7   :  { %v530_v26 = vmul.f32 %v4484_v18, %v519_v24  ;;  %v531_v27 = vmul.f32 %v4486_v22, %v519_v24 }
 0x3d9   :  { %v543_v30 = vadd.f32 %v4492_v29, %v531_v27  ;;  %v542_v32 = vadd.f32 %v4488_v25, %v530_v26  ;;  %v4571_v27 = vld [vmem:[%s5043_s10] ss:$0 sm:$0xff] }
 0x3db   :  { %v545_v33 = vmax.f32 %v543_v30, 0.0  ;;  %v544_v35 = vmax.f32 %v542_v32, 0.0 }
 0x3dd   :  { %v3702_v37 = vpack.c.bf16 %v545_v33, %v544_v35  ;;  %3448 = vmatprep.mubr.msk.f32.mxu1 %vm510_vm5, %v544_v35 }
 0x3df   :  { %3704 = vmatprep.subr.msk.bf16.mxu1 %vm4498_vm6, %v3702_v37  ;;  %3709 = vmatprep.subr.bf16.mxu0 %v3702_v37 }
 0x3e0   :  { %3707 = vmatpush3.bf16.xpose.msk.msra.mxu1 %vm4498_vm6, %v3702_v37  ;;  %3711 = vmatpush3.bf16.msra.mxu0 %v3702_v37 }
 0x3e1   :  { %3713 = vmatprep.subr.bf16.mxu0 %v4518_v60 }
 0x3e7   :  { %3449 = vmatmul.mubr.msk.f32.vlgmr.msra.gmra.mrb[4].mxu1 %vm510_vm5, %v545_v33 }
 0x4ba   :  { %v3450_v38 = vpop.f32.mrb[4].mxu1 }
 0x4bb   :  { %v618_v39 = vpop.f32.mrb[5].mxu1  ;;  %v628_v41 = vmul.f32 0.17677669, %v3450_v38 }
 0x4bc   :  { %v627_v40 = vmul.f32 0.17677669, %v618_v39 }
 0x4bd   :  { %v632_v44 = vsel %vm148_vm0, %v628_v41, -inf }
 0x4be   :  { %v629_v43 = vsel %vm148_vm0, %v627_v40, -inf }
 0x4bf   :  { %630 = vmax.xlane.f32.xlu1 %v629_v43 }
 0x4c3   :  { %633 = vmax.xlane.f32.xlu1 %v632_v44 }
 0x54c   :  { %v631_v45 = vpop.xlane.xlu1 %630 }
 0x54d   :  { %v635_v46 = vsub.f32 %v627_v40, %v631_v45 }
 0x54f   :  { %v637_v47 = vmul.f32 1.442695, %v635_v46 }
 0x550   :  { %v634_v48 = vpop.xlane.xlu1 %633 }
 0x551   :  { %3914 = vpow2.f32 %v637_v47  ;;  %v636_v49 = vsub.f32 %v628_v41, %v634_v48 }
 0x553   :  { %v639_v50 = vmul.f32 1.442695, %v636_v49 }
 0x555   :  { %3916 = vpow2.f32 %v639_v50 }
 0x55b   :  { %v3915_v51 = vpop.eup %3914 }
 0x55c   :  { %v641_v52 = vsel %vm148_vm0, %v3915_v51, 0.0 }
 0x55d   :  { %642 = vadd.xlane.f32.xlu0 %v641_v52 }
 0x55f   :  { %v3917_v54 = vpop.eup %3916 }
 0x560   :  { %v644_v55 = vsel %vm148_vm0, %v3917_v54, 0.0 }
 0x561   :  { %645 = vadd.xlane.f32.xlu1 %v644_v55 }
 0x5ea   :  { %v643_v61 = vpop.xlane.xlu0 %642 }
 0x5eb   :  { %3918 = vrcp.f32 %v643_v61 }
 0x5ee   :  { %v646_v62 = vpop.xlane.xlu1 %645 }
 0x5ef   :  { %3920 = vrcp.f32 %v646_v62  ;;  %v121_v62 = vld [vmem:[%s5044_s11] sm:$0xff] }
 0x5f5   :  { %v3919_v63 = vpop.eup %3918 }
 0x5f6   :  { %v649_v2 = vmul.f32 %v3919_v63, %v3915_v51  ;;  %v122_v63 = vld [vmem:[%s5044_s11 + $0x8] sm:$0xff] }
 0x5f7   :  { %v4600_v3 = vpack.c.bf16 %v122_v63, %v121_v62 }
 0x5f8   :  { %3455 = vmatprep.mubr.msk.f32.mxu0 %vm148_vm0, %v649_v2  ;;  %v123_v2 = vld [vmem:[%s5044_s11 + $0x10] sm:$0xff] }
 0x5f9   :  { %v3921_v6 = vpop.eup %3920 }
 0x5fa   :  { %v650_v7 = vmul.f32 %v3921_v6, %v3917_v54  ;;  %v4605_v6 = vpack.c.bf16 %v124_v4, %v123_v2 }
 0x5fc   :  { %3456 = vmatmul.mubr.msk.f32.vlgmr.msra.gmra.mrb[4].mxu0 %vm148_vm0, %v650_v7  ;;  %v125_v7 = vld [vmem:[%s5044_s11 + $0x20] sm:$0xff] }
 0x5fd   :  { %3715 = vmatpush3.bf16.msra.mxu0 %v4518_v60  ;;  %3470 = vmatprep.mubr.msk.f32.mxu0 %vm418_vm4, %v142_v10  ;;  %v126_v10 = vld [vmem:[%s5044_s11 + $0x28] sm:$0xff] }
 0x5fe   :  { %3717 = vmatprep.subr.bf16.mxu0 %v4528_v8  ;;  %v4616_v11 = vpack.c.bf16 %v126_v10, %v125_v7  ;;  %v4665_v10 = vld [vmem:[%s5047_s14] sm:$0xff] }
 0x601   :  { %3719 = vmatpush3.bf16.msra.mxu0 %v4528_v8 }
 0x602   :  { %3721 = vmatprep.subr.bf16.mxu0 %v4540_v14 }
 0x605   :  { %3723 = vmatpush3.bf16.msra.mxu0 %v4540_v14 }
 0x606   :  { %3735 = vmatprep.subr.bf16.mxu0 %v4550_v17 }
 0x608   :  { %3471 = vmatmul.mubr.msk.f32.vlgmr.msra.gmra.mrb[6].mxu0 %vm418_vm4, %v143_v21 }
 0x609   :  { %3737 = vmatpush3.bf16.msra.mxu0 %v4550_v17 }
 0x60a   :  { %3739 = vmatprep.subr.bf16.mxu0 %v4560_v23 }
 0x60d   :  { %3741 = vmatpush3.bf16.msra.mxu0 %v4560_v23 }
 0x60e   :  { %3743 = vmatprep.subr.bf16.mxu0 %v4600_v3 }
 0x6cf   :  { %v3457_v24 = vpop.f32.mrb[4].mxu0 }
 0x6d0   :  { %v723_v26 = vpop.f32.mrb[5].mxu0 }
 0x6d1   :  { %3495 = vmatprep.mubr.msk.f32.mxu0 %vm510_vm5, %v723_v26 }
 0x6d2   :  { %3496 = vmatmul.mubr.msk.f32.vlgmr.msra.gmra.mrb[8].mxu0 %vm510_vm5, %v3457_v24 }
 0x6d3   :  { %3745 = vmatpush3.bf16.msra.mxu0 %v4600_v3 }
 0x6d4   :  { %3747 = vmatprep.subr.bf16.mxu0 %v4605_v6 }
 0x6d7   :  { %3749 = vmatpush3.bf16.msra.mxu0 %v4605_v6 }
 0x6d8   :  { %3751 = vmatprep.subr.bf16.mxu0 %v4616_v11 }
 0x6db   :  { %v3472_v30 = vpop.f32.mrb[6].mxu0  ;;  %3753 = vmatpush3.bf16.msra.mxu0 %v4616_v11 }
 0x6dc   :  { %v816_v32 = vadd.f32 %v3472_v30, %v4571_v27  ;;  %v810_v33 = vpop.f32.mrb[7].mxu0  ;;  %3755 = vmatprep.subr.bf16.mxu0 %v4626_v16 }
 0x6dd   :  { %v811_v35 = vadd.f32 %v4571_v27, %v810_v33 }
 0x6de   :  { %v820_v37 = vmax.f32 %v816_v32, 0.0 }
 0x6df   :  { %v819_v38 = vmax.f32 %v811_v35, 0.0  ;;  %3757 = vmatpush3.bf16.msra.mxu0 %v4626_v16  ;;  %v4638_v35 = vld [vmem:[%s5046_s13] ss:$0 sm:$0xff] }
 0x6e1   :  { %v3724_v40 = vpack.c.bf16 %v820_v37, %v819_v38  ;;  %3477 = vmatprep.mubr.msk.f32.mxu1 %vm251_vm3, %v819_v38 }
 0x6e3   :  { %3726 = vmatprep.subr.msk.bf16.mxu1 %vm4577_vm7, %v3724_v40 }
 0x6e4   :  { %3729 = vmatpush3.bf16.xpose.msk.msra.mxu1 %vm4577_vm7, %v3724_v40 }
 0x6e5   :  { %3731 = vmatprep.subr.bf16.mxu1 %v3724_v40 }
 0x6eb   :  { %3478 = vmatmul.mubr.msk.f32.vlgmr.msra.gmra.mrb[6].mxu1 %vm251_vm3, %v820_v37 }
 0x6ec   :  { %3733 = vmatpush3.bf16.msra.mxu1 %v3724_v40 }
 0x7be   :  { %v3479_v41 = vpop.f32.mrb[6].mxu1 }
 0x7bf   :  { %v893_v43 = vpop.f32.mrb[7].mxu1  ;;  %v903_v45 = vmul.f32 0.125, %v3479_v41 }
 0x7c0   :  { %v902_v44 = vmul.f32 0.125, %v893_v43 }
 0x7c1   :  { %v907_v47 = vsel %vm148_vm0, %v903_v45, -inf }
 0x7c2   :  { %v904_v46 = vsel %vm148_vm0, %v902_v44, -inf }
 0x7c3   :  { %905 = vmax.xlane.f32.xlu1 %v904_v46 }
 0x7c7   :  { %908 = vmax.xlane.f32.xlu1 %v907_v47 }
 0x850   :  { %v906_v48 = vpop.xlane.xlu1 %905 }
 0x851   :  { %v910_v49 = vsub.f32 %v902_v44, %v906_v48 }
 0x853   :  { %v912_v50 = vmul.f32 1.442695, %v910_v49  ;;  %v3205_v49 = vld [vmem:[%s5056_s30 + $0x18] sm:$0xff] }
 0x854   :  { %v909_v51 = vpop.xlane.xlu1 %908  ;;  %vm1311_vm8 = vcmp.ne.f32.partialorder %v3205_v49, 0.0 }
 0x855   :  { %3922 = vpow2.f32 %v912_v50  ;;  %v911_v52 = vsub.f32 %v903_v45, %v909_v51  ;;  %v1313_v50 = vsel %vm1311_vm8, 1.0, %v4219_v9  ;;  %v3204_v51 = vld [vmem:[%s5056_s30 + $0x10] sm:$0xff] }
 0x856   :  { %vm1310_vm9 = vcmp.ne.f32.partialorder %v3204_v51, 0.0 }
 0x857   :  { %v914_v54 = vmul.f32 1.442695, %v911_v52  ;;  %v1312_v52 = vsel %vm1310_vm9, 1.0, %v4219_v9 }
 0x859   :  { %3924 = vpow2.f32 %v914_v54  ;;  %v1314_v54 = vsel %vm148_vm0, %v1312_v52, 0.0 }
 0x85f   :  { %v3923_v55 = vpop.eup %3922 }
 0x860   :  { %v916_v57 = vsel %vm148_vm0, %v3923_v55, 0.0 }
 0x861   :  { %917 = vadd.xlane.f32.xlu1 %v916_v57 }
 0x863   :  { %v3925_v58 = vpop.eup %3924 }
 0x864   :  { %v919_v61 = vsel %vm148_vm0, %v3925_v58, 0.0 }
 0x865   :  { %920 = vadd.xlane.f32.xlu1 %v919_v61 }
 0x8ee   :  { %v918_v19 = vpop.xlane.xlu1 %917 }
 0x8ef   :  { %3926 = vrcp.f32 %v918_v19 }
 0x8f2   :  { %v921_v20 = vpop.xlane.xlu1 %920 }
 0x8f3   :  { %3928 = vrcp.f32 %v921_v20 }
 0x8f9   :  { %v3927_v21 = vpop.eup %3926 }
 0x8fa   :  { %v924_v24 = vmul.f32 %v3927_v21, %v3923_v55  ;;  %v1317_v55 = vsel %vm148_vm0, %v1313_v50, 0.0 }
 0x8fb   :  { %v1324_v57 = vadd.f32 %v1317_v55, %v1314_v54  ;;  %1318 = vadd.xlane.f32.xlu0 %v1317_v55 }
 0x8fc   :  { %3484 = vmatprep.mubr.msk.f32.mxu1 %vm148_vm0, %v924_v24 }
 0x8fd   :  { %v3929_v26 = vpop.eup %3928 }
 0x8fe   :  { %v925_v30 = vmul.f32 %v3929_v26, %v3925_v58  ;;  %v1325_v58 = vrot.slane %v1324_v57, 4 }
 0x900   :  { %3485 = vmatmul.mubr.msk.f32.vlgmr.msra.gmra.mrb[8].mxu1 %vm148_vm0, %v925_v30  ;;  %v1326_v61 = vadd.f32 %v1325_v58, %v1324_v57  ;;  %v3206_v30 = vld [vmem:[%s5055_s28 + $0x10] sm:$0xff] }
 0x901   :  { %3521 = vmatprep.mubr.msk.f32.mxu1 %vm251_vm3, %v4665_v10 }
 0x902   :  { %v1327_v62 = vrot.slane %v1326_v61, 2 }
 0x904   :  { %v1328_v63 = vadd.f32 %v1327_v62, %v1326_v61 }
 0x906   :  { %v1329_v2 = vrot.slane %v1328_v63, 1 }
 0x908   :  { %v1330_v4 = vadd.f32 %v1329_v2, %v1328_v63 }
 0x90a   :  { %v1331_v7 = vmax.f32 %v1330_v4, 1.0 }
 0x90c   :  { %3930 = vrsqrt.f32 %v1331_v7 }
 0x916   :  { %v3931_v9 = vpop.eup %3930 }
 0x917   :  { %v1333_v13 = vmul.f32 %v3931_v9, %v3204_v51 }
 0x9d3   :  { %v3486_v32 = vpop.f32.mrb[8].mxu1 }
 0x9d4   :  { %v998_v33 = vpop.f32.mrb[9].mxu1 }
 0x9d5   :  { %3514 = vmatprep.mubr.msk.f32.mxu0 %vm251_vm3, %v998_v33 }
 0x9d6   :  { %3515 = vmatmul.mubr.msk.f32.vlgmr.msra.gmra.mrb[8].mxu0 %vm251_vm3, %v3486_v32  ;;  %v3207_v32 = vld [vmem:[%s5055_s28 + $0x18] sm:$0xff] }
 0x9d7   :  { %3554 = vmatprep.mubr.msk.f32.mxu0 %vm148_vm0, %v1333_v13 }
 0xaa9   :  { %v3516_v37 = vpop.f32.mrb[8].mxu0 }
 0xaaa   :  { %v1176_v38 = vadd.f32 %v3516_v37, %v4638_v35  ;;  %v1160_v40 = vpop.f32.mrb[9].mxu0 }
 0xaab   :  { %v1175_v41 = vadd.f32 %v4638_v35, %v1160_v40  ;;  %v3764_v40 = vpack.c.bf16 %v3207_v32, %v3206_v30 }
 0xaac   :  { %v4642_v43 = vmax.f32 %v1176_v38, 0.0 }
 0xaad   :  { %v4644_v44 = vmax.f32 %v1175_v41, 0.0  ;;  %v4685_v41 = vld [vmem:[%s5047_s14 + $0x8] sm:$0xff]  ;;  %s4816_s14 = smov 0  }
 0xaae   :  { %v1180_v47 = vmul.f32 %v4642_v43, %v4642_v43 }
 0xaaf   :  { %v1179_v45 = vmul.f32 %v4644_v44, %v4644_v44 }
 0xab0   :  { %v1184_v48 = vsel %vm251_vm3, %v1180_v47, 0.0 }
 0xab1   :  { %v1181_v46 = vsel %vm251_vm3, %v1179_v45, 0.0  ;;  %v1334_v45 = vmul.f32 %v3931_v9, %v3205_v49 }
 0xab2   :  { %1182 = vadd.xlane.f32.xlu1 %v1181_v46 }
 0xab6   :  { %1185 = vadd.xlane.f32.xlu1 %v1184_v48 }
 0xaba   :  { %1315 = vadd.xlane.f32.xlu1 %v1314_v54 }
 0xb3f   :  { %v1183_v15 = vpop.xlane.xlu1 %1182 }
 0xb40   :  { %v1187_v19 = vmax.f32 %v1183_v15, 1e-12 }
 0xb42   :  { %3932 = vrsqrt.f32 %v1187_v19 }
 0xb43   :  { %v1186_v20 = vpop.xlane.xlu1 %1185 }
 0xb44   :  { %v1188_v21 = vmax.f32 %v1186_v20, 1e-12 }
 0xb46   :  { %3934 = vrsqrt.f32 %v1188_v21 }
 0xb4c   :  { %v3933_v24 = vpop.eup %3932 }
 0xb4d   :  { %v1191_v33 = vmul.f32 %v3933_v24, %v4644_v44 }
 0xb50   :  { %v3935_v26 = vpop.eup %3934 }
 0xb51   :  { %v1192_v37 = vmul.f32 %v3935_v26, %v4642_v43 }
 0xb53   :  { %v3758_v38 = vpack.c.bf16 %v1192_v37, %v1191_v33 }
 0xb55   :  { %3760 = vmatprep.subr.msk.bf16.mxu1 %vm4577_vm7, %v3758_v38 }
 0xb56   :  { %3763 = vmatpush3.bf16.xpose.msk.msra.mxu1 %vm4577_vm7, %v3758_v38 }
 0xb57   :  { %3765 = vmatprep.subr.bf16.mxu1 %v3764_v40 }
 0xb5d   :  { %3522 = vmatmul.mubr.msk.f32.vlgmr.msra.gmra.mrb[10].mxu1 %vm251_vm3, %v4685_v41 }
 0xb5e   :  { %3767 = vmatpush3.bf16.msra.mxu1 %v3764_v40  ;;  %3528 = vmatprep.mubr.msk.f32.mxu1 %vm148_vm0, %v1333_v13 }
 0xb5f   :  { %3769 = vmatprep.subr.bf16.mxu1 %v4388_v12 }
 0xb61   :  { %3529 = vmatmul.mubr.msk.f32.vlgmr.msra.gmra.mrb[12].mxu1 %vm148_vm0, %v1334_v45 }
 0xb62   :  { %3771 = vmatpush3.bf16.msra.mxu1 %v4388_v12  ;;  %v1319_v12 = vpop.xlane.xlu0 %1318 }
 0xb63   :  { %3773 = vmatprep.subr.bf16.mxu1 %v4399_v28  ;;  %v1321_v50 = vmax.f32 %v1319_v12, 1.0 }
 0xb65   :  { %3936 = vrsqrt.f32 %v1321_v50 }
 0xb66   :  { %3775 = vmatpush3.bf16.msra.mxu1 %v4399_v28  ;;  %v1316_v28 = vpop.xlane.xlu1 %1315 }
 0xb67   :  { %3777 = vmatprep.subr.bf16.mxu1 %v4412_v31  ;;  %v1320_v51 = vmax.f32 %v1316_v28, 1.0 }
 0xb69   :  { %3938 = vrsqrt.f32 %v1320_v51 }
 0xb6a   :  { %3779 = vmatpush3.bf16.msra.mxu1 %v4412_v31 }
 0xb6b   :  { %3781 = vmatprep.subr.bf16.mxu1 %v4422_v34 }
 0xb6e   :  { %3783 = vmatpush3.bf16.msra.mxu1 %v4422_v34 }
 0xb6f   :  { %v3937_v31 = vpop.eup %3936 }
 0xb73   :  { %v3939_v52 = vpop.eup %3938 }
 0xc30   :  { %v4699_v46 = vpop.f32.mrb[10].mxu1 }
 0xc31   :  { %v4701_v47 = vpop.f32.mrb[11].mxu1 }
 0xc34   :  { %v3530_v48 = vpop.f32.mrb[12].mxu1 }
 0xc35   :  { %v1407_v49 = vpop.f32.mrb[13].mxu1 }
 0xc36   :  { %3547 = vmatprep.mubr.msk.f32.mxu1 %vm251_vm3, %v1407_v49 }
 0xc37   :  { %3548 = vmatmul.mubr.msk.f32.vlgmr.msra.gmra.mrb[14].mxu1 %vm251_vm3, %v3530_v48 }
 0xd0a   :  { %v3549_v54 = vpop.f32.mrb[14].mxu1 }
 0xd0b   :  { %v1498_v34 = vmul.f32 %v3937_v31, %v3549_v54  ;;  %v1488_v55 = vpop.f32.mrb[15].mxu1 }
 0xd0c   :  { %v1497_v57 = vmul.f32 %v3939_v52, %v1488_v55 }
 0xd0d   :  { %v1500_v58 = vadd.f32 %v4429_v42, %v1498_v34 }
 0xd0e   :  { %v1499_v61 = vadd.f32 %v4429_v42, %v1497_v57 }
 0xd10   :  { %v3784_v62 = vpack.c.bf16 %v1500_v58, %v1499_v61 }
 0xd12   :  { %3785 = vmatprep.subr.bf16.mxu0 %v3784_v62 }
 0xd13   :  { %3787 = vmatpush3.bf16.msra.mxu0 %v3784_v62 }
 0xd14   :  { %3789 = vmatprep.subr.bf16.mxu0 %v4439_v53 }
 0xd16   :  { %3555 = vmatmul.mubr.msk.f32.vlgmr.msra.gmra.mrb[10].mxu0 %vm148_vm0, %v1334_v45 }
 0xd17   :  { %3791 = vmatpush3.bf16.msra.mxu0 %v4439_v53 }
 0xd18   :  { %3793 = vmatprep.subr.bf16.mxu0 %v4448_v56 }
 0xd1b   :  { %3795 = vmatpush3.bf16.msra.mxu0 %v4448_v56 }
 0xd1c   :  { %3797 = vmatprep.subr.bf16.mxu0 %v4459_v59 }
 0xd1f   :  { %3799 = vmatpush3.bf16.msra.mxu0 %v4459_v59 }
 0xd20   :  { %3811 = vmatprep.subr.bf16.mxu0 %v4518_v60 }
 0xde9   :  { %v3556_v42 = vpop.f32.mrb[10].mxu0 }
 0xdea   :  { %v1567_v63 = vpop.f32.mrb[11].mxu0 }
 0xdeb   :  { %3569 = vmatprep.mubr.msk.f32.mxu0 %vm418_vm4, %v1567_v63 }
 0xdec   :  { %3570 = vmatmul.mubr.msk.f32.vlgmr.msra.gmra.mrb[12].mxu0 %vm418_vm4, %v3556_v42 }
 0xded   :  { %3813 = vmatpush3.bf16.msra.mxu0 %v4518_v60 }
 0xdee   :  { %3815 = vmatprep.subr.bf16.mxu0 %v4528_v8 }
 0xdf1   :  { %3817 = vmatpush3.bf16.msra.mxu0 %v4528_v8 }
 0xdf2   :  { %3819 = vmatprep.subr.bf16.mxu0 %v4540_v14 }
 0xdf5   :  { %3821 = vmatpush3.bf16.msra.mxu0 %v4540_v14 }
 0xdf6   :  { %3833 = vmatprep.subr.bf16.mxu0 %v4550_v17 }
 0xebf   :  { %v3571_v53 = vpop.f32.mrb[12].mxu0 }
 0xec0   :  { %v1658_v56 = vmul.f32 %v3937_v31, %v3571_v53  ;;  %v1648_v59 = vpop.f32.mrb[13].mxu0 }
 0xec1   :  { %v1657_v2 = vmul.f32 %v3939_v52, %v1648_v59 }
 0xec2   :  { %v1660_v4 = vadd.f32 %v4478_v5, %v1658_v56 }
 0xec3   :  { %v1659_v7 = vadd.f32 %v4478_v5, %v1657_v2 }
 0xec4   :  { %v1662_v60 = vsel %vm510_vm5, %v1660_v4, -inf }
 0xec5   :  { %v1661_v9 = vsel %vm510_vm5, %v1659_v7, -inf }
 0xec6   :  { %v1663_v13 = vmax.f32 %v1661_v9, %v1662_v60 }
 0xec8   :  { %v1664_v8 = vrot.slane %v1663_v13, 4 }
 0xeca   :  { %v1665_v15 = vmax.f32 %v1663_v13, %v1664_v8 }
 0xecc   :  { %v1666_v19 = vrot.slane %v1665_v15, 2 }
 0xece   :  { %v1667_v20 = vmax.f32 %v1665_v15, %v1666_v19 }
 0xed0   :  { %v1668_v14 = vrot.slane %v1667_v20, 1 }
 0xed2   :  { %v1669_v21 = vmax.f32 %v1667_v20, %v1668_v14 }
 0xed4   :  { %v1670_v24 = vmul.f32 %v1669_v21, %v4484_v18  ;;  %v1671_v26 = vmul.f32 %v1669_v21, %v4486_v22  ;;  %v1308_v18 = vld [vmem:[#allocation2 + $0x10] sm:$0xff]  ;;  %v1309_v22 = vld [vmem:[#allocation2 + $0x18] sm:$0xff] }
 0xed5   :  { %3598 = vmatprep.mubr.msk.f32.mxu0 %vm418_vm4, %v1308_v18 }
 0xed6   :  { %v1672_v30 = vadd.f32 %v1670_v24, %v4488_v25  ;;  %v1673_v32 = vadd.f32 %v1671_v26, %v4492_v29  ;;  %3599 = vmatmul.mubr.msk.f32.vlgmr.msra.gmra.mrb[14].mxu0 %vm418_vm4, %v1309_v22 }
 0xed7   :  { %3835 = vmatpush3.bf16.msra.mxu0 %v4550_v17 }
 0xed8   :  { %v1674_v5 = vmax.f32 %v1672_v30, 0.0  ;;  %v1675_v33 = vmax.f32 %v1673_v32, 0.0  ;;  %3837 = vmatprep.subr.bf16.mxu0 %v4560_v23 }
 0xeda   :  { %3576 = vmatprep.mubr.msk.f32.mxu1 %vm510_vm5, %v1674_v5  ;;  %v3800_v37 = vpack.c.bf16 %v1675_v33, %v1674_v5 }
 0xedb   :  { %3839 = vmatpush3.bf16.msra.mxu0 %v4560_v23 }
 0xedc   :  { %3802 = vmatprep.subr.msk.bf16.mxu1 %vm4498_vm6, %v3800_v37  ;;  %3841 = vmatprep.subr.bf16.mxu0 %v4600_v3 }
 0xedd   :  { %3805 = vmatpush3.bf16.xpose.msk.msra.mxu1 %vm4498_vm6, %v3800_v37 }
 0xede   :  { %3807 = vmatprep.subr.bf16.mxu1 %v3800_v37 }
 0xee4   :  { %3577 = vmatmul.mubr.msk.f32.vlgmr.msra.gmra.mrb[16].mxu1 %vm510_vm5, %v1675_v33 }
 0xee5   :  { %3809 = vmatpush3.bf16.msra.mxu1 %v3800_v37 }
 0xfa9   :  { %v3600_v54 = vpop.f32.mrb[14].mxu0 }
 0xfaa   :  { %v1934_v34 = vpop.f32.mrb[15].mxu0  ;;  %v1940_v55 = vadd.f32 %v3600_v54, %v4571_v27 }
 0xfab   :  { %v1935_v57 = vadd.f32 %v4571_v27, %v1934_v34 }
 0xfac   :  { %v1944_v58 = vmax.f32 %v1940_v55, 0.0 }
 0xfad   :  { %v1943_v61 = vmax.f32 %v1935_v57, 0.0 }
 0xfaf   :  { %v3822_v62 = vpack.c.bf16 %v1944_v58, %v1943_v61 }
 0xfb1   :  { %3824 = vmatprep.subr.msk.bf16.mxu1 %vm4577_vm7, %v3822_v62 }
 0xfb7   :  { %v3578_v25 = vpop.f32.mrb[16].mxu1 }
 0xfb8   :  { %v1758_v29 = vmul.f32 0.17677669, %v3578_v25  ;;  %v1748_v36 = vpop.f32.mrb[17].mxu1 }
 0xfb9   :  { %v1757_v38 = vmul.f32 0.17677669, %v1748_v36 }
 0xfba   :  { %v1762_v40 = vsel %vm148_vm0, %v1758_v29, -inf }
 0xfbb   :  { %1763 = vmax.xlane.f32.xlu0 %v1762_v40  ;;  %v1759_v45 = vsel %vm148_vm0, %v1757_v38, -inf }
 0xfbc   :  { %1760 = vmax.xlane.f32.xlu1 %v1759_v45 }
0x1048   :  { %v1764_v48 = vpop.xlane.xlu0 %1763 }
0x1049   :  { %v1766_v49 = vsub.f32 %v1758_v29, %v1764_v48  ;;  %v1761_v12 = vpop.xlane.xlu1 %1760 }
0x104a   :  { %v1765_v17 = vsub.f32 %v1757_v38, %v1761_v12 }
0x104b   :  { %v1769_v28 = vmul.f32 1.442695, %v1766_v49 }
0x104c   :  { %v1767_v50 = vmul.f32 1.442695, %v1765_v17 }
0x104d   :  { %3940 = vpow2.f32 %v1769_v28  ;;  %v1283_v28 = vsel %vm148_vm0, %v4699_v46, -inf }
0x104e   :  { %3942 = vpow2.f32 %v1767_v50 }
0x1057   :  { %v3941_v23 = vpop.eup %3940 }
0x1058   :  { %v3943_v51 = vpop.eup %3942  ;;  %v1774_v31 = vsel %vm148_vm0, %v3941_v23, 0.0 }
0x1059   :  { %1775 = vadd.xlane.f32.xlu0 %v1774_v31  ;;  %v1771_v52 = vsel %vm148_vm0, %v3943_v51, 0.0 }
0x105a   :  { %1772 = vadd.xlane.f32.xlu1 %v1771_v52 }
0x10e6   :  { %v1776_v42 = vpop.xlane.xlu0 %1775 }
0x10e7   :  { %3944 = vrcp.f32 %v1776_v42  ;;  %v1773_v63 = vpop.xlane.xlu1 %1772 }
0x10e8   :  { %3946 = vrcp.f32 %v1773_v63 }
0x10f1   :  { %v3945_v53 = vpop.eup %3944 }
0x10f2   :  { %v3947_v56 = vpop.eup %3946  ;;  %v1780_v2 = vmul.f32 %v3945_v53, %v3941_v23 }
0x10f3   :  { %v1779_v59 = vmul.f32 %v3947_v56, %v3943_v51 }
0x10f5   :  { %3583 = vmatprep.mubr.msk.f32.mxu1 %vm148_vm0, %v1779_v59 }
0x10f6   :  { %3584 = vmatmul.mubr.msk.f32.vlgmr.msra.gmra.mrb[18].mxu1 %vm148_vm0, %v1780_v2 }
0x10f7   :  { %3827 = vmatpush3.bf16.xpose.msk.msra.mxu1 %vm4577_vm7, %v3822_v62  ;;  %3605 = vmatprep.mubr.msk.f32.mxu1 %vm251_vm3, %v1943_v61 }
0x10f8   :  { %3829 = vmatprep.subr.bf16.mxu1 %v3822_v62 }
0x10fe   :  { %3606 = vmatmul.mubr.msk.f32.vlgmr.msra.gmra.mrb[20].mxu1 %vm251_vm3, %v1944_v58 }
0x10ff   :  { %3831 = vmatpush3.bf16.msra.mxu1 %v3822_v62 }
0x11c9   :  { %v3585_v27 = vpop.f32.mrb[18].mxu1 }
0x11ca   :  { %v1853_v4 = vpop.f32.mrb[19].mxu1 }
0x11cb   :  { %3623 = vmatprep.mubr.msk.f32.mxu0 %vm510_vm5, %v1853_v4 }
0x11cc   :  { %3624 = vmatmul.mubr.msk.f32.vlgmr.msra.gmra.mrb[16].mxu0 %vm510_vm5, %v3585_v27 }
0x11cd   :  { %3843 = vmatpush3.bf16.msra.mxu0 %v4600_v3 }
0x11ce   :  { %3845 = vmatprep.subr.bf16.mxu0 %v4605_v6 }
0x11d1   :  { %v3607_v7 = vpop.f32.mrb[20].mxu1  ;;  %3847 = vmatpush3.bf16.msra.mxu0 %v4605_v6 }
0x11d2   :  { %v2027_v60 = vmul.f32 0.125, %v3607_v7  ;;  %v2017_v9 = vpop.f32.mrb[21].mxu1  ;;  %3849 = vmatprep.subr.bf16.mxu0 %v4616_v11 }
0x11d3   :  { %v2026_v13 = vmul.f32 0.125, %v2017_v9 }
0x11d4   :  { %v2031_v8 = vsel %vm148_vm0, %v2027_v60, -inf }
0x11d5   :  { %2032 = vmax.xlane.f32.xlu0 %v2031_v8  ;;  %v2028_v15 = vsel %vm148_vm0, %v2026_v13, -inf  ;;  %3851 = vmatpush3.bf16.msra.mxu0 %v4616_v11 }
0x11d6   :  { %2029 = vmax.xlane.f32.xlu1 %v2028_v15  ;;  %3853 = vmatprep.subr.bf16.mxu0 %v4626_v16 }
0x11d9   :  { %3855 = vmatpush3.bf16.msra.mxu0 %v4626_v16 }
0x1262   :  { %v2033_v3 = vpop.xlane.xlu0 %2032 }
0x1263   :  { %v2035_v19 = vsub.f32 %v2027_v60, %v2033_v3  ;;  %v2030_v6 = vpop.xlane.xlu1 %2029 }
0x1264   :  { %v2034_v20 = vsub.f32 %v2026_v13, %v2030_v6 }
0x1265   :  { %v2038_v14 = vmul.f32 1.442695, %v2035_v19 }
0x1266   :  { %v2036_v21 = vmul.f32 1.442695, %v2034_v20 }
0x1267   :  { %3948 = vpow2.f32 %v2038_v14 }
0x1268   :  { %3950 = vpow2.f32 %v2036_v21 }
0x1271   :  { %v3949_v24 = vpop.eup %3948 }
0x1272   :  { %v3951_v26 = vpop.eup %3950  ;;  %v2043_v30 = vsel %vm148_vm0, %v3949_v24, 0.0 }
0x1273   :  { %2044 = vadd.xlane.f32.xlu0 %v2043_v30  ;;  %v2040_v11 = vsel %vm148_vm0, %v3951_v26, 0.0 }
0x1274   :  { %2041 = vadd.xlane.f32.xlu1 %v2040_v11 }
0x1300   :  { %v2045_v32 = vpop.xlane.xlu0 %2044 }
0x1301   :  { %3952 = vrcp.f32 %v2045_v32  ;;  %v2042_v5 = vpop.xlane.xlu1 %2041 }
0x1302   :  { %3954 = vrcp.f32 %v2042_v5 }
0x130b   :  { %v3953_v16 = vpop.eup %3952 }
0x130c   :  { %v3955_v33 = vpop.eup %3954  ;;  %v2049_v18 = vmul.f32 %v3953_v16, %v3949_v24 }
0x130d   :  { %v2048_v37 = vmul.f32 %v3955_v33, %v3951_v26 }
0x130f   :  { %3612 = vmatprep.mubr.msk.f32.mxu1 %vm148_vm0, %v2048_v37 }
0x1310   :  { %3613 = vmatmul.mubr.msk.f32.vlgmr.msra.gmra.mrb[22].mxu1 %vm148_vm0, %v2049_v18 }
0x1311   :  { %3649 = vmatprep.mubr.msk.f32.mxu1 %vm251_vm3, %v4665_v10 }
0x13e3   :  { %v3614_v22 = vpop.f32.mrb[22].mxu1 }
0x13e4   :  { %v2122_v25 = vpop.f32.mrb[23].mxu1 }
0x13e5   :  { %3642 = vmatprep.mubr.msk.f32.mxu0 %vm251_vm3, %v2122_v25  ;;  %v4812_v25 = vmov 1.0  }
0x13e6   :  { %3643 = vmatmul.mubr.msk.f32.vlgmr.msra.gmra.mrb[16].mxu0 %vm251_vm3, %v3614_v22 }
0x14b9   :  { %v3644_v29 = vpop.f32.mrb[16].mxu0 }
0x14ba   :  { %v2294_v36 = vadd.f32 %v3644_v29, %v4638_v35  ;;  %v2284_v38 = vpop.f32.mrb[17].mxu0  ;;  %v4814_v29 = vmov 1.0  }
0x14bb   :  { %v2293_v40 = vadd.f32 %v4638_v35, %v2284_v38  ;;  %v1280_v35 = vsel %vm148_vm0, %v4701_v47, -inf }
0x14bc   :  { %v4778_v45 = vmax.f32 %v2294_v36, 0.0 }
0x14bd   :  { %v4780_v48 = vmax.f32 %v2293_v40, 0.0 }
0x14be   :  { %v2298_v49 = vmul.f32 %v4778_v45, %v4778_v45 }
0x14bf   :  { %v2297_v10 = vmul.f32 %v4780_v48, %v4780_v48 }
0x14c0   :  { %v2302_v12 = vsel %vm251_vm3, %v2298_v49, 0.0 }
0x14c1   :  { %2303 = vadd.xlane.f32.xlu0 %v2302_v12  ;;  %v2299_v17 = vsel %vm251_vm3, %v2297_v10, 0.0 }
0x14c2   :  { %2300 = vadd.xlane.f32.xlu1 %v2299_v17 }
0x14c5   :  { %1284 = vmax.xlane.f32.xlu0 %v1283_v28 }
0x14c6   :  { %1281 = vmax.xlane.f32.xlu1 %v1280_v35 }
0x154e   :  { %v2304_v50 = vpop.xlane.xlu0 %2303 }
0x154f   :  { %v2306_v23 = vmax.f32 %v2304_v50, 1e-12  ;;  %v2301_v51 = vpop.xlane.xlu1 %2300 }
0x1550   :  { %v2305_v31 = vmax.f32 %v2301_v51, 1e-12 }
0x1551   :  { %3956 = vrsqrt.f32 %v2306_v23 }
0x1552   :  { %3958 = vrsqrt.f32 %v2305_v31  ;;  %v1285_v52 = vpop.xlane.xlu0 %1284 }
0x1553   :  { %v1282_v54 = vpop.xlane.xlu1 %1281 }
0x1554   :  { %v1286_v34 = vmax.f32 %v1282_v54, %v1285_v52 }
0x1556   :  { %v1287_v55 = vrot.slane %v1286_v34, 4 }
0x1558   :  { %v1288_v57 = vmax.f32 %v1286_v34, %v1287_v55 }
0x155a   :  { %v1289_v58 = vrot.slane %v1288_v57, 2 }
0x155b   :  { %v3957_v61 = vpop.eup %3956 }
0x155c   :  { %v3959_v62 = vpop.eup %3958  ;;  %v1290_v42 = vmax.f32 %v1288_v57, %v1289_v58  ;;  %v2310_v63 = vmul.f32 %v3957_v61, %v4778_v45 }
0x155d   :  { %v2309_v53 = vmul.f32 %v3959_v62, %v4780_v48 }
0x155e   :  { %v1291_v56 = vrot.slane %v1290_v42, 1 }
0x155f   :  { %v3856_v59 = vpack.c.bf16 %v2310_v63, %v2309_v53 }
0x1560   :  { %v1292_v2 = vmax.f32 %v1290_v42, %v1291_v56 }
0x1561   :  { %3858 = vmatprep.subr.msk.bf16.mxu1 %vm4577_vm7, %v3856_v59 }
0x1562   :  { %v1293_v27 = vsub.f32 %v4701_v47, %v1292_v2  ;;  %v1294_v4 = vsub.f32 %v4699_v46, %v1292_v2  ;;  %3861 = vmatpush3.bf16.xpose.msk.msra.mxu1 %vm4577_vm7, %v3856_v59 }
0x1564   :  { %v1295_v7 = vmul.f32 10.0, %v1293_v27  ;;  %v1296_v60 = vmul.f32 10.0, %v1294_v4 }
0x1566   :  { %v1297_v9 = vmul.f32 1.442695, %v1295_v7  ;;  %v1299_v13 = vmul.f32 1.442695, %v1296_v60 }
0x1568   :  { %3960 = vpow2.f32 %v1297_v9 }
0x1569   :  { %3962 = vpow2.f32 %v1299_v13  ;;  %3650 = vmatmul.mubr.msk.f32.vlgmr.msra.gmra.mrb[24].mxu1 %vm251_vm3, %v4685_v41 }
0x1572   :  { %v4802_v8 = vpop.eup %3960 }
0x1573   :  { %v4804_v15 = vpop.eup %3962 }
0x163c   :  { %v3651_v3 = vpop.f32.mrb[24].mxu1 }
0x163d   :  { %v2383_v47 = vpop.f32.mrb[25].mxu1  ;;  %v2395_v46 = vsel %vm148_vm0, %v3651_v3, -inf }
0x163e   :  { %2396 = vmax.xlane.f32.xlu0 %v2395_v46  ;;  %v2392_v39 = vsel %vm148_vm0, %v2383_v47, -inf }
0x163f   :  { %2393 = vmax.xlane.f32.xlu1 %v2392_v39 }
0x16cb   :  { %v2397_v19 = vpop.xlane.xlu0 %2396 }
0x16cc   :  { %v2394_v6 = vpop.xlane.xlu1 %2393 }
0x16cd   :  { %v2398_v20 = vmax.f32 %v2394_v6, %v2397_v19 }
0x16cf   :  { %v2399_v14 = vrot.slane %v2398_v20, 4 }
0x16d1   :  { %v2400_v21 = vmax.f32 %v2398_v20, %v2399_v14 }
0x16d3   :  { %v2401_v24 = vrot.slane %v2400_v21, 2 }
0x16d5   :  { %v2402_v26 = vmax.f32 %v2400_v21, %v2401_v24 }
0x16d7   :  { %v2403_v41 = vrot.slane %v2402_v26, 1 }
0x16d9   :  { %v2404_v30 = vmax.f32 %v2402_v26, %v2403_v41 }
0x16db   :  { %v2405_v11 = vsub.f32 %v2383_v47, %v2404_v30  ;;  %v2406_v32 = vsub.f32 %v3651_v3, %v2404_v30 }
0x16dd   :  { %v2407_v5 = vmul.f32 10.0, %v2405_v11  ;;  %v2408_v16 = vmul.f32 10.0, %v2406_v32 }
0x16df   :  { %v2409_v33 = vmul.f32 1.442695, %v2407_v5  ;;  %v2411_v37 = vmul.f32 1.442695, %v2408_v16 }
0x16e1   :  { %3964 = vpow2.f32 %v2409_v33 }
0x16e2   :  { %3966 = vpow2.f32 %v2411_v37 }
0x16eb   :  { %v4808_v18 = vpop.eup %3964 }
0x16ec   :  { %v4810_v22 = vpop.eup %3966 }
0x16ed LB: > { %v2425_v36 = vmul.f32 %v4208_v29, %v4802_v8  ;;  %v2447_v38 = vmul.f32 %v4204_v25, %v4808_v18  ;;  %v2426_v40 = vmul.f32 %v4208_v29, %v4804_v15  ;;  %v2448_v49 = vmul.f32 %v4204_v25, %v4810_v22  ;;  %s2418_s14 = sadd.s32 1, %s4212_s14   ;;  %s4212_s14 = sphi %s4816_s14, %s2418_s14   ;;  %v4208_v29 = vphi %v4814_v29, %v5062_v29   ;;  %v4204_v25 = vphi %v4812_v25, %v5061_v25  }
0x16ee   : > { %p2415_p10 = scmp.ge.s32.totalorder %s2418_s14, 10  }
0x16ef   : > { %v2427_v10 = vsel %vm148_vm0, %v2425_v36, 0.0  ;;  %v2449_v12 = vsel %vm148_vm0, %v2447_v38, 0.0  ;;  %v2430_v17 = vsel %vm148_vm0, %v2426_v40, 0.0  ;;  %v2452_v28 = vsel %vm148_vm0, %v2448_v49, 0.0  ;;  %s4221_s28 = smov (%p2415_p10), [#allocation8]  }
0x16f0   : > { %2428 = vadd.xlane.f32.xlu0 %v2427_v10  ;;  %2450 = vadd.xlane.f32.xlu1 %v2449_v12  ;;  %s3134_s27 = sshll.u32 (%p2415_p10), %s4221_s28, 4  ;;  %s3135_s27 = int_to_ptr.vmem [resolvable:$true] %s3134_s27 }
0x16f1   :  { %s4162_s19 = scalar_lea.vmem (%p2415_p10), %s3135_s27, 512  ;;  %p4167_p12 = scmp.lt.s32.totalorder (%p2415_p10), %s3135_s27, %s3135_s27 }
0x16f2   :  { %p4163_p11 = scmp.ne.s32.totalorder (%p2415_p10), %s3135_s27, %s4162_s19  ;;  %p4168_p13 = scmp.lt.s32.totalorder (%p2415_p10), %s4162_s19, %s4162_s19 }
0x16f4   : > { %2431 = vadd.xlane.f32.xlu0 %v2430_v17  ;;  %2453 = vadd.xlane.f32.xlu1 %v2452_v28  ;;  %p4169_p0 = por (%p2415_p10), %p4168_p13, %p4167_p12 }
0x16f6   :  { %p4170_p1 = pnand (%p2415_p10), %p4169_p0, %p4163_p11 }
0x177d   : > { %v2429_v35 = vpop.xlane.xlu0 %2428  ;;  %v2451_v50 = vpop.xlane.xlu1 %2450 }
0x177e   : > { %3968 = vrcp.f32 %v2429_v35 }
0x177f   : > { %3970 = vrcp.f32 %v2451_v50 }
0x1781   : > { %v2432_v23 = vpop.xlane.xlu0 %2431  ;;  %v2454_v51 = vpop.xlane.xlu1 %2453 }
0x1782   : > { %3972 = vrcp.f32 %v2432_v23 }
0x1783   : > { %3974 = vrcp.f32 %v2454_v51 }
0x1788   : > { %v3969_v31 = vpop.eup %3968 }
0x1789   : > { %v3971_v52 = vpop.eup %3970  ;;  %v2435_v34 = vmul.f32 %v3969_v31, %v4802_v8 }
0x178a   : > { %v2457_v54 = vmul.f32 %v3971_v52, %v4808_v18 }
0x178b   : > { %v2437_v42 = vsel %vm148_vm0, %v2435_v34, 0.0 }
0x178c   : > { %v3973_v55 = vpop.eup %3972  ;;  %v2459_v61 = vsel %vm148_vm0, %v2457_v54, 0.0 }
0x178d   : > { %v3975_v57 = vpop.eup %3974  ;;  %v2436_v58 = vmul.f32 %v3973_v55, %v4804_v15 }
0x178e   : > { %v2458_v62 = vmul.f32 %v3975_v57, %v4810_v22 }
0x178f   : > { %v2438_v63 = vsel %vm148_vm0, %v2436_v58, 0.0 }
0x1790   : > { %v2439_v53 = vadd.f32 %v2438_v63, %v2437_v42  ;;  %v2460_v56 = vsel %vm148_vm0, %v2458_v62, 0.0 }
0x1791   : > { %v2461_v59 = vadd.f32 %v2460_v56, %v2459_v61 }
0x1792   : > { %v2440_v2 = vrot.slane %v2439_v53, 4 }
0x1793   : > { %v2462_v27 = vrot.slane %v2461_v59, 4 }
0x1794   : > { %v2441_v4 = vadd.f32 %v2440_v2, %v2439_v53 }
0x1795   : > { %v2463_v7 = vadd.f32 %v2462_v27, %v2461_v59 }
0x1796   : > { %v2442_v60 = vrot.slane %v2441_v4, 2 }
0x1797   : > { %v2464_v9 = vrot.slane %v2463_v7, 2 }
0x1798   : > { %v2443_v13 = vadd.f32 %v2442_v60, %v2441_v4 }
0x1799   : > { %v2465_v3 = vadd.f32 %v2464_v9, %v2463_v7 }
0x179a   : > { %v2444_v47 = vrot.slane %v2443_v13, 1 }
0x179b   : > { %v2466_v46 = vrot.slane %v2465_v3, 1 }
0x179c   : > { %v2445_v39 = vadd.f32 %v2444_v47, %v2443_v13 }
0x179d   : > { %v2467_v19 = vadd.f32 %v2466_v46, %v2465_v3 }
0x179e   : > { %3976 = vrcp.f32 %v2445_v39 }
0x179f   : > { %3978 = vrcp.f32 %v2467_v19 }
0x17a8   : > { %v3977_v6 = vpop.eup %3976 }
0x17a9   : > { %v3979_v20 = vpop.eup %3978  ;;  %v2469_v14 = vmul.f32 %v3977_v6, %v4802_v8  ;;  %v2470_v21 = vmul.f32 %v3977_v6, %v4804_v15 }
0x17aa   : > { %v2492_v41 = vmul.f32 %v3979_v20, %v4810_v22  ;;  %v2491_v30 = vmul.f32 %v3979_v20, %v4808_v18 }
0x17ab   : > { %v2471_v24 = vsel %vm148_vm0, %v2469_v14, 0.0  ;;  %v2474_v26 = vsel %vm148_vm0, %v2470_v21, 0.0 }
0x17ac   : > { %2472 = vadd.xlane.f32.xlu0 %v2471_v24  ;;  %2475 = vadd.xlane.f32.xlu1 %v2474_v26  ;;  %v2496_v11 = vsel %vm148_vm0, %v2492_v41, 0.0  ;;  %v2493_v32 = vsel %vm148_vm0, %v2491_v30, 0.0 }
0x17b0   : > { %2497 = vadd.xlane.f32.xlu1 %v2496_v11  ;;  %2494 = vadd.xlane.f32.xlu0 %v2493_v32 }
0x1839   : > { %v2473_v5 = vpop.xlane.xlu0 %2472  ;;  %v2476_v16 = vpop.xlane.xlu1 %2475 }
0x183a   : > { %3980 = vrcp.f32 %v2473_v5 }
0x183b   : > { %3982 = vrcp.f32 %v2476_v16 }
0x183d   : > { %v2495_v33 = vpop.xlane.xlu0 %2494  ;;  %v2498_v37 = vpop.xlane.xlu1 %2497 }
0x183e   : > { %3984 = vrcp.f32 %v2495_v33 }
0x183f   : > { %3986 = vrcp.f32 %v2498_v37 }
0x1844   : > { %v3981_v25 = vpop.eup %3980 }
0x1845   : > { %v3983_v29 = vpop.eup %3982  ;;  %v2479_v36 = vmul.f32 %v3981_v25, %v4802_v8 }
0x1846   : > { %v2480_v38 = vmul.f32 %v3983_v29, %v4804_v15 }
0x1847   : > { %v2481_v40 = vsel %vm148_vm0, %v2479_v36, 0.0 }
0x1848   : > { %v3985_v49 = vpop.eup %3984  ;;  %v2482_v10 = vsel %vm148_vm0, %v2480_v38, 0.0 }
0x1849   : > { %v3987_v12 = vpop.eup %3986  ;;  %v2483_v17 = vadd.f32 %v2482_v10, %v2481_v40  ;;  %v2501_v28 = vmul.f32 %v3985_v49, %v4808_v18 }
0x184a   : > { %v2502_v35 = vmul.f32 %v3987_v12, %v4810_v22 }
0x184b   : > { %v2484_v50 = vrot.slane %v2483_v17, 4  ;;  %v2503_v23 = vsel %vm148_vm0, %v2501_v28, 0.0 }
0x184c   : > { %v2504_v51 = vsel %vm148_vm0, %v2502_v35, 0.0 }
0x184d   : > { %v2485_v31 = vadd.f32 %v2484_v50, %v2483_v17  ;;  %v2505_v52 = vadd.f32 %v2504_v51, %v2503_v23 }
0x184f   : > { %v2486_v54 = vrot.slane %v2485_v31, 2  ;;  %v2506_v34 = vrot.slane %v2505_v52, 4 }
0x1851   : > { %v2487_v55 = vadd.f32 %v2486_v54, %v2485_v31  ;;  %v2507_v57 = vadd.f32 %v2506_v34, %v2505_v52 }
0x1853   : > { %v2488_v58 = vrot.slane %v2487_v55, 1  ;;  %v2508_v61 = vrot.slane %v2507_v57, 2 }
0x1855   : > { %v2489_v62 = vadd.f32 %v2488_v58, %v2487_v55  ;;  %v2509_v42 = vadd.f32 %v2508_v61, %v2507_v57 }
0x1857   : > { %3988 = vrcp.f32 %v2489_v62  ;;  %v2510_v63 = vrot.slane %v2509_v42, 1 }
0x1859   : > { %v2511_v53 = vadd.f32 %v2510_v63, %v2509_v42 }
0x185b   : > { %3990 = vrcp.f32 %v2511_v53 }
0x1861   : > { %v3989_v56 = vpop.eup %3988 }
0x1862   : > { %v2514_v59 = vmul.f32 %v3989_v56, %v4804_v15  ;;  %v2513_v2 = vmul.f32 %v3989_v56, %v4802_v8 }
0x1864   : > { %v2518_v27 = vsel %vm148_vm0, %v2514_v59, 0.0  ;;  %v2515_v4 = vsel %vm148_vm0, %v2513_v2, 0.0 }
0x1865   : > { %v3991_v7 = vpop.eup %3990  ;;  %2519 = vadd.xlane.f32.xlu1 %v2518_v27  ;;  %2516 = vadd.xlane.f32.xlu0 %v2515_v4 }
0x1866   : > { %v2536_v60 = vmul.f32 %v3991_v7, %v4810_v22  ;;  %v2535_v9 = vmul.f32 %v3991_v7, %v4808_v18 }
0x1868   : > { %v2540_v13 = vsel %vm148_vm0, %v2536_v60, 0.0  ;;  %v2537_v3 = vsel %vm148_vm0, %v2535_v9, 0.0 }
0x1869   : > { %2541 = vadd.xlane.f32.xlu1 %v2540_v13  ;;  %2538 = vadd.xlane.f32.xlu0 %v2537_v3 }
0x18f2   : > { %v2517_v47 = vpop.xlane.xlu0 %2516  ;;  %v2520_v46 = vpop.xlane.xlu1 %2519 }
0x18f3   : > { %3992 = vrcp.f32 %v2517_v47 }
0x18f4   : > { %3994 = vrcp.f32 %v2520_v46 }
0x18f6   : > { %v2539_v39 = vpop.xlane.xlu0 %2538  ;;  %v2542_v19 = vpop.xlane.xlu1 %2541 }
0x18f7   : > { %3996 = vrcp.f32 %v2539_v39 }
0x18f8   : > { %3998 = vrcp.f32 %v2542_v19 }
0x18fd   : > { %v3993_v6 = vpop.eup %3992 }
0x18fe   : > { %v3995_v20 = vpop.eup %3994  ;;  %v2523_v14 = vmul.f32 %v3993_v6, %v4802_v8 }
0x18ff   : > { %v2524_v21 = vmul.f32 %v3995_v20, %v4804_v15 }
0x1900   : > { %v2525_v24 = vsel %vm148_vm0, %v2523_v14, 0.0 }
0x1901   : > { %v3997_v26 = vpop.eup %3996  ;;  %v2526_v41 = vsel %vm148_vm0, %v2524_v21, 0.0 }
0x1902   : > { %v3999_v30 = vpop.eup %3998  ;;  %v2527_v11 = vadd.f32 %v2526_v41, %v2525_v24  ;;  %v2545_v32 = vmul.f32 %v3997_v26, %v4808_v18 }
0x1903   : > { %v2546_v5 = vmul.f32 %v3999_v30, %v4810_v22 }
0x1904   : > { %v2528_v16 = vrot.slane %v2527_v11, 4  ;;  %v2547_v33 = vsel %vm148_vm0, %v2545_v32, 0.0 }
0x1905   : > { %v2548_v37 = vsel %vm148_vm0, %v2546_v5, 0.0 }
0x1906   : > { %v2529_v25 = vadd.f32 %v2528_v16, %v2527_v11  ;;  %v2549_v29 = vadd.f32 %v2548_v37, %v2547_v33 }
0x1908   : > { %v2530_v36 = vrot.slane %v2529_v25, 2  ;;  %v2550_v38 = vrot.slane %v2549_v29, 4 }
0x190a   : > { %v2531_v40 = vadd.f32 %v2530_v36, %v2529_v25  ;;  %v2551_v49 = vadd.f32 %v2550_v38, %v2549_v29 }
0x190c   : > { %v2532_v10 = vrot.slane %v2531_v40, 1  ;;  %v2552_v12 = vrot.slane %v2551_v49, 2 }
0x190e   : > { %v2533_v17 = vadd.f32 %v2532_v10, %v2531_v40  ;;  %v2553_v28 = vadd.f32 %v2552_v12, %v2551_v49 }
0x1910   : > { %4000 = vrcp.f32 %v2533_v17  ;;  %v2554_v35 = vrot.slane %v2553_v28, 1 }
0x1912   : > { %v2555_v50 = vadd.f32 %v2554_v35, %v2553_v28 }
0x1914   : > { %4002 = vrcp.f32 %v2555_v50 }
0x191a   : > { %v4001_v23 = vpop.eup %4000 }
0x191b   : > { %v2558_v51 = vmul.f32 %v4001_v23, %v4804_v15  ;;  %v2557_v31 = vmul.f32 %v4001_v23, %v4802_v8 }
0x191d   : > { %v2562_v52 = vsel %vm148_vm0, %v2558_v51, 0.0  ;;  %v2559_v54 = vsel %vm148_vm0, %v2557_v31, 0.0 }
0x191e   : > { %v4003_v34 = vpop.eup %4002  ;;  %2563 = vadd.xlane.f32.xlu1 %v2562_v52  ;;  %2560 = vadd.xlane.f32.xlu0 %v2559_v54 }
0x191f   : > { %v2580_v55 = vmul.f32 %v4003_v34, %v4810_v22  ;;  %v2579_v57 = vmul.f32 %v4003_v34, %v4808_v18 }
0x1921   : > { %v2584_v58 = vsel %vm148_vm0, %v2580_v55, 0.0  ;;  %v2581_v61 = vsel %vm148_vm0, %v2579_v57, 0.0 }
0x1922   : > { %2585 = vadd.xlane.f32.xlu1 %v2584_v58  ;;  %2582 = vadd.xlane.f32.xlu0 %v2581_v61 }
0x19ab   : > { %v2561_v62 = vpop.xlane.xlu0 %2560  ;;  %v2564_v42 = vpop.xlane.xlu1 %2563 }
0x19ac   : > { %4004 = vrcp.f32 %v2561_v62 }
0x19ad   : > { %4006 = vrcp.f32 %v2564_v42 }
0x19af   : > { %v2583_v63 = vpop.xlane.xlu0 %2582  ;;  %v2586_v53 = vpop.xlane.xlu1 %2585 }
0x19b0   : > { %4008 = vrcp.f32 %v2583_v63 }
0x19b1   : > { %4010 = vrcp.f32 %v2586_v53 }
0x19b6   : > { %v4005_v56 = vpop.eup %4004 }
0x19b7   : > { %v4007_v59 = vpop.eup %4006  ;;  %v2567_v2 = vmul.f32 %v4005_v56, %v4802_v8 }
0x19b8   : > { %v2568_v27 = vmul.f32 %v4007_v59, %v4804_v15 }
0x19b9   : > { %v2569_v4 = vsel %vm148_vm0, %v2567_v2, 0.0 }
0x19ba   : > { %v4009_v7 = vpop.eup %4008  ;;  %v2570_v60 = vsel %vm148_vm0, %v2568_v27, 0.0 }
0x19bb   : > { %v4011_v9 = vpop.eup %4010  ;;  %v2571_v13 = vadd.f32 %v2570_v60, %v2569_v4  ;;  %v2589_v3 = vmul.f32 %v4009_v7, %v4808_v18 }
0x19bc   : > { %v2590_v47 = vmul.f32 %v4011_v9, %v4810_v22 }
0x19bd   : > { %v2572_v46 = vrot.slane %v2571_v13, 4  ;;  %v2591_v39 = vsel %vm148_vm0, %v2589_v3, 0.0 }
0x19be   : > { %v2592_v19 = vsel %vm148_vm0, %v2590_v47, 0.0 }
0x19bf   : > { %v2573_v6 = vadd.f32 %v2572_v46, %v2571_v13  ;;  %v2593_v20 = vadd.f32 %v2592_v19, %v2591_v39 }
0x19c1   : > { %v2574_v14 = vrot.slane %v2573_v6, 2  ;;  %v2594_v21 = vrot.slane %v2593_v20, 4 }
0x19c3   : > { %v2575_v24 = vadd.f32 %v2574_v14, %v2573_v6  ;;  %v2595_v26 = vadd.f32 %v2594_v21, %v2593_v20 }
0x19c5   : > { %v2576_v41 = vrot.slane %v2575_v24, 1  ;;  %v2596_v30 = vrot.slane %v2595_v26, 2 }
0x19c7   : > { %v2577_v11 = vadd.f32 %v2576_v41, %v2575_v24  ;;  %v2597_v32 = vadd.f32 %v2596_v30, %v2595_v26 }
0x19c9   : > { %4012 = vrcp.f32 %v2577_v11  ;;  %v2598_v5 = vrot.slane %v2597_v32, 1 }
0x19cb   : > { %v2599_v16 = vadd.f32 %v2598_v5, %v2597_v32 }
0x19cd   : > { %4014 = vrcp.f32 %v2599_v16 }
0x19d3   : > { %v4013_v33 = vpop.eup %4012 }
0x19d4   : > { %v2602_v37 = vmul.f32 %v4013_v33, %v4804_v15  ;;  %v2601_v25 = vmul.f32 %v4013_v33, %v4802_v8 }
0x19d6   : > { %v2606_v29 = vsel %vm148_vm0, %v2602_v37, 0.0  ;;  %v2603_v36 = vsel %vm148_vm0, %v2601_v25, 0.0 }
0x19d7   : > { %v4015_v38 = vpop.eup %4014  ;;  %2607 = vadd.xlane.f32.xlu1 %v2606_v29  ;;  %2604 = vadd.xlane.f32.xlu0 %v2603_v36 }
0x19d8   : > { %v2624_v40 = vmul.f32 %v4015_v38, %v4810_v22  ;;  %v2623_v49 = vmul.f32 %v4015_v38, %v4808_v18 }
0x19da   : > { %v2628_v10 = vsel %vm148_vm0, %v2624_v40, 0.0  ;;  %v2625_v12 = vsel %vm148_vm0, %v2623_v49, 0.0 }
0x19db   : > { %2629 = vadd.xlane.f32.xlu1 %v2628_v10  ;;  %2626 = vadd.xlane.f32.xlu0 %v2625_v12 }
0x1a64   : > { %v2605_v17 = vpop.xlane.xlu0 %2604  ;;  %v2608_v28 = vpop.xlane.xlu1 %2607 }
0x1a65   : > { %4016 = vrcp.f32 %v2605_v17 }
0x1a66   : > { %4018 = vrcp.f32 %v2608_v28 }
0x1a68   : > { %v2627_v35 = vpop.xlane.xlu0 %2626  ;;  %v2630_v50 = vpop.xlane.xlu1 %2629 }
0x1a69   : > { %4020 = vrcp.f32 %v2627_v35 }
0x1a6a   : > { %4022 = vrcp.f32 %v2630_v50 }
0x1a6f   : > { %v4017_v23 = vpop.eup %4016 }
0x1a70   : > { %v4019_v51 = vpop.eup %4018  ;;  %v2611_v31 = vmul.f32 %v4017_v23, %v4802_v8 }
0x1a71   : > { %v2612_v52 = vmul.f32 %v4019_v51, %v4804_v15 }
0x1a72   : > { %v2613_v54 = vsel %vm148_vm0, %v2611_v31, 0.0 }
0x1a73   : > { %v4021_v34 = vpop.eup %4020  ;;  %v2614_v55 = vsel %vm148_vm0, %v2612_v52, 0.0 }
0x1a74   : > { %v4023_v57 = vpop.eup %4022  ;;  %v2615_v58 = vadd.f32 %v2614_v55, %v2613_v54  ;;  %v2633_v61 = vmul.f32 %v4021_v34, %v4808_v18 }
0x1a75   : > { %v2634_v62 = vmul.f32 %v4023_v57, %v4810_v22 }
0x1a76   : > { %v2616_v42 = vrot.slane %v2615_v58, 4  ;;  %v2635_v63 = vsel %vm148_vm0, %v2633_v61, 0.0 }
0x1a77   : > { %v2636_v53 = vsel %vm148_vm0, %v2634_v62, 0.0 }
0x1a78   : > { %v2617_v56 = vadd.f32 %v2616_v42, %v2615_v58  ;;  %v2637_v59 = vadd.f32 %v2636_v53, %v2635_v63 }
0x1a7a   : > { %v2618_v2 = vrot.slane %v2617_v56, 2  ;;  %v2638_v27 = vrot.slane %v2637_v59, 4 }
0x1a7c   : > { %v2619_v4 = vadd.f32 %v2618_v2, %v2617_v56  ;;  %v2639_v7 = vadd.f32 %v2638_v27, %v2637_v59 }
0x1a7e   : > { %v2620_v60 = vrot.slane %v2619_v4, 1  ;;  %v2640_v9 = vrot.slane %v2639_v7, 2 }
0x1a80   : > { %v2621_v13 = vadd.f32 %v2620_v60, %v2619_v4  ;;  %v2641_v3 = vadd.f32 %v2640_v9, %v2639_v7 }
0x1a82   : > { %4024 = vrcp.f32 %v2621_v13  ;;  %v2642_v47 = vrot.slane %v2641_v3, 1 }
0x1a84   : > { %v2643_v46 = vadd.f32 %v2642_v47, %v2641_v3 }
0x1a86   : > { %4026 = vrcp.f32 %v2643_v46 }
0x1a8c   : > { %v4025_v39 = vpop.eup %4024 }
0x1a8d   : > { %v2646_v19 = vmul.f32 %v4025_v39, %v4804_v15  ;;  %v2645_v6 = vmul.f32 %v4025_v39, %v4802_v8 }
0x1a8f   : > { %v2650_v20 = vsel %vm148_vm0, %v2646_v19, 0.0  ;;  %v2647_v14 = vsel %vm148_vm0, %v2645_v6, 0.0 }
0x1a90   : > { %v4027_v21 = vpop.eup %4026  ;;  %2651 = vadd.xlane.f32.xlu1 %v2650_v20  ;;  %2648 = vadd.xlane.f32.xlu0 %v2647_v14 }
0x1a91   : > { %v2668_v24 = vmul.f32 %v4027_v21, %v4810_v22  ;;  %v2667_v26 = vmul.f32 %v4027_v21, %v4808_v18 }
0x1a93   : > { %v2672_v41 = vsel %vm148_vm0, %v2668_v24, 0.0  ;;  %v2669_v30 = vsel %vm148_vm0, %v2667_v26, 0.0 }
0x1a94   : > { %2673 = vadd.xlane.f32.xlu1 %v2672_v41  ;;  %2670 = vadd.xlane.f32.xlu0 %v2669_v30 }
0x1b1d   : > { %v2649_v11 = vpop.xlane.xlu0 %2648  ;;  %v2652_v32 = vpop.xlane.xlu1 %2651 }
0x1b1e   : > { %4028 = vrcp.f32 %v2649_v11 }
0x1b1f   : > { %4030 = vrcp.f32 %v2652_v32 }
0x1b21   : > { %v2671_v5 = vpop.xlane.xlu0 %2670  ;;  %v2674_v16 = vpop.xlane.xlu1 %2673 }
0x1b22   : > { %4032 = vrcp.f32 %v2671_v5 }
0x1b23   : > { %4034 = vrcp.f32 %v2674_v16 }
0x1b28   : > { %v4029_v33 = vpop.eup %4028 }
0x1b29   : > { %v4031_v37 = vpop.eup %4030  ;;  %v2655_v25 = vmul.f32 %v4029_v33, %v4802_v8 }
0x1b2a   : > { %v2656_v29 = vmul.f32 %v4031_v37, %v4804_v15 }
0x1b2b   : > { %v2657_v36 = vsel %vm148_vm0, %v2655_v25, 0.0 }
0x1b2c   : > { %v4033_v38 = vpop.eup %4032  ;;  %v2658_v40 = vsel %vm148_vm0, %v2656_v29, 0.0 }
0x1b2d   : > { %v4035_v49 = vpop.eup %4034  ;;  %v2659_v10 = vadd.f32 %v2658_v40, %v2657_v36  ;;  %v2677_v12 = vmul.f32 %v4033_v38, %v4808_v18 }
0x1b2e   : > { %v2678_v17 = vmul.f32 %v4035_v49, %v4810_v22 }
0x1b2f   : > { %v2660_v28 = vrot.slane %v2659_v10, 4  ;;  %v2679_v35 = vsel %vm148_vm0, %v2677_v12, 0.0 }
0x1b30   : > { %v2680_v50 = vsel %vm148_vm0, %v2678_v17, 0.0 }
0x1b31   : > { %v2661_v23 = vadd.f32 %v2660_v28, %v2659_v10  ;;  %v2681_v51 = vadd.f32 %v2680_v50, %v2679_v35 }
0x1b33   : > { %v2662_v31 = vrot.slane %v2661_v23, 2  ;;  %v2682_v52 = vrot.slane %v2681_v51, 4 }
0x1b35   : > { %v2663_v54 = vadd.f32 %v2662_v31, %v2661_v23  ;;  %v2683_v34 = vadd.f32 %v2682_v52, %v2681_v51 }
0x1b37   : > { %v2664_v55 = vrot.slane %v2663_v54, 1  ;;  %v2684_v57 = vrot.slane %v2683_v34, 2 }
0x1b39   : > { %v2665_v58 = vadd.f32 %v2664_v55, %v2663_v54  ;;  %v2685_v61 = vadd.f32 %v2684_v57, %v2683_v34 }
0x1b3b   : > { %4036 = vrcp.f32 %v2665_v58  ;;  %v2686_v62 = vrot.slane %v2685_v61, 1 }
0x1b3d   : > { %v2687_v42 = vadd.f32 %v2686_v62, %v2685_v61 }
0x1b3f   : > { %4038 = vrcp.f32 %v2687_v42 }
0x1b45   : > { %v4037_v63 = vpop.eup %4036 }
0x1b46   : > { %v2690_v53 = vmul.f32 %v4037_v63, %v4804_v15  ;;  %v2689_v56 = vmul.f32 %v4037_v63, %v4802_v8 }
0x1b48   : > { %v2694_v59 = vsel %vm148_vm0, %v2690_v53, 0.0  ;;  %v2691_v2 = vsel %vm148_vm0, %v2689_v56, 0.0 }
0x1b49   : > { %v4039_v27 = vpop.eup %4038  ;;  %2695 = vadd.xlane.f32.xlu1 %v2694_v59  ;;  %2692 = vadd.xlane.f32.xlu0 %v2691_v2 }
0x1b4a   : > { %v2712_v4 = vmul.f32 %v4039_v27, %v4810_v22  ;;  %v2711_v7 = vmul.f32 %v4039_v27, %v4808_v18 }
0x1b4c   : > { %v2716_v60 = vsel %vm148_vm0, %v2712_v4, 0.0  ;;  %v2713_v9 = vsel %vm148_vm0, %v2711_v7, 0.0 }
0x1b4d   : > { %2717 = vadd.xlane.f32.xlu1 %v2716_v60  ;;  %2714 = vadd.xlane.f32.xlu0 %v2713_v9 }
0x1bd6   : > { %v2693_v13 = vpop.xlane.xlu0 %2692  ;;  %v2696_v3 = vpop.xlane.xlu1 %2695 }
0x1bd7   : > { %4040 = vrcp.f32 %v2693_v13 }
0x1bd8   : > { %4042 = vrcp.f32 %v2696_v3 }
0x1bda   : > { %v2715_v47 = vpop.xlane.xlu0 %2714  ;;  %v2718_v46 = vpop.xlane.xlu1 %2717 }
0x1bdb   : > { %4044 = vrcp.f32 %v2715_v47 }
0x1bdc   : > { %4046 = vrcp.f32 %v2718_v46 }
0x1be1   : > { %v4041_v39 = vpop.eup %4040 }
0x1be2   : > { %v4043_v19 = vpop.eup %4042  ;;  %v2699_v6 = vmul.f32 %v4041_v39, %v4802_v8 }
0x1be3   : > { %v2700_v20 = vmul.f32 %v4043_v19, %v4804_v15 }
0x1be4   : > { %v2701_v14 = vsel %vm148_vm0, %v2699_v6, 0.0 }
0x1be5   : > { %v4045_v21 = vpop.eup %4044  ;;  %v2702_v24 = vsel %vm148_vm0, %v2700_v20, 0.0 }
0x1be6   : > { %v4047_v26 = vpop.eup %4046  ;;  %v2703_v41 = vadd.f32 %v2702_v24, %v2701_v14  ;;  %v2721_v30 = vmul.f32 %v4045_v21, %v4808_v18 }
0x1be7   : > { %v2722_v11 = vmul.f32 %v4047_v26, %v4810_v22 }
0x1be8   : > { %v2704_v32 = vrot.slane %v2703_v41, 4  ;;  %v2723_v5 = vsel %vm148_vm0, %v2721_v30, 0.0 }
0x1be9   : > { %v2724_v16 = vsel %vm148_vm0, %v2722_v11, 0.0 }
0x1bea   : > { %v2705_v33 = vadd.f32 %v2704_v32, %v2703_v41  ;;  %v2725_v37 = vadd.f32 %v2724_v16, %v2723_v5 }
0x1bec   : > { %v2706_v25 = vrot.slane %v2705_v33, 2  ;;  %v2726_v29 = vrot.slane %v2725_v37, 4 }
0x1bee   : > { %v2707_v36 = vadd.f32 %v2706_v25, %v2705_v33  ;;  %v2727_v38 = vadd.f32 %v2726_v29, %v2725_v37 }
0x1bf0   : > { %v2708_v40 = vrot.slane %v2707_v36, 1  ;;  %v2728_v49 = vrot.slane %v2727_v38, 2 }
0x1bf2   : > { %v2709_v10 = vadd.f32 %v2708_v40, %v2707_v36  ;;  %v2729_v12 = vadd.f32 %v2728_v49, %v2727_v38 }
0x1bf4   : > { %4048 = vrcp.f32 %v2709_v10  ;;  %v2730_v17 = vrot.slane %v2729_v12, 1 }
0x1bf6   : > { %v2731_v28 = vadd.f32 %v2730_v17, %v2729_v12 }
0x1bf8   : > { %4050 = vrcp.f32 %v2731_v28 }
0x1bfe   : > { %v4049_v35 = vpop.eup %4048 }
0x1bff   : > { %v2734_v50 = vmul.f32 %v4049_v35, %v4804_v15  ;;  %v2733_v23 = vmul.f32 %v4049_v35, %v4802_v8 }
0x1c01   : > { %v2738_v51 = vsel %vm148_vm0, %v2734_v50, 0.0  ;;  %v2735_v31 = vsel %vm148_vm0, %v2733_v23, 0.0 }
0x1c02   : > { %v4051_v52 = vpop.eup %4050  ;;  %2739 = vadd.xlane.f32.xlu1 %v2738_v51  ;;  %2736 = vadd.xlane.f32.xlu0 %v2735_v31 }
0x1c03   : > { %v2756_v54 = vmul.f32 %v4051_v52, %v4810_v22  ;;  %v2755_v34 = vmul.f32 %v4051_v52, %v4808_v18 }
0x1c05   : > { %v2760_v55 = vsel %vm148_vm0, %v2756_v54, 0.0  ;;  %v2757_v57 = vsel %vm148_vm0, %v2755_v34, 0.0 }
0x1c06   : > { %2761 = vadd.xlane.f32.xlu1 %v2760_v55  ;;  %2758 = vadd.xlane.f32.xlu0 %v2757_v57 }
0x1c8f   : > { %v2737_v58 = vpop.xlane.xlu0 %2736  ;;  %v2740_v61 = vpop.xlane.xlu1 %2739 }
0x1c90   : > { %4052 = vrcp.f32 %v2737_v58 }
0x1c91   : > { %4054 = vrcp.f32 %v2740_v61 }
0x1c93   : > { %v2759_v62 = vpop.xlane.xlu0 %2758  ;;  %v2762_v42 = vpop.xlane.xlu1 %2761 }
0x1c94   : > { %4056 = vrcp.f32 %v2759_v62 }
0x1c95   : > { %4058 = vrcp.f32 %v2762_v42 }
0x1c9a   : > { %v4053_v63 = vpop.eup %4052 }
0x1c9b   : > { %v4055_v53 = vpop.eup %4054  ;;  %v2743_v56 = vmul.f32 %v4053_v63, %v4802_v8 }
0x1c9c   : > { %v2744_v59 = vmul.f32 %v4055_v53, %v4804_v15 }
0x1c9d   : > { %v2745_v2 = vsel %vm148_vm0, %v2743_v56, 0.0 }
0x1c9e   : > { %v4057_v27 = vpop.eup %4056  ;;  %v2746_v4 = vsel %vm148_vm0, %v2744_v59, 0.0 }
0x1c9f   : > { %v4059_v7 = vpop.eup %4058  ;;  %v2747_v60 = vadd.f32 %v2746_v4, %v2745_v2  ;;  %v2765_v9 = vmul.f32 %v4057_v27, %v4808_v18 }
0x1ca0   : > { %v2766_v13 = vmul.f32 %v4059_v7, %v4810_v22 }
0x1ca1   : > { %v2748_v3 = vrot.slane %v2747_v60, 4  ;;  %v2767_v47 = vsel %vm148_vm0, %v2765_v9, 0.0 }
0x1ca2   : > { %v2768_v46 = vsel %vm148_vm0, %v2766_v13, 0.0 }
0x1ca3   : > { %v2749_v39 = vadd.f32 %v2748_v3, %v2747_v60  ;;  %v2769_v19 = vadd.f32 %v2768_v46, %v2767_v47 }
0x1ca5   : > { %v2750_v6 = vrot.slane %v2749_v39, 2  ;;  %v2770_v20 = vrot.slane %v2769_v19, 4 }
0x1ca7   : > { %v2751_v14 = vadd.f32 %v2750_v6, %v2749_v39  ;;  %v2771_v21 = vadd.f32 %v2770_v20, %v2769_v19 }
0x1ca9   : > { %v2752_v24 = vrot.slane %v2751_v14, 1  ;;  %v2772_v26 = vrot.slane %v2771_v21, 2 }
0x1cab   : > { %v2753_v41 = vadd.f32 %v2752_v24, %v2751_v14  ;;  %v2773_v30 = vadd.f32 %v2772_v26, %v2771_v21 }
0x1cad   : > { %4060 = vrcp.f32 %v2753_v41  ;;  %v2774_v11 = vrot.slane %v2773_v30, 1 }
0x1caf   : > { %v2775_v32 = vadd.f32 %v2774_v11, %v2773_v30 }
0x1cb1   : > { %4062 = vrcp.f32 %v2775_v32 }
0x1cb7   : > { %v4061_v5 = vpop.eup %4060 }
0x1cb8   : > { %v2778_v16 = vmul.f32 %v4061_v5, %v4804_v15  ;;  %v2777_v33 = vmul.f32 %v4061_v5, %v4802_v8 }
0x1cba   : > { %v2782_v37 = vsel %vm148_vm0, %v2778_v16, 0.0  ;;  %v2779_v25 = vsel %vm148_vm0, %v2777_v33, 0.0 }
0x1cbb   : > { %v4063_v29 = vpop.eup %4062  ;;  %2783 = vadd.xlane.f32.xlu1 %v2782_v37  ;;  %2780 = vadd.xlane.f32.xlu0 %v2779_v25 }
0x1cbc   : > { %v2800_v36 = vmul.f32 %v4063_v29, %v4810_v22  ;;  %v2799_v38 = vmul.f32 %v4063_v29, %v4808_v18 }
0x1cbe   : > { %v2804_v40 = vsel %vm148_vm0, %v2800_v36, 0.0  ;;  %v2801_v49 = vsel %vm148_vm0, %v2799_v38, 0.0 }
0x1cbf   : > { %2805 = vadd.xlane.f32.xlu1 %v2804_v40  ;;  %2802 = vadd.xlane.f32.xlu0 %v2801_v49 }
0x1d48   : > { %v2781_v10 = vpop.xlane.xlu0 %2780  ;;  %v2784_v12 = vpop.xlane.xlu1 %2783 }
0x1d49   : > { %4064 = vrcp.f32 %v2781_v10 }
0x1d4a   : > { %4066 = vrcp.f32 %v2784_v12 }
0x1d4c   : > { %v2803_v17 = vpop.xlane.xlu0 %2802  ;;  %v2806_v28 = vpop.xlane.xlu1 %2805 }
0x1d4d   : > { %4068 = vrcp.f32 %v2803_v17 }
0x1d4e   : > { %4070 = vrcp.f32 %v2806_v28 }
0x1d53   : > { %v4065_v35 = vpop.eup %4064 }
0x1d54   : > { %v4067_v50 = vpop.eup %4066  ;;  %v2787_v23 = vmul.f32 %v4065_v35, %v4802_v8 }
0x1d55   : > { %v2788_v51 = vmul.f32 %v4067_v50, %v4804_v15 }
0x1d56   : > { %v2789_v31 = vsel %vm148_vm0, %v2787_v23, 0.0 }
0x1d57   : > { %v4069_v52 = vpop.eup %4068  ;;  %v2790_v54 = vsel %vm148_vm0, %v2788_v51, 0.0 }
0x1d58   : > { %v4071_v34 = vpop.eup %4070  ;;  %v2791_v55 = vadd.f32 %v2790_v54, %v2789_v31  ;;  %v2809_v57 = vmul.f32 %v4069_v52, %v4808_v18 }
0x1d59   : > { %v2810_v58 = vmul.f32 %v4071_v34, %v4810_v22 }
0x1d5a   : > { %v2792_v61 = vrot.slane %v2791_v55, 4  ;;  %v2811_v62 = vsel %vm148_vm0, %v2809_v57, 0.0 }
0x1d5b   : > { %v2812_v42 = vsel %vm148_vm0, %v2810_v58, 0.0 }
0x1d5c   : > { %v2793_v63 = vadd.f32 %v2792_v61, %v2791_v55  ;;  %v2813_v53 = vadd.f32 %v2812_v42, %v2811_v62 }
0x1d5e   : > { %v2794_v56 = vrot.slane %v2793_v63, 2  ;;  %v2814_v59 = vrot.slane %v2813_v53, 4 }
0x1d60   : > { %v2795_v2 = vadd.f32 %v2794_v56, %v2793_v63  ;;  %v2815_v27 = vadd.f32 %v2814_v59, %v2813_v53  ;;  %v3862_v63 = vpack.c.bf16 (%p2415_p10), %v4642_v43, %v4644_v44  ;;  %v3866_v56 = vpack.c.bf16 (%p2415_p10), %v4778_v45, %v4780_v48 }
0x1d62   : > { %v2796_v4 = vrot.slane %v2795_v2, 1  ;;  %v2816_v7 = vrot.slane %v2815_v27, 2  ;;  %3863 = vmatprep.subr.bf16.mxu1 (%p2415_p10), %v3862_v63 }
0x1d63   :  { %3865 = vmatpush3.bf16.msra.mxu1 (%p2415_p10), %v3862_v63 }
0x1d64   : > { %v2797_v60 = vadd.f32 %v2796_v4, %v2795_v2  ;;  %v2817_v9 = vadd.f32 %v2816_v7, %v2815_v27  ;;  %3867 = vmatprep.subr.bf16.mxu1 (%p2415_p10), %v3866_v56 }
0x1d66   : > { %4072 = vrcp.f32 %v2797_v60  ;;  %v2818_v13 = vrot.slane %v2817_v9, 1 }
0x1d68   : > { %v2819_v3 = vadd.f32 %v2818_v13, %v2817_v9 }
0x1d6a   : > { %4074 = vrcp.f32 %v2819_v3 }
0x1d70   : > { %v4073_v47 = vpop.eup %4072 }
0x1d71   : > { %v2822_v46 = vmul.f32 %v4073_v47, %v4804_v15  ;;  %v2821_v39 = vmul.f32 %v4073_v47, %v4802_v8 }
0x1d73   : > { %v2826_v19 = vsel %vm148_vm0, %v2822_v46, 0.0  ;;  %v2823_v6 = vsel %vm148_vm0, %v2821_v39, 0.0 }
0x1d74   : > { %v4075_v20 = vpop.eup %4074  ;;  %2827 = vadd.xlane.f32.xlu1 %v2826_v19  ;;  %2824 = vadd.xlane.f32.xlu0 %v2823_v6 }
0x1d75   : > { %v2844_v14 = vmul.f32 %v4075_v20, %v4810_v22  ;;  %v2843_v21 = vmul.f32 %v4075_v20, %v4808_v18 }
0x1d77   : > { %v2848_v24 = vsel %vm148_vm0, %v2844_v14, 0.0  ;;  %v2845_v26 = vsel %vm148_vm0, %v2843_v21, 0.0 }
0x1d78   : > { %2849 = vadd.xlane.f32.xlu1 %v2848_v24  ;;  %2846 = vadd.xlane.f32.xlu0 %v2845_v26 }
0x1e01   : > { %v2825_v41 = vpop.xlane.xlu0 %2824  ;;  %v2828_v30 = vpop.xlane.xlu1 %2827 }
0x1e02   : > { %4076 = vrcp.f32 %v2825_v41 }
0x1e03   : > { %4078 = vrcp.f32 %v2828_v30 }
0x1e05   : > { %v2847_v11 = vpop.xlane.xlu0 %2846  ;;  %v2850_v32 = vpop.xlane.xlu1 %2849 }
0x1e06   : > { %4080 = vrcp.f32 %v2847_v11 }
0x1e07   : > { %4082 = vrcp.f32 %v2850_v32 }
0x1e0c   : > { %v4077_v5 = vpop.eup %4076 }
0x1e0d   : > { %v4079_v16 = vpop.eup %4078  ;;  %v2831_v33 = vmul.f32 %v4077_v5, %v4802_v8 }
0x1e0e   : > { %v2832_v37 = vmul.f32 %v4079_v16, %v4804_v15 }
0x1e0f   : > { %v2833_v25 = vsel %vm148_vm0, %v2831_v33, 0.0 }
0x1e10   : > { %v4081_v29 = vpop.eup %4080  ;;  %v2834_v36 = vsel %vm148_vm0, %v2832_v37, 0.0 }
0x1e11   : > { %v4083_v38 = vpop.eup %4082  ;;  %v2835_v40 = vadd.f32 %v2834_v36, %v2833_v25  ;;  %v2853_v49 = vmul.f32 %v4081_v29, %v4808_v18 }
0x1e12   : > { %v2854_v10 = vmul.f32 %v4083_v38, %v4810_v22 }
0x1e13   : > { %v2836_v12 = vrot.slane %v2835_v40, 4  ;;  %v2855_v17 = vsel %vm148_vm0, %v2853_v49, 0.0 }
0x1e14   : > { %v2856_v28 = vsel %vm148_vm0, %v2854_v10, 0.0 }
0x1e15   : > { %v2837_v35 = vadd.f32 %v2836_v12, %v2835_v40  ;;  %v2857_v50 = vadd.f32 %v2856_v28, %v2855_v17 }
0x1e17   : > { %v2838_v23 = vrot.slane %v2837_v35, 2  ;;  %v2858_v51 = vrot.slane %v2857_v50, 4 }
0x1e19   : > { %v2839_v31 = vadd.f32 %v2838_v23, %v2837_v35  ;;  %v2859_v52 = vadd.f32 %v2858_v51, %v2857_v50 }
0x1e1b   : > { %v2840_v54 = vrot.slane %v2839_v31, 1  ;;  %v2860_v34 = vrot.slane %v2859_v52, 2 }
0x1e1d   : > { %v2841_v55 = vadd.f32 %v2840_v54, %v2839_v31  ;;  %v2861_v57 = vadd.f32 %v2860_v34, %v2859_v52 }
0x1e1f   : > { %4084 = vrcp.f32 %v2841_v55  ;;  %v2862_v58 = vrot.slane %v2861_v57, 1 }
0x1e21   : > { %v2863_v61 = vadd.f32 %v2862_v58, %v2861_v57 }
0x1e23   : > { %4086 = vrcp.f32 %v2863_v61 }
0x1e28   :  { %2417 = sbr.rel (!%p2415_p10) target bundleno = 5869 (0x16ed), region = 111 }
0x1e29   : > { %v4085_v62 = vpop.eup %4084  }
0x1e2a   : > { %v5062_v29 = vmov %v4085_v62  ;;  %v2867_v53 = vmul.f32 (%p2415_p10), %v4085_v62, %v2831_v33  ;;  %v2868_v59 = vmul.f32 (%p2415_p10), %v4085_v62, %v2832_v37 }
0x1e2c   :  { %3656 = vmatprep.mubr.msk.f32.mxu1 (%p2415_p10), %vm148_vm0, %v2867_v53 }
0x1e2d   : > { %v4087_v42 = vpop.eup %4086   ;;  %3657 = vmatmul.mubr.msk.f32.vlgmr.msra.gmra.mrb[26].mxu1 (%p2415_p10), %vm148_vm0, %v2868_v59 }
0x1e2e   : > { %v5061_v25 = vmov %v4087_v42  ;;  %v3005_v2 = vmul.f32 (%p2415_p10), %v4087_v42, %v2853_v49  ;;  %v3006_v27 = vmul.f32 (%p2415_p10), %v4087_v42, %v2854_v10  ;;  %3869 = vmatpush3.bf16.msra.mxu1 (%p2415_p10), %v3866_v56 }
0x1e30   :  { %3663 = vmatprep.mubr.msk.f32.mxu1 %vm148_vm0, %v3005_v2 }
0x1e31   :  { %3664 = vmatmul.mubr.msk.f32.vlgmr.msra.gmra.mrb[28].mxu1 %vm148_vm0, %v3006_v27 }
0x1f00   :  { %v3658_v43 = vpop.f32.mrb[26].mxu1 }
0x1f01   :  { %vm2951_vm10 = vcmp.ne.f32.partialorder %v3658_v43, %v3658_v43  ;;  %v2941_v44 = vpop.f32.mrb[27].mxu1 }
0x1f02   :  { %vm2950_vm11 = vcmp.ne.f32.partialorder %v2941_v44, %v2941_v44  ;;  %v2953_v45 = vsel %vm2951_vm10, 0.0, %v3658_v43 }
0x1f03   :  { %v2952_v48 = vsel %vm2950_vm11, 0.0, %v2941_v44  ;;  %v3241_v22 = vclamps-f32 %v2953_v45, 3.4028235e+38 }
0x1f04   :  { %v3665_v8 = vpop.f32.mrb[28].mxu1  ;;  %v3240_v15 = vclamps-f32 %v2952_v48, 3.4028235e+38 }
0x1f05   :  { %vm3089_vm12 = vcmp.ne.f32.partialorder %v3665_v8, %v3665_v8  ;;  %v3079_v18 = vpop.f32.mrb[29].mxu1  ;;  %v2961_v47 = vsel %vm251_vm3, %v3241_v22, 0.0 }
0x1f06   :  { %vm3088_vm13 = vcmp.ne.f32.partialorder %v3079_v18, %v3079_v18  ;;  %v2958_v4 = vsel %vm251_vm3, %v3240_v15, 0.0  ;;  %v3091_v7 = vsel %vm3089_vm12, 0.0, %v3665_v8 }
0x1f07   :  { %v3090_v60 = vsel %vm3088_vm13, 0.0, %v3079_v18  ;;  %2959 = vadd.xlane.f32.xlu0 %v2958_v4  ;;  %v3247_v13 = vclamps-f32 %v3091_v7, 3.4028235e+38 }
0x1f08   :  { %v3246_v9 = vclamps-f32 %v3090_v60, 3.4028235e+38 }
0x1f09   :  { %v3099_v46 = vsel %vm251_vm3, %v3247_v13, 0.0 }
0x1f0a   :  { %v3096_v3 = vsel %vm251_vm3, %v3246_v9, 0.0 }
0x1f0b   :  { %3097 = vadd.xlane.f32.xlu1 %v3096_v3  ;;  %2962 = vadd.xlane.f32.xlu0 %v2961_v47 }
0x1f0f   :  { %3100 = vadd.xlane.f32.xlu1 %v3099_v46 }
0x1f94   :  { %v2960_v39 = vpop.xlane.xlu0 %2959 }
0x1f95   :  { %v2965_v19 = vmul.f32 0.015625, %v2960_v39 }
0x1f97   :  { %v2967_v6 = vsub.f32 %v3240_v15, %v2965_v19 }
0x1f98   :  { %v3098_v20 = vpop.xlane.xlu1 %3097  ;;  %v2963_v14 = vpop.xlane.xlu0 %2962 }
0x1f99   :  { %v3102_v21 = vmul.f32 0.015625, %v3098_v20  ;;  %v2966_v24 = vmul.f32 0.015625, %v2963_v14  ;;  %v2969_v26 = vmul.f32 %v2967_v6, %v2967_v6 }
0x1f9b   :  { %v3104_v41 = vsub.f32 %v3246_v9, %v3102_v21  ;;  %v2968_v30 = vsub.f32 %v3241_v22, %v2966_v24  ;;  %v2971_v11 = vsel %vm251_vm3, %v2969_v26, 0.0 }
0x1f9c   :  { %v3101_v32 = vpop.xlane.xlu1 %3100  ;;  %2972 = vadd.xlane.f32.xlu0 %v2971_v11 }
0x1f9d   :  { %v3103_v5 = vmul.f32 0.015625, %v3101_v32  ;;  %v3106_v16 = vmul.f32 %v3104_v41, %v3104_v41  ;;  %v2970_v33 = vmul.f32 %v2968_v30, %v2968_v30 }
0x1f9f   :  { %v3105_v37 = vsub.f32 %v3247_v13, %v3103_v5  ;;  %v3108_v25 = vsel %vm251_vm3, %v3106_v16, 0.0  ;;  %v2974_v29 = vsel %vm251_vm3, %v2970_v33, 0.0 }
0x1fa0   :  { %3109 = vadd.xlane.f32.xlu0 %v3108_v25  ;;  %2975 = vadd.xlane.f32.xlu1 %v2974_v29 }
0x1fa1   :  { %v3107_v36 = vmul.f32 %v3105_v37, %v3105_v37 }
0x1fa3   :  { %v3111_v38 = vsel %vm251_vm3, %v3107_v36, 0.0 }
0x1fa4   :  { %3112 = vadd.xlane.f32.xlu1 %v3111_v38 }
0x2029   :  { %v2973_v40 = vpop.xlane.xlu0 %2972 }
0x202a   :  { %v2977_v49 = vmul.f32 0.015625, %v2973_v40 }
0x202c   :  { %v2979_v10 = vadd.f32 1e-05, %v2977_v49 }
0x202d   :  { %v2976_v12 = vpop.xlane.xlu1 %2975  ;;  %v3110_v17 = vpop.xlane.xlu0 %3109 }
0x202e   :  { %4088 = vrsqrt.f32 %v2979_v10  ;;  %v2978_v28 = vmul.f32 0.015625, %v2976_v12  ;;  %v3114_v35 = vmul.f32 0.015625, %v3110_v17 }
0x2030   :  { %v2980_v50 = vadd.f32 1e-05, %v2978_v28  ;;  %v3116_v23 = vadd.f32 1e-05, %v3114_v35 }
0x2031   :  { %v3113_v51 = vpop.xlane.xlu1 %3112 }
0x2032   :  { %4090 = vrsqrt.f32 %v2980_v50  ;;  %v3115_v31 = vmul.f32 0.015625, %v3113_v51 }
0x2033   :  { %4092 = vrsqrt.f32 %v3116_v23 }
0x2034   :  { %v3117_v52 = vadd.f32 1e-05, %v3115_v31 }
0x2036   :  { %4094 = vrsqrt.f32 %v3117_v52 }
0x2038   :  { %v4089_v54 = vpop.eup %4088 }
0x2039   :  { %v2983_v34 = vmul.f32 %v4089_v54, %v2967_v6 }
0x203b   :  { %v2991_v55 = vmul.f32 %v4361_v0, %v2983_v34 }
0x203c   :  { %v4091_v57 = vpop.eup %4090 }
0x203d   :  { %v4093_v58 = vpop.eup %4092  ;;  %v2984_v61 = vmul.f32 %v4091_v57, %v2968_v30  ;;  %v2999_v62 = vadd.f32 %v4366_v1, %v2991_v55 }
0x203e   :  { %v3120_v42 = vmul.f32 %v4093_v58, %v3104_v41 }
0x203f   :  { %v2992_v63 = vmul.f32 %v4361_v0, %v2984_v61  ;;  %3001 = vst.msk [vmem:[#allocation8] sm:$0xff] %vm251_vm3, %v2999_v62 }
0x2040   :  { %v4095_v53 = vpop.eup %4094  ;;  %v3122_v56 = vmul.f32 %v4361_v0, %v3120_v42 }
0x2041   :  { %v3000_v59 = vadd.f32 %v4366_v1, %v2992_v63  ;;  %v3121_v2 = vmul.f32 %v4095_v53, %v3105_v37 }
0x2042   :  { %v3124_v27 = vadd.f32 %v4366_v1, %v3122_v56 }
0x2043   :  { %3002 = vst.msk [vmem:[#allocation8 + $0x8] sm:$0xff] %vm251_vm3, %v3000_v59  ;;  %v3123_v43 = vmul.f32 %v4361_v0, %v3121_v2 }
0x2044   :  { %3127 = vst.msk [vmem:[#allocation8 + $0x10] sm:$0xff] %vm251_vm3, %v3124_v27 }
0x2045   :  { %v3125_v44 = vadd.f32 %v4366_v1, %v3123_v43 }
0x2047   :  { %3128 = vst.msk [vmem:[#allocation8 + $0x18] sm:$0xff] %vm251_vm3, %v3125_v44 }
0x2048   :  { %4173 = shalt.err (!%p4170_p1)
}
0x2049   :  { %s4174_s21 = scalar_lea.hbm %s5050_s17, 512 }
0x204a   :  { %p4175_p2 = scmp.ne.s32.totalorder %s5050_s17, %s4174_s21  ;;  %p4178_p3 = scmp.lt.u32.totalorder %s4174_s21, %s5050_s17 }
0x204c   :  { %p4180_p4 = pnand %p4178_p3, %p4175_p2 }
0x204e   :  { %4183 = shalt.err (!%p4180_p4)
}
0x204f   :  { %3140 = dma.vmem_to_hbm [thread:$0]  %s3135_s27, 512, %s5050_s17, [#allocation4], %s4216_s4, %s4216_s4, %s4217_s25  }
0x2050   :  { %4200 = dma.done.wait [#allocation4], 512  }
0x2051   :  { %4201 = vsyncadd [#allocation4], 4294966784 }
0x2052   :  { %3144 = vsyncpa [#allocation3], 1 }
0x2053   :  { %3145 = vsyncpa [#allocation6], 1 }
0x2054   :  { %3146 = vsyncpa [#allocation4], 1 }

</bundles_post_ra>
